<compile_context>
chip_gen: v7x
topology: tpu7x:2x2x1
jax: 0.10.0
libtpu: 0.0.40
codegen_flags: <defaults>
</compile_context>

<pallas_src>
import functools

import jax
import jax.numpy as jnp
from jax.experimental import pallas as pl
from jax.experimental.pallas import tpu as pltpu


# ---------------------------------------------------------------------------
# helpers
# ---------------------------------------------------------------------------

def _round8(x):
    return ((x + 7) // 8) * 8


def _pick_tm(M, tm):
    """Largest multiple-of-8 row tile <= tm that still yields >= 2 grid steps."""
    half = _round8((M + 1) // 2)
    return max(8, min(tm, half))


# ---------------------------------------------------------------------------
# Pallas kernels: dense / LN+dense / mask
# ---------------------------------------------------------------------------

def _dense_kernel(x_ref, w_ref, b_ref, o_ref, *, activation):
    y = jnp.dot(x_ref[...], w_ref[...], preferred_element_type=jnp.float32) + b_ref[...]
    if activation == "relu":
        y = jnp.maximum(y, 0.0)
    o_ref[...] = y.astype(o_ref.dtype)


def dense(x, w, b=None, activation=None, out_dtype=None, tm=512):
    """y = act(x @ w + b).  x: (M, K) bf16, w: (K, N) bf16, b: (N,) f32."""
    M, K = x.shape
    N = w.shape[1]
    if b is None:
        b = jnp.zeros((N,), jnp.float32)
    if out_dtype is None:
        out_dtype = x.dtype
    tm_eff = _pick_tm(M, tm)
    return pl.pallas_call(
        functools.partial(_dense_kernel, activation=activation),
        out_shape=jax.ShapeDtypeStruct((M, N), out_dtype),
        grid=(pl.cdiv(M, tm_eff),),
        in_specs=[
            pl.BlockSpec((tm_eff, K), lambda i: (i, 0)),
            pl.BlockSpec((K, N), lambda i: (0, 0)),
            pl.BlockSpec((1, N), lambda i: (0, 0)),
        ],
        out_specs=pl.BlockSpec((tm_eff, N), lambda i: (i, 0)),
        compiler_params=pltpu.CompilerParams(dimension_semantics=("parallel",)),
    )(x, w, b.reshape(1, N).astype(jnp.float32))


def _ln_dense_kernel(x_ref, g_ref, b_ref, w_ref, wb_ref, o_ref, *, eps):
    x = x_ref[...].astype(jnp.float32)
    mean = jnp.mean(x, axis=-1, keepdims=True)
    var = jnp.mean(jnp.square(x - mean), axis=-1, keepdims=True)
    xn = (x - mean) * jax.lax.rsqrt(var + eps) * g_ref[...] + b_ref[...]
    y = jnp.dot(xn.astype(w_ref.dtype), w_ref[...],
                preferred_element_type=jnp.float32) + wb_ref[...]
    o_ref[...] = y.astype(o_ref.dtype)


def ln_dense(x, g, b, w, wb, eps=1e-5, out_dtype=None, tm=512):
    """Fused row-wise LayerNorm followed by 1x1 conv.  x: (M, C) bf16, w: (C, N) bf16."""
    M, C = x.shape
    N = w.shape[1]
    if out_dtype is None:
        out_dtype = x.dtype
    tm_eff = _pick_tm(M, tm)
    return pl.pallas_call(
        functools.partial(_ln_dense_kernel, eps=eps),
        out_shape=jax.ShapeDtypeStruct((M, N), out_dtype),
        grid=(pl.cdiv(M, tm_eff),),
        in_specs=[
            pl.BlockSpec((tm_eff, C), lambda i: (i, 0)),
            pl.BlockSpec((1, C), lambda i: (0, 0)),
            pl.BlockSpec((1, C), lambda i: (0, 0)),
            pl.BlockSpec((C, N), lambda i: (0, 0)),
            pl.BlockSpec((1, N), lambda i: (0, 0)),
        ],
        out_specs=pl.BlockSpec((tm_eff, N), lambda i: (i, 0)),
        compiler_params=pltpu.CompilerParams(dimension_semantics=("parallel",)),
    )(x, g.reshape(1, C).astype(jnp.float32), b.reshape(1, C).astype(jnp.float32),
      w, wb.reshape(1, N).astype(jnp.float32))


def _mask_mul_kernel(y_ref, wenc_ref, wm_ref, bm_ref, o_ref):
    m = jnp.dot(y_ref[...], wm_ref[...], preferred_element_type=jnp.float32) + bm_ref[...]
    m = jnp.maximum(m, 0.0)
    o_ref[...] = (m * wenc_ref[...].astype(jnp.float32)).astype(o_ref.dtype)


def mask_apply(y2, wenc2, wm, bm, out_dtype=None, tm=512):
    """[S1|S2|S3] = wenc * relu(y @ Wm + bm).  y2: (M, P), wenc2: (M, 3F)."""
    M, Pc = y2.shape
    N = wm.shape[1]
    if out_dtype is None:
        out_dtype = y2.dtype
    tm_eff = _pick_tm(M, tm)
    return pl.pallas_call(
        _mask_mul_kernel,
        out_shape=jax.ShapeDtypeStruct((M, N), out_dtype),
        grid=(pl.cdiv(M, tm_eff),),
        in_specs=[
            pl.BlockSpec((tm_eff, Pc), lambda i: (i, 0)),
            pl.BlockSpec((tm_eff, N), lambda i: (i, 0)),
            pl.BlockSpec((Pc, N), lambda i: (0, 0)),
            pl.BlockSpec((1, N), lambda i: (0, 0)),
        ],
        out_specs=pl.BlockSpec((tm_eff, N), lambda i: (i, 0)),
        compiler_params=pltpu.CompilerParams(dimension_semantics=("parallel",)),
    )(y2, wenc2, wm, bm.reshape(1, N).astype(jnp.float32))


# ---------------------------------------------------------------------------
# Pallas kernel: the whole TCN stack in ONE pallas_call
# ---------------------------------------------------------------------------

def _tcn_stack_kernel(dil_ref, y_ref, bias1_ref, w1_ref, g1_ref, be1_ref,
                      dw_ref, db_ref, g2_ref, be2_ref, w2_ref, b2_ref,
                      a1_ref, a2_ref, o_ref, yacc_ref, hpad_ref,
                      *, ksize, off, eps):
    """One TCN block per grid step; activation resident in f32 VMEM across blocks."""
    j = pl.program_id(1)
    nblk = pl.num_programs(1)
    T, _ = yacc_ref.shape
    H = hpad_ref.shape[1]

    @pl.when(j == 0)
    def _():
        yacc_ref[...] = y_ref[0].astype(jnp.float32)

    y0 = yacc_ref[...]

    # 1x1 conv (aux speaker embedding folded into the per-(block,batch) bias) + PReLU
    h = jnp.dot(y0.astype(jnp.bfloat16), w1_ref[0],
                preferred_element_type=jnp.float32) + bias1_ref[0, 0]
    a1 = a1_ref[j]
    h = jnp.where(h >= 0, h, a1 * h)

    # gLN #1: two-pass stats over (T, H)
    inv_n = 1.0 / float(T * H)
    mean = jnp.sum(h) * inv_n
    hc = h - mean
    var = jnp.sum(hc * hc) * inv_n
    h = hc * jax.lax.rsqrt(var + eps) * g1_ref[0] + be1_ref[0]

    # dilated depthwise conv ('same'), dilation read from SMEM, 8-aligned halo scratch
    d = dil_ref[j]
    zeros_halo = jnp.zeros((off, H), jnp.float32)
    hpad_ref[0:off, :] = zeros_halo
    hpad_ref[off + T:off + T + off, :] = zeros_halo
    hpad_ref[off:off + T, :] = h
    c = (ksize - 1) // 2
    acc = jnp.zeros((T, H), jnp.float32)
    for k in range(ksize):
        start = off if k == c else off + (k - c) * d
        acc = acc + hpad_ref[pl.ds(start, T), :] * dw_ref[0, k:k + 1, :]
    acc = acc + db_ref[0]
    a2 = a2_ref[j]
    h = jnp.where(acc >= 0, acc, a2 * acc)

    # gLN #2
    mean = jnp.sum(h) * inv_n
    hc = h - mean
    var = jnp.sum(hc * hc) * inv_n
    h = hc * jax.lax.rsqrt(var + eps) * g2_ref[0] + be2_ref[0]

    # 1x1 conv back to P channels + residual into resident accumulator
    out = jnp.dot(h.astype(jnp.bfloat16), w2_ref[0],
                  preferred_element_type=jnp.float32) + b2_ref[0]
    ynew = y0 + out
    yacc_ref[...] = ynew

    @pl.when(j == nblk - 1)
    def _():
        o_ref[0] = ynew.astype(o_ref.dtype)


def tcn_stack(y, tp, dilations, bias1, ksize, max_dil, eps=1e-5):
    """Fused 4*num_blocks TCN stack.  y: (B, T, P) bf16; bias1: (NBLK, B, 1, H) f32."""
    B, T, P = y.shape
    NBLK, _, H = tp["w1"].shape
    off = max(8, _round8(max_dil))
    kern = functools.partial(_tcn_stack_kernel, ksize=ksize, off=off, eps=eps)
    gs = pltpu.PrefetchScalarGridSpec(
        num_scalar_prefetch=1,                     # dilation schedule -> SMEM
        grid=(B, NBLK),
        in_specs=[
            pl.BlockSpec((1, T, P), lambda b, j, dil: (b, 0, 0)),          # y (resident per b)
            pl.BlockSpec((1, 1, 1, H), lambda b, j, dil: (j, b, 0, 0)),    # bias1 (aux folded)
            pl.BlockSpec((1, P, H), lambda b, j, dil: (j, 0, 0)),          # w1
            pl.BlockSpec((1, 1, H), lambda b, j, dil: (j, 0, 0)),          # gLN1 gamma
            pl.BlockSpec((1, 1, H), lambda b, j, dil: (j, 0, 0)),          # gLN1 beta
            pl.BlockSpec((1, ksize, H), lambda b, j, dil: (j, 0, 0)),      # depthwise weight
            pl.BlockSpec((1, 1, H), lambda b, j, dil: (j, 0, 0)),          # depthwise bias
            pl.BlockSpec((1, 1, H), lambda b, j, dil: (j, 0, 0)),          # gLN2 gamma
            pl.BlockSpec((1, 1, H), lambda b, j, dil: (j, 0, 0)),          # gLN2 beta
            pl.BlockSpec((1, H, P), lambda b, j, dil: (j, 0, 0)),          # w2
            pl.BlockSpec((1, 1, P), lambda b, j, dil: (j, 0, 0)),          # b2
            pl.BlockSpec(memory_space=pltpu.MemorySpace.SMEM),             # PReLU a1 (NBLK,)
            pl.BlockSpec(memory_space=pltpu.MemorySpace.SMEM),             # PReLU a2 (NBLK,)
        ],
        out_specs=pl.BlockSpec((1, T, P), lambda b, j, dil: (b, 0, 0)),
        scratch_shapes=[pltpu.VMEM((T, P), jnp.float32),                   # resident activation
                        pltpu.VMEM((T + 2 * off, H), jnp.float32)],        # dconv halo
    )
    return pl.pallas_call(
        kern,
        out_shape=jax.ShapeDtypeStruct((B, T, P), y.dtype),
        grid_spec=gs,
        compiler_params=pltpu.CompilerParams(
            dimension_semantics=("parallel", "arbitrary")),
    )(dilations, y, bias1, tp["w1"], tp["g1"], tp["be1"], tp["dw"], tp["db"],
      tp["g2"], tp["be2"], tp["w2"], tp["b2"], tp["a1"], tp["a2"])


# ---------------------------------------------------------------------------
# Pallas kernel: fused ResBlock (BN folded into the conv weights)
# ---------------------------------------------------------------------------

def _res_block_kernel(*refs, downsample):
    if downsample:
        x_ref, w1_ref, b1_ref, w2_ref, b2_ref, wd_ref, a_ref, o_ref = refs
    else:
        x_ref, w1_ref, b1_ref, w2_ref, b2_ref, a_ref, o_ref = refs
        wd_ref = None
    x = x_ref[0]                                                 # (T, Cin) bf16
    h = jnp.dot(x, w1_ref[...], preferred_element_type=jnp.float32) + b1_ref[...]
    h = jnp.where(h >= 0, h, a_ref[0] * h)
    h = jnp.dot(h.astype(jnp.bfloat16), w2_ref[...],
                preferred_element_type=jnp.float32) + b2_ref[...]
    if downsample:
        res = jnp.dot(x, wd_ref[...], preferred_element_type=jnp.float32)
    else:
        res = x.astype(jnp.float32)
    z = h + res
    z = jnp.where(z >= 0, z, a_ref[1] * z)
    o_ref[0] = z.astype(o_ref.dtype)


def res_block(x, p):
    """Fused ResBlock: conv1x1+BN+PReLU+conv1x1+BN (+downsample) +res+PReLU, then MaxPool(3)."""
    B, T, Cin = x.shape
    Cout = p["w1"].shape[1]
    downsample = "wd" in p
    args = [x, p["w1"], p["b1"].reshape(1, Cout), p["w2"], p["b2"].reshape(1, Cout)]
    in_specs = [
        pl.BlockSpec((1, T, Cin), lambda b: (b, 0, 0)),
        pl.BlockSpec((Cin, Cout), lambda b: (0, 0)),
        pl.BlockSpec((1, Cout), lambda b: (0, 0)),
        pl.BlockSpec((Cout, Cout), lambda b: (0, 0)),
        pl.BlockSpec((1, Cout), lambda b: (0, 0)),
    ]
    if downsample:
        args.append(p["wd"])
        in_specs.append(pl.BlockSpec((Cin, Cout), lambda b: (0, 0)))
    args.append(p["a"])
    in_specs.append(pl.BlockSpec(memory_space=pltpu.MemorySpace.SMEM))  # PReLU scalars
    z = pl.pallas_call(
        functools.partial(_res_block_kernel, downsample=downsample),
        out_shape=jax.ShapeDtypeStruct((B, T, Cout), x.dtype),
        grid=(B,),
        in_specs=in_specs,
        out_specs=pl.BlockSpec((1, T, Cout), lambda b: (b, 0, 0)),
        compiler_params=pltpu.CompilerParams(dimension_semantics=("parallel",)),
    )(*args)
    # MaxPool1d(kernel=3, stride=3).
    # TODO(synk): fuse the pool into the kernel epilogue (needs an in-kernel (T,C)->(T/3,3,C)
    #             relayout); kept in XLA glue at these tiny speaker-path sizes.
    Tp = (T // 3) * 3
    return z[:, :Tp].reshape(B, Tp // 3, 3, Cout).max(axis=2)


# ---------------------------------------------------------------------------
# Decoder glue
# ---------------------------------------------------------------------------

def decode_all(S, p, B, T, stride, ksizes):
    """Three ConvTranspose1d decoders: one block-diag matmul + shifted-add overlap-add."""
    F3 = S.shape[-1]
    contrib = dense(S.reshape(B * T, F3), p["w"], out_dtype=jnp.float32).reshape(B, T, -1)
    outs = []
    col = 0
    for i, K in enumerate(ksizes):
        c = contrib[:, :, col:col + K]
        col += K
        L_out = (T - 1) * stride + K
        if K % stride == 0:
            r = K // stride
            chunks = c.reshape(B, T, r, stride)
            total = jnp.zeros((B, L_out), jnp.float32)
            for j in range(r):
                seg = chunks[:, :, j, :].reshape(B, T * stride)
                total = total + jnp.pad(seg, ((0, 0), (j * stride, (r - 1 - j) * stride)))
        else:
            # TODO(synk): scatter overlap-add fallback for kernels not divisible by the hop.
            idx = (jnp.arange(T)[:, None] * stride + jnp.arange(K)[None, :]).reshape(-1)
            total = jnp.zeros((B, L_out), jnp.float32).at[:, idx].add(c.reshape(B, T * K))
        outs.append(total + p["b"][i])
    # TODO(synk): replace with a single Pallas overlap-add kernel for realistic audio lengths.
    return outs


def fix_len(x, L):
    x = x[:, :L]
    return jnp.pad(x, ((0, 0), (0, L - x.shape[1])))


# ---------------------------------------------------------------------------
# Parameter initialization (deterministic, synthetic; matmul weights in bf16)
# ---------------------------------------------------------------------------

def init_params(key, cfg):
    keys = iter(jax.random.split(key, 1024))
    nk = lambda: next(keys)
    ini = lambda shape, s=0.1: s * jax.random.normal(nk(), shape, jnp.float32)
    bf = lambda x: x.astype(jnp.bfloat16)

    F_, P, H, E = cfg["F"], cfg["P"], cfg["H"], cfg["E"]
    Ks, Km, Kl, Kt = cfg["Ks"], cfg["Km"], cfg["Kl"], cfg["Kt"]
    nb = cfg["num_blocks"]
    NBLK = 4 * nb

    # stacked TCN parameters (per-block leading axis; spk blocks get w1aux split out)
    tcn = {
        "w1": bf(ini((NBLK, P, H))),
        "b1": ini((NBLK, H)),
        "w1aux": ini((4, E, H)),
        "g1": jnp.ones((NBLK, 1, H), jnp.float32),
        "be1": jnp.zeros((NBLK, 1, H), jnp.float32),
        "dw": ini((NBLK, Kt, H)),
        "db": ini((NBLK, 1, H)),
        "g2": jnp.ones((NBLK, 1, H), jnp.float32),
        "be2": jnp.zeros((NBLK, 1, H), jnp.float32),
        "w2": bf(ini((NBLK, H, P))),
        "b2": ini((NBLK, 1, P)),
        "a1": jnp.full((NBLK,), 0.25, jnp.float32),
        "a2": jnp.full((NBLK,), 0.25, jnp.float32),
    }

    def resblock(cin, cout):
        # eval-mode BatchNorm (running_mean=0, running_var=1, gamma=1, beta=0) folded
        # into the conv weights/bias.
        def fold(w):
            scale = jax.lax.rsqrt(jnp.ones((cout,), jnp.float32) + 1e-5)
            return bf(w * scale[None, :]), jnp.zeros((cout,), jnp.float32)

        w1, b1 = fold(ini((cin, cout)))
        w2, b2 = fold(ini((cout, cout)))
        d = {"w1": w1, "b1": b1, "w2": w2, "b2": b2,
             "a": jnp.full((2,), 0.25, jnp.float32)}
        if cin != cout:
            d["wd"] = bf(ini((cin, cout)))
        return d

    # combined tri-encoder: zero-pad short/middle kernels to Kl rows -> one (Kl, 3F) matmul
    enc_w = jnp.zeros((Kl, 3 * F_), jnp.float32)
    enc_w = enc_w.at[:Ks, 0:F_].set(ini((Ks, F_)))
    enc_w = enc_w.at[:Km, F_:2 * F_].set(ini((Km, F_)))
    enc_w = enc_w.at[:, 2 * F_:].set(ini((Kl, F_)))

    # combined tri-decoder: block-diagonal (3F, Ks+Km+Kl)
    dec_w = jnp.zeros((3 * F_, Ks + Km + Kl), jnp.float32)
    dec_w = dec_w.at[0:F_, 0:Ks].set(ini((F_, Ks)))
    dec_w = dec_w.at[F_:2 * F_, Ks:Ks + Km].set(ini((F_, Km)))
    dec_w = dec_w.at[2 * F_:, Ks + Km:].set(ini((F_, Kl)))

    params = {
        "enc": {"w": bf(enc_w), "b": ini((3 * F_,))},
        "ln": {"g": jnp.ones((3 * F_,), jnp.float32), "b": jnp.zeros((3 * F_,), jnp.float32)},
        "ln_spk": {"g": jnp.ones((3 * F_,), jnp.float32), "b": jnp.zeros((3 * F_,), jnp.float32)},
        "proj": {"w": bf(ini((3 * F_, P))), "b": ini((P,))},
        "tcn": tcn,
        "mask": {"w": bf(ini((P, 3 * F_))), "b": ini((3 * F_,))},
        "dec": {"w": bf(dec_w), "b": ini((3,))},
        "spk_in": {"w": bf(ini((3 * F_, P))), "b": ini((P,))},
        "res1": resblock(P, P), "res2": resblock(P, H), "res3": resblock(H, H),
        "spk_out": {"w": bf(ini((H, E))), "b": ini((E,))},
        "head": {"w": bf(ini((E, cfg["num_spks"]))), "b": ini((cfg["num_spks"],))},
    }
    return params


# ---------------------------------------------------------------------------
# Full forward pass
# ---------------------------------------------------------------------------

def spex_plus_forward(params, cfg, audio_mix, audio_ref, len_ref):
    Ks, Km, Kl, Kt = cfg["Ks"], cfg["Km"], cfg["Kl"], cfg["Kt"]
    F_, P, H, E = cfg["F"], cfg["P"], cfg["H"], cfg["E"]
    nb = cfg["num_blocks"]
    stride = Ks // 2
    F3 = 3 * F_

    mix = audio_mix[:, 0, :].astype(jnp.float32)     # (B, L)
    ref = audio_ref[:, 0, :].astype(jnp.float32)
    B, L = mix.shape

    def encode(sig):
        """All three encoders as one framed matmul -> (B, T, 3F) = [w1|w2|w3]."""
        Bs, Lx = sig.shape
        T = (Lx - Ks) // stride + 1
        len3 = (T - 1) * stride + Kl
        sp = jnp.pad(sig, ((0, 0), (0, len3 - Lx))).astype(jnp.bfloat16)
        r = Kl // stride
        spr = sp.reshape(Bs, len3 // stride, stride)
        # frame t = sig[t*stride : t*stride + Kl] via r shifted slabs (no gather)
        frames = jnp.concatenate([spr[:, j:j + T, :] for j in range(r)], axis=2)
        # TODO(synk): move framing into the encoder kernel (strided pl.ds reads from a
        #             VMEM-resident signal tile) to avoid the (B,T,Kl) HBM materialization.
        w = dense(frames.reshape(Bs * T, Kl), params["enc"]["w"], params["enc"]["b"],
                  activation="relu")
        return w.reshape(Bs, T, F3), T

    # ---- mixture path: encoders -> fused LN + proj
    w_mix, T = encode(mix)
    y = ln_dense(w_mix.reshape(B * T, F3), params["ln"]["g"], params["ln"]["b"],
                 params["proj"]["w"], params["proj"]["b"]).reshape(B, T, P)

    # ---- speaker path: encoders -> fused LN+conv1x1 -> 3 fused ResBlocks -> conv1x1 -> mean
    w_ref, Tr = encode(ref)
    r = ln_dense(w_ref.reshape(B * Tr, F3), params["ln_spk"]["g"], params["ln_spk"]["b"],
                 params["spk_in"]["w"], params["spk_in"]["b"]).reshape(B, Tr, P)
    r = res_block(r, params["res1"])
    r = res_block(r, params["res2"])
    r = res_block(r, params["res3"])
    Br, Trr, Hc = r.shape
    r = dense(r.reshape(Br * Trr, Hc), params["spk_out"]["w"], params["spk_out"]["b"],
              out_dtype=jnp.float32).reshape(Br, Trr, E)
    ref_T = (len_ref - Ks) // stride + 1
    ref_T = ref_T // 3 // 3 // 3
    # NOTE: matches the reference exactly (unmasked frame sum divided by ref_T).
    spk_emb = jnp.sum(r, axis=1) / ref_T[:, None].astype(jnp.float32)   # (B, E)

    # ---- whole TCN stack: ONE fused pallas_call, grid (B, 4*num_blocks)
    tp = params["tcn"]
    NBLK = 4 * nb
    biases = []
    for i in range(NBLK):
        base = jnp.broadcast_to(tp["b1"][i][None, :], (B, H))
        if i % nb == 0:  # TCNBlock_Spk: aux speaker embedding folded into the bias
            base = base + spk_emb @ tp["w1aux"][i // nb]
        biases.append(base)
    bias1 = jnp.stack(biases, axis=0)[:, :, None, :]                    # (NBLK, B, 1, H)
    dil = jnp.array(([1] + [2 ** b for b in range(1, nb)]) * 4, jnp.int32)
    max_dil = 2 ** (nb - 1)
    y = tcn_stack(y, tp, dil, bias1, Kt, max_dil)

    # ---- fused masks + elementwise apply: [S1|S2|S3] = w_enc * relu(y @ Wm + bm)
    S = mask_apply(y.reshape(B * T, P), w_mix.reshape(B * T, F3),
                   params["mask"]["w"], params["mask"]["b"]).reshape(B, T, F3)

    # ---- decoders: one block-diag matmul + shifted-add overlap-add
    dec = decode_all(S, params["dec"], B, T, stride, (Ks, Km, Kl))
    s1 = fix_len(dec[0], L)
    s2 = fix_len(dec[1], L)
    s3 = fix_len(dec[2], L)

    logits = dense(spk_emb.astype(jnp.bfloat16), params["head"]["w"],
                   params["head"]["b"], out_dtype=jnp.float32)
    return {"s1": s1, "s2": s2, "s3": s3, "logits": logits}


# ---------------------------------------------------------------------------

if __name__ == "__main__":
    # small hyper-parameters consistent with the module (kernel ratios 1:2:4, stride = Ks//2)
    cfg = dict(Ks=8, Km=16, Kl=32, F=64, P=64, H=128, E=64, Kt=3,
               num_blocks=2, num_spks=11)

    params = init_params(jax.random.PRNGKey(42), cfg)

    key = jax.random.PRNGKey(0)
    k1, k2 = jax.random.split(key)
    audio_mix = jax.random.normal(k1, (2, 1, 320), jnp.float32)   # PyTorch NCL layout
    audio_ref = jax.random.normal(k2, (2, 1, 160), jnp.float32)
    len_ref = jnp.array([160, 128], jnp.int32)

    fwd = jax.jit(lambda am, ar, lr: spex_plus_forward(params, cfg, am, ar, lr))
    out = fwd(audio_mix, audio_ref, len_ref)
    jax.block_until_ready(out)

    assert out["s1"].shape == (2, 320)
    assert out["s2"].shape == (2, 320)
    assert out["s3"].shape == (2, 320)
    assert out["logits"].shape == (2, cfg["num_spks"])
    print("KERNEL_OK")
</pallas_src>

<mosaic_0001>
module attributes {stable_mosaic.version = 11 : i64} {
  func.func @_dense_kernel(%arg0: i32, %arg1: memref<40x32xbf16, #tpu.memory_space<vmem>>, %arg2: memref<32x192xbf16, #tpu.memory_space<vmem>>, %arg3: memref<1x192xf32, #tpu.memory_space<vmem>>, %arg4: memref<40x192xbf16, #tpu.memory_space<vmem>>) attributes {dimension_semantics = [#tpu.dimension_semantics<parallel>], iteration_bounds = array<i64: 2>, scalar_prefetch = 0 : i64, scratch_operands = 0 : i64, tpu.core_type = #tpu.core_type<tc>, window_params = [{transform_indices = @transform_0, window_bounds = array<i64: 40, 32>}, {pipeline_mode = #tpu.pipeline_mode<synchronous>, transform_indices = @transform_1, window_bounds = array<i64: 32, 192>}, {pipeline_mode = #tpu.pipeline_mode<synchronous>, transform_indices = @transform_2, window_bounds = array<i64: 1, 192>}, {transform_indices = @transform_3, window_bounds = array<i64: 40, 192>}]} {
    %c0 = arith.constant 0 : index
    %c0_0 = arith.constant 0 : index
    %0 = vector.load %arg1[%c0, %c0_0] : memref<40x32xbf16, #tpu.memory_space<vmem>>, vector<40x32xbf16>
    %c0_1 = arith.constant 0 : index
    %c0_2 = arith.constant 0 : index
    %1 = vector.load %arg2[%c0_1, %c0_2] : memref<32x192xbf16, #tpu.memory_space<vmem>>, vector<32x192xbf16>
    %cst = arith.constant dense<0.000000e+00> : vector<40x192xf32>
    %2 = tpu.matmul %0, %1, %cst {dimension_numbers = #tpu.dot_dimension_numbers<[1], [0], [0], [1], [0, 0, 1, 1], [], []>} : vector<40x32xbf16>, vector<32x192xbf16>, vector<40x192xf32> -> vector<40x192xf32>
    %c0_3 = arith.constant 0 : index
    %c0_4 = arith.constant 0 : index
    %3 = vector.load %arg3[%c0_3, %c0_4] : memref<1x192xf32, #tpu.memory_space<vmem>>, vector<1x192xf32>
    %4 = vector.broadcast %3 : vector<1x192xf32> to vector<40x192xf32>
    %5 = arith.addf %2, %4 : vector<40x192xf32>
    %cst_5 = arith.constant 0.000000e+00 : f32
    %6 = vector.broadcast %cst_5 : f32 to vector<40x192xf32>
    %7 = arith.maximumf %5, %6 : vector<40x192xf32>
    %8 = arith.truncf %7 : vector<40x192xf32> to vector<40x192xbf16>
    %c0_6 = arith.constant 0 : index
    %c0_7 = arith.constant 0 : index
    %9 = vector.load %arg4[%c0_6, %c0_7] : memref<40x192xbf16, #tpu.memory_space<vmem>>, vector<40x192xbf16>
    tpu.vector_store %arg4[%c0_6, %c0_7], %8 {strides = array<i32>} : memref<40x192xbf16, #tpu.memory_space<vmem>>, vector<40x192xbf16>,
    return
  }
  func.func @transform_0(%arg0: i32) -> (i32, i32) {
    %c0_i32 = arith.constant 0 : i32
    %c0_i32_0 = arith.constant 0 : i32
    return %arg0, %c0_i32 : i32, i32
  }
  func.func @transform_1(%arg0: i32) -> (i32, i32) {
    %c0_i32 = arith.constant 0 : i32
    %c0_i32_0 = arith.constant 0 : i32
    %c0_i32_1 = arith.constant 0 : i32
    return %c0_i32, %c0_i32_0 : i32, i32
  }
  func.func @transform_2(%arg0: i32) -> (i32, i32) {
    %c0_i32 = arith.constant 0 : i32
    %c0_i32_0 = arith.constant 0 : i32
    %c0_i32_1 = arith.constant 0 : i32
    return %c0_i32, %c0_i32_0 : i32, i32
  }
  func.func @transform_3(%arg0: i32) -> (i32, i32) {
    %c0_i32 = arith.constant 0 : i32
    %c0_i32_0 = arith.constant 0 : i32
    return %arg0, %c0_i32 : i32, i32
  }
}

module attributes {stable_mosaic.version = 11 : i64} {
  func.func @_ln_dense_kernel(%arg0: i32, %arg1: memref<40x192xbf16, #tpu.memory_space<vmem>>, %arg2: memref<1x192xf32, #tpu.memory_space<vmem>>, %arg3: memref<1x192xf32, #tpu.memory_space<vmem>>, %arg4: memref<192x64xbf16, #tpu.memory_space<vmem>>, %arg5: memref<1x64xf32, #tpu.memory_space<vmem>>, %arg6: memref<40x64xbf16, #tpu.memory_space<vmem>>) attributes {dimension_semantics = [#tpu.dimension_semantics<parallel>], iteration_bounds = array<i64: 2>, scalar_prefetch = 0 : i64, scratch_operands = 0 : i64, tpu.core_type = #tpu.core_type<tc>, window_params = [{transform_indices = @transform_0, window_bounds = array<i64: 40, 192>}, {pipeline_mode = #tpu.pipeline_mode<synchronous>, transform_indices = @transform_1, window_bounds = array<i64: 1, 192>}, {pipeline_mode = #tpu.pipeline_mode<synchronous>, transform_indices = @transform_2, window_bounds = array<i64: 1, 192>}, {pipeline_mode = #tpu.pipeline_mode<synchronous>, transform_indices = @transform_3, window_bounds = array<i64: 192, 64>}, {pipeline_mode = #tpu.pipeline_mode<synchronous>, transform_indices = @transform_4, window_bounds = array<i64: 1, 64>}, {transform_indices = @transform_5, window_bounds = array<i64: 40, 64>}]} {
    %c0 = arith.constant 0 : index
    %c0_0 = arith.constant 0 : index
    %0 = vector.load %arg1[%c0, %c0_0] : memref<40x192xbf16, #tpu.memory_space<vmem>>, vector<40x192xbf16>
    %1 = arith.extf %0 : vector<40x192xbf16> to vector<40x192xf32>
    %cst = arith.constant dense<0.000000e+00> : vector<40xf32>
    %2 = vector.multi_reduction <add>, %1, %cst [1] : vector<40x192xf32> to vector<40xf32>
    %3 = vector.shape_cast %2 : vector<40xf32> to vector<40x1xf32>
    %cst_1 = arith.constant 1.920000e+02 : f32
    %4 = vector.broadcast %cst_1 : f32 to vector<40x1xf32>
    %5 = arith.divf %3, %4 : vector<40x1xf32>
    %6 = vector.broadcast %5 : vector<40x1xf32> to vector<40x192xf32>
    %7 = arith.subf %1, %6 : vector<40x192xf32>
    %8 = arith.mulf %7, %7 : vector<40x192xf32>
    %cst_2 = arith.constant dense<0.000000e+00> : vector<40xf32>
    %9 = vector.multi_reduction <add>, %8, %cst_2 [1] : vector<40x192xf32> to vector<40xf32>
    %10 = vector.shape_cast %9 : vector<40xf32> to vector<40x1xf32>
    %cst_3 = arith.constant 1.920000e+02 : f32
    %11 = vector.broadcast %cst_3 : f32 to vector<40x1xf32>
    %12 = arith.divf %10, %11 : vector<40x1xf32>
    %13 = vector.broadcast %5 : vector<40x1xf32> to vector<40x192xf32>
    %14 = arith.subf %1, %13 : vector<40x192xf32>
    %cst_4 = arith.constant 9.99999974E-6 : f32
    %15 = vector.broadcast %cst_4 : f32 to vector<40x1xf32>
    %16 = arith.addf %12, %15 : vector<40x1xf32>
    %17 = math.rsqrt %16 : vector<40x1xf32>
    %18 = vector.broadcast %17 : vector<40x1xf32> to vector<40x192xf32>
    %19 = arith.mulf %14, %18 : vector<40x192xf32>
    %c0_5 = arith.constant 0 : index
    %c0_6 = arith.constant 0 : index
    %20 = vector.load %arg2[%c0_5, %c0_6] : memref<1x192xf32, #tpu.memory_space<vmem>>, vector<1x192xf32>
    %21 = vector.broadcast %20 : vector<1x192xf32> to vector<40x192xf32>
    %22 = arith.mulf %19, %21 : vector<40x192xf32>
    %c0_7 = arith.constant 0 : index
    %c0_8 = arith.constant 0 : index
    %23 = vector.load %arg3[%c0_7, %c0_8] : memref<1x192xf32, #tpu.memory_space<vmem>>, vector<1x192xf32>
    %24 = vector.broadcast %23 : vector<1x192xf32> to vector<40x192xf32>
    %25 = arith.addf %22, %24 : vector<40x192xf32>
    %26 = arith.truncf %25 : vector<40x192xf32> to vector<40x192xbf16>
    %c0_9 = arith.constant 0 : index
    %c0_10 = arith.constant 0 : index
    %27 = vector.load %arg4[%c0_9, %c0_10] : memref<192x64xbf16, #tpu.memory_space<vmem>>, vector<192x64xbf16>
    %cst_11 = arith.constant dense<0.000000e+00> : vector<40x64xf32>
    %28 = tpu.matmul %26, %27, %cst_11 {dimension_numbers = #tpu.dot_dimension_numbers<[1], [0], [0], [1], [0, 0, 1, 1], [], []>} : vector<40x192xbf16>, vector<192x64xbf16>, vector<40x64xf32> -> vector<40x64xf32>
    %c0_12 = arith.constant 0 : index
    %c0_13 = arith.constant 0 : index
    %29 = vector.load %arg5[%c0_12, %c0_13] : memref<1x64xf32, #tpu.memory_space<vmem>>, vector<1x64xf32>
    %30 = vector.broadcast %29 : vector<1x64xf32> to vector<40x64xf32>
    %31 = arith.addf %28, %30 : vector<40x64xf32>
    %32 = arith.truncf %31 : vector<40x64xf32> to vector<40x64xbf16>
    %c0_14 = arith.constant 0 : index
    %c0_15 = arith.constant 0 : index
    %33 = vector.load %arg6[%c0_14, %c0_15] : memref<40x64xbf16, #tpu.memory_space<vmem>>, vector<40x64xbf16>
    tpu.vector_store %arg6[%c0_14, %c0_15], %32 {strides = array<i32>} : memref<40x64xbf16, #tpu.memory_space<vmem>>, vector<40x64xbf16>,
    return
  }
  func.func @transform_0(%arg0: i32) -> (i32, i32) {
    %c0_i32 = arith.constant 0 : i32
    %c0_i32_0 = arith.constant 0 : i32
    return %arg0, %c0_i32 : i32, i32
  }
  func.func @transform_1(%arg0: i32) -> (i32, i32) {
    %c0_i32 = arith.constant 0 : i32
    %c0_i32_0 = arith.constant 0 : i32
    %c0_i32_1 = arith.constant 0 : i32
    return %c0_i32, %c0_i32_0 : i32, i32
  }
  func.func @transform_2(%arg0: i32) -> (i32, i32) {
    %c0_i32 = arith.constant 0 : i32
    %c0_i32_0 = arith.constant 0 : i32
    %c0_i32_1 = arith.constant 0 : i32
    return %c0_i32, %c0_i32_0 : i32, i32
  }
  func.func @transform_3(%arg0: i32) -> (i32, i32) {
    %c0_i32 = arith.constant 0 : i32
    %c0_i32_0 = arith.constant 0 : i32
    %c0_i32_1 = arith.constant 0 : i32
    return %c0_i32, %c0_i32_0 : i32, i32
  }
  func.func @transform_4(%arg0: i32) -> (i32, i32) {
    %c0_i32 = arith.constant 0 : i32
    %c0_i32_0 = arith.constant 0 : i32
    %c0_i32_1 = arith.constant 0 : i32
    return %c0_i32, %c0_i32_0 : i32, i32
  }
  func.func @transform_5(%arg0: i32) -> (i32, i32) {
    %c0_i32 = arith.constant 0 : i32
    %c0_i32_0 = arith.constant 0 : i32
    return %arg0, %c0_i32 : i32, i32
  }
}

module attributes {stable_mosaic.version = 11 : i64} {
  func.func @_res_block_kernel(%arg0: i32, %arg1: memref<1x39x64xbf16, #tpu.memory_space<vmem>>, %arg2: memref<64x64xbf16, #tpu.memory_space<vmem>>, %arg3: memref<1x64xf32, #tpu.memory_space<vmem>>, %arg4: memref<64x64xbf16, #tpu.memory_space<vmem>>, %arg5: memref<1x64xf32, #tpu.memory_space<vmem>>, %arg6: memref<2xf32, #tpu.memory_space<smem>>, %arg7: memref<1x39x64xbf16, #tpu.memory_space<vmem>>) attributes {dimension_semantics = [#tpu.dimension_semantics<parallel>], iteration_bounds = array<i64: 2>, scalar_prefetch = 0 : i64, scratch_operands = 0 : i64, tpu.core_type = #tpu.core_type<tc>, window_params = [{transform_indices = @transform_0, window_bounds = array<i64: 1, 39, 64>}, {pipeline_mode = #tpu.pipeline_mode<synchronous>, transform_indices = @transform_1, window_bounds = array<i64: 64, 64>}, {pipeline_mode = #tpu.pipeline_mode<synchronous>, transform_indices = @transform_2, window_bounds = array<i64: 1, 64>}, {pipeline_mode = #tpu.pipeline_mode<synchronous>, transform_indices = @transform_3, window_bounds = array<i64: 64, 64>}, {pipeline_mode = #tpu.pipeline_mode<synchronous>, transform_indices = @transform_4, window_bounds = array<i64: 1, 64>}, {transform_indices = @transform_5, window_bounds = array<i64: 2>}, {transform_indices = @transform_6, window_bounds = array<i64: 1, 39, 64>}]} {
    %c0 = arith.constant 0 : index
    %c0_0 = arith.constant 0 : index
    %c0_1 = arith.constant 0 : index
    %0 = vector.load %arg1[%c0, %c0_0, %c0_1] : memref<1x39x64xbf16, #tpu.memory_space<vmem>>, vector<1x39x64xbf16>
    %1 = vector.shape_cast %0 : vector<1x39x64xbf16> to vector<39x64xbf16>
    %c0_2 = arith.constant 0 : index
    %c0_3 = arith.constant 0 : index
    %2 = vector.load %arg2[%c0_2, %c0_3] : memref<64x64xbf16, #tpu.memory_space<vmem>>, vector<64x64xbf16>
    %cst = arith.constant dense<0.000000e+00> : vector<39x64xf32>
    %3 = tpu.matmul %1, %2, %cst {dimension_numbers = #tpu.dot_dimension_numbers<[1], [0], [0], [1], [0, 0, 1, 1], [], []>} : vector<39x64xbf16>, vector<64x64xbf16>, vector<39x64xf32> -> vector<39x64xf32>
    %c0_4 = arith.constant 0 : index
    %c0_5 = arith.constant 0 : index
    %4 = vector.load %arg3[%c0_4, %c0_5] : memref<1x64xf32, #tpu.memory_space<vmem>>, vector<1x64xf32>
    %5 = vector.broadcast %4 : vector<1x64xf32> to vector<39x64xf32>
    %6 = arith.addf %3, %5 : vector<39x64xf32>
    %cst_6 = arith.constant 0.000000e+00 : f32
    %7 = vector.broadcast %cst_6 : f32 to vector<39x64xf32>
    %8 = arith.cmpf oge, %6, %7 : vector<39x64xf32>
    %c0_7 = arith.constant 0 : index
    %9 = memref.load %arg6[%c0_7] : memref<2xf32, #tpu.memory_space<smem>>
    %10 = vector.broadcast %9 : f32 to vector<39x64xf32>
    %11 = arith.mulf %10, %6 : vector<39x64xf32>
    %12 = arith.select %8, %6, %11 : vector<39x64xi1>, vector<39x64xf32>
    %13 = arith.truncf %12 : vector<39x64xf32> to vector<39x64xbf16>
    %c0_8 = arith.constant 0 : index
    %c0_9 = arith.constant 0 : index
    %14 = vector.load %arg4[%c0_8, %c0_9] : memref<64x64xbf16, #tpu.memory_space<vmem>>, vector<64x64xbf16>
    %cst_10 = arith.constant dense<0.000000e+00> : vector<39x64xf32>
    %15 = tpu.matmul %13, %14, %cst_10 {dimension_numbers = #tpu.dot_dimension_numbers<[1], [0], [0], [1], [0, 0, 1, 1], [], []>} : vector<39x64xbf16>, vector<64x64xbf16>, vector<39x64xf32> -> vector<39x64xf32>
    %c0_11 = arith.constant 0 : index
    %c0_12 = arith.constant 0 : index
    %16 = vector.load %arg5[%c0_11, %c0_12] : memref<1x64xf32, #tpu.memory_space<vmem>>, vector<1x64xf32>
    %17 = vector.broadcast %16 : vector<1x64xf32> to vector<39x64xf32>
    %18 = arith.addf %15, %17 : vector<39x64xf32>
    %19 = arith.extf %1 : vector<39x64xbf16> to vector<39x64xf32>
    %20 = arith.addf %18, %19 : vector<39x64xf32>
    %cst_13 = arith.constant 0.000000e+00 : f32
    %21 = vector.broadcast %cst_13 : f32 to vector<39x64xf32>
    %22 = arith.cmpf oge, %20, %21 : vector<39x64xf32>
    %c1 = arith.constant 1 : index
    %23 = memref.load %arg6[%c1] : memref<2xf32, #tpu.memory_space<smem>>
    %24 = vector.broadcast %23 : f32 to vector<39x64xf32>
    %25 = arith.mulf %24, %20 : vector<39x64xf32>
    %26 = arith.select %22, %20, %25 : vector<39x64xi1>, vector<39x64xf32>
    %27 = arith.truncf %26 : vector<39x64xf32> to vector<39x64xbf16>
    %c0_14 = arith.constant 0 : index
    %c0_15 = arith.constant 0 : index
    %c0_16 = arith.constant 0 : index
    %28 = vector.load %arg7[%c0_14, %c0_15, %c0_16] : memref<1x39x64xbf16, #tpu.memory_space<vmem>>, vector<1x39x64xbf16>
    %29 = vector.shape_cast %28 : vector<1x39x64xbf16> to vector<39x64xbf16>
    %30 = vector.shape_cast %27 : vector<39x64xbf16> to vector<1x39x64xbf16>
    tpu.vector_store %arg7[%c0_14, %c0_15, %c0_16], %30 {strides = array<i32>} : memref<1x39x64xbf16, #tpu.memory_space<vmem>>, vector<1x39x64xbf16>,
    return
  }
  func.func @transform_0(%arg0: i32) -> (i32, i32, i32) {
    %c0_i32 = arith.constant 0 : i32
    %c0_i32_0 = arith.constant 0 : i32
    %c0_i32_1 = arith.constant 0 : i32
    return %arg0, %c0_i32, %c0_i32_0 : i32, i32, i32
  }
  func.func @transform_1(%arg0: i32) -> (i32, i32) {
    %c0_i32 = arith.constant 0 : i32
    %c0_i32_0 = arith.constant 0 : i32
    %c0_i32_1 = arith.constant 0 : i32
    return %c0_i32, %c0_i32_0 : i32, i32
  }
  func.func @transform_2(%arg0: i32) -> (i32, i32) {
    %c0_i32 = arith.constant 0 : i32
    %c0_i32_0 = arith.constant 0 : i32
    %c0_i32_1 = arith.constant 0 : i32
    return %c0_i32, %c0_i32_0 : i32, i32
  }
  func.func @transform_3(%arg0: i32) -> (i32, i32) {
    %c0_i32 = arith.constant 0 : i32
    %c0_i32_0 = arith.constant 0 : i32
    %c0_i32_1 = arith.constant 0 : i32
    return %c0_i32, %c0_i32_0 : i32, i32
  }
  func.func @transform_4(%arg0: i32) -> (i32, i32) {
    %c0_i32 = arith.constant 0 : i32
    %c0_i32_0 = arith.constant 0 : i32
    %c0_i32_1 = arith.constant 0 : i32
    return %c0_i32, %c0_i32_0 : i32, i32
  }
  func.func @transform_5(%arg0: i32) -> i32 {
    %c0_i32 = arith.constant 0 : i32
    %c0_i32_0 = arith.constant 0 : i32
    return %c0_i32 : i32
  }
  func.func @transform_6(%arg0: i32) -> (i32, i32, i32) {
    %c0_i32 = arith.constant 0 : i32
    %c0_i32_0 = arith.constant 0 : i32
    %c0_i32_1 = arith.constant 0 : i32
    return %arg0, %c0_i32, %c0_i32_0 : i32, i32, i32
  }
}

module attributes {stable_mosaic.version = 11 : i64} {
  func.func @_res_block_kernel(%arg0: i32, %arg1: memref<1x13x64xbf16, #tpu.memory_space<vmem>>, %arg2: memref<64x128xbf16, #tpu.memory_space<vmem>>, %arg3: memref<1x128xf32, #tpu.memory_space<vmem>>, %arg4: memref<128x128xbf16, #tpu.memory_space<vmem>>, %arg5: memref<1x128xf32, #tpu.memory_space<vmem>>, %arg6: memref<64x128xbf16, #tpu.memory_space<vmem>>, %arg7: memref<2xf32, #tpu.memory_space<smem>>, %arg8: memref<1x13x128xbf16, #tpu.memory_space<vmem>>) attributes {dimension_semantics = [#tpu.dimension_semantics<parallel>], iteration_bounds = array<i64: 2>, scalar_prefetch = 0 : i64, scratch_operands = 0 : i64, tpu.core_type = #tpu.core_type<tc>, window_params = [{transform_indices = @transform_0, window_bounds = array<i64: 1, 13, 64>}, {pipeline_mode = #tpu.pipeline_mode<synchronous>, transform_indices = @transform_1, window_bounds = array<i64: 64, 128>}, {pipeline_mode = #tpu.pipeline_mode<synchronous>, transform_indices = @transform_2, window_bounds = array<i64: 1, 128>}, {pipeline_mode = #tpu.pipeline_mode<synchronous>, transform_indices = @transform_3, window_bounds = array<i64: 128, 128>}, {pipeline_mode = #tpu.pipeline_mode<synchronous>, transform_indices = @transform_4, window_bounds = array<i64: 1, 128>}, {pipeline_mode = #tpu.pipeline_mode<synchronous>, transform_indices = @transform_5, window_bounds = array<i64: 64, 128>}, {transform_indices = @transform_6, window_bounds = array<i64: 2>}, {transform_indices = @transform_7, window_bounds = array<i64: 1, 13, 128>}]} {
    %c0 = arith.constant 0 : index
    %c0_0 = arith.constant 0 : index
    %c0_1 = arith.constant 0 : index
    %0 = vector.load %arg1[%c0, %c0_0, %c0_1] : memref<1x13x64xbf16, #tpu.memory_space<vmem>>, vector<1x13x64xbf16>
    %1 = vector.shape_cast %0 : vector<1x13x64xbf16> to vector<13x64xbf16>
    %c0_2 = arith.constant 0 : index
    %c0_3 = arith.constant 0 : index
    %2 = vector.load %arg2[%c0_2, %c0_3] : memref<64x128xbf16, #tpu.memory_space<vmem>>, vector<64x128xbf16>
    %cst = arith.constant dense<0.000000e+00> : vector<13x128xf32>
    %3 = tpu.matmul %1, %2, %cst {dimension_numbers = #tpu.dot_dimension_numbers<[1], [0], [0], [1], [0, 0, 1, 1], [], []>} : vector<13x64xbf16>, vector<64x128xbf16>, vector<13x128xf32> -> vector<13x128xf32>
    %c0_4 = arith.constant 0 : index
    %c0_5 = arith.constant 0 : index
    %4 = vector.load %arg3[%c0_4, %c0_5] : memref<1x128xf32, #tpu.memory_space<vmem>>, vector<1x128xf32>
    %5 = vector.broadcast %4 : vector<1x128xf32> to vector<13x128xf32>
    %6 = arith.addf %3, %5 : vector<13x128xf32>
    %cst_6 = arith.constant 0.000000e+00 : f32
    %7 = vector.broadcast %cst_6 : f32 to vector<13x128xf32>
    %8 = arith.cmpf oge, %6, %7 : vector<13x128xf32>
    %c0_7 = arith.constant 0 : index
    %9 = memref.load %arg7[%c0_7] : memref<2xf32, #tpu.memory_space<smem>>
    %10 = vector.broadcast %9 : f32 to vector<13x128xf32>
    %11 = arith.mulf %10, %6 : vector<13x128xf32>
    %12 = arith.select %8, %6, %11 : vector<13x128xi1>, vector<13x128xf32>
    %13 = arith.truncf %12 : vector<13x128xf32> to vector<13x128xbf16>
    %c0_8 = arith.constant 0 : index
    %c0_9 = arith.constant 0 : index
    %14 = vector.load %arg4[%c0_8, %c0_9] : memref<128x128xbf16, #tpu.memory_space<vmem>>, vector<128x128xbf16>
    %cst_10 = arith.constant dense<0.000000e+00> : vector<13x128xf32>
    %15 = tpu.matmul %13, %14, %cst_10 {dimension_numbers = #tpu.dot_dimension_numbers<[1], [0], [0], [1], [0, 0, 1, 1], [], []>} : vector<13x128xbf16>, vector<128x128xbf16>, vector<13x128xf32> -> vector<13x128xf32>
    %c0_11 = arith.constant 0 : index
    %c0_12 = arith.constant 0 : index
    %16 = vector.load %arg5[%c0_11, %c0_12] : memref<1x128xf32, #tpu.memory_space<vmem>>, vector<1x128xf32>
    %17 = vector.broadcast %16 : vector<1x128xf32> to vector<13x128xf32>
    %18 = arith.addf %15, %17 : vector<13x128xf32>
    %c0_13 = arith.constant 0 : index
    %c0_14 = arith.constant 0 : index
    %19 = vector.load %arg6[%c0_13, %c0_14] : memref<64x128xbf16, #tpu.memory_space<vmem>>, vector<64x128xbf16>
    %cst_15 = arith.constant dense<0.000000e+00> : vector<13x128xf32>
    %20 = tpu.matmul %1, %19, %cst_15 {dimension_numbers = #tpu.dot_dimension_numbers<[1], [0], [0], [1], [0, 0, 1, 1], [], []>} : vector<13x64xbf16>, vector<64x128xbf16>, vector<13x128xf32> -> vector<13x128xf32>
    %21 = arith.addf %18, %20 : vector<13x128xf32>
    %cst_16 = arith.constant 0.000000e+00 : f32
    %22 = vector.broadcast %cst_16 : f32 to vector<13x128xf32>
    %23 = arith.cmpf oge, %21, %22 : vector<13x128xf32>
    %c1 = arith.constant 1 : index
    %24 = memref.load %arg7[%c1] : memref<2xf32, #tpu.memory_space<smem>>
    %25 = vector.broadcast %24 : f32 to vector<13x128xf32>
    %26 = arith.mulf %25, %21 : vector<13x128xf32>
    %27 = arith.select %23, %21, %26 : vector<13x128xi1>, vector<13x128xf32>
    %28 = arith.truncf %27 : vector<13x128xf32> to vector<13x128xbf16>
    %c0_17 = arith.constant 0 : index
    %c0_18 = arith.constant 0 : index
    %c0_19 = arith.constant 0 : index
    %29 = vector.load %arg8[%c0_17, %c0_18, %c0_19] : memref<1x13x128xbf16, #tpu.memory_space<vmem>>, vector<1x13x128xbf16>
    %30 = vector.shape_cast %29 : vector<1x13x128xbf16> to vector<13x128xbf16>
    %31 = vector.shape_cast %28 : vector<13x128xbf16> to vector<1x13x128xbf16>
    tpu.vector_store %arg8[%c0_17, %c0_18, %c0_19], %31 {strides = array<i32>} : memref<1x13x128xbf16, #tpu.memory_space<vmem>>, vector<1x13x128xbf16>,
    return
  }
  func.func @transform_0(%arg0: i32) -> (i32, i32, i32) {
    %c0_i32 = arith.constant 0 : i32
    %c0_i32_0 = arith.constant 0 : i32
    %c0_i32_1 = arith.constant 0 : i32
    return %arg0, %c0_i32, %c0_i32_0 : i32, i32, i32
  }
  func.func @transform_1(%arg0: i32) -> (i32, i32) {
    %c0_i32 = arith.constant 0 : i32
    %c0_i32_0 = arith.constant 0 : i32
    %c0_i32_1 = arith.constant 0 : i32
    return %c0_i32, %c0_i32_0 : i32, i32
  }
  func.func @transform_2(%arg0: i32) -> (i32, i32) {
    %c0_i32 = arith.constant 0 : i32
    %c0_i32_0 = arith.constant 0 : i32
    %c0_i32_1 = arith.constant 0 : i32
    return %c0_i32, %c0_i32_0 : i32, i32
  }
  func.func @transform_3(%arg0: i32) -> (i32, i32) {
    %c0_i32 = arith.constant 0 : i32
    %c0_i32_0 = arith.constant 0 : i32
    %c0_i32_1 = arith.constant 0 : i32
    return %c0_i32, %c0_i32_0 : i32, i32
  }
  func.func @transform_4(%arg0: i32) -> (i32, i32) {
    %c0_i32 = arith.constant 0 : i32
    %c0_i32_0 = arith.constant 0 : i32
    %c0_i32_1 = arith.constant 0 : i32
    return %c0_i32, %c0_i32_0 : i32, i32
  }
  func.func @transform_5(%arg0: i32) -> (i32, i32) {
    %c0_i32 = arith.constant 0 : i32
    %c0_i32_0 = arith.constant 0 : i32
    %c0_i32_1 = arith.constant 0 : i32
    return %c0_i32, %c0_i32_0 : i32, i32
  }
  func.func @transform_6(%arg0: i32) -> i32 {
    %c0_i32 = arith.constant 0 : i32
    %c0_i32_0 = arith.constant 0 : i32
    return %c0_i32 : i32
  }
  func.func @transform_7(%arg0: i32) -> (i32, i32, i32) {
    %c0_i32 = arith.constant 0 : i32
    %c0_i32_0 = arith.constant 0 : i32
    %c0_i32_1 = arith.constant 0 : i32
    return %arg0, %c0_i32, %c0_i32_0 : i32, i32, i32
  }
}

module attributes {stable_mosaic.version = 11 : i64} {
  func.func @_res_block_kernel(%arg0: i32, %arg1: memref<1x4x128xbf16, #tpu.memory_space<vmem>>, %arg2: memref<128x128xbf16, #tpu.memory_space<vmem>>, %arg3: memref<1x128xf32, #tpu.memory_space<vmem>>, %arg4: memref<128x128xbf16, #tpu.memory_space<vmem>>, %arg5: memref<1x128xf32, #tpu.memory_space<vmem>>, %arg6: memref<2xf32, #tpu.memory_space<smem>>, %arg7: memref<1x4x128xbf16, #tpu.memory_space<vmem>>) attributes {dimension_semantics = [#tpu.dimension_semantics<parallel>], iteration_bounds = array<i64: 2>, scalar_prefetch = 0 : i64, scratch_operands = 0 : i64, tpu.core_type = #tpu.core_type<tc>, window_params = [{transform_indices = @transform_0, window_bounds = array<i64: 1, 4, 128>}, {pipeline_mode = #tpu.pipeline_mode<synchronous>, transform_indices = @transform_1, window_bounds = array<i64: 128, 128>}, {pipeline_mode = #tpu.pipeline_mode<synchronous>, transform_indices = @transform_2, window_bounds = array<i64: 1, 128>}, {pipeline_mode = #tpu.pipeline_mode<synchronous>, transform_indices = @transform_3, window_bounds = array<i64: 128, 128>}, {pipeline_mode = #tpu.pipeline_mode<synchronous>, transform_indices = @transform_4, window_bounds = array<i64: 1, 128>}, {transform_indices = @transform_5, window_bounds = array<i64: 2>}, {transform_indices = @transform_6, window_bounds = array<i64: 1, 4, 128>}]} {
    %c0 = arith.constant 0 : index
    %c0_0 = arith.constant 0 : index
    %c0_1 = arith.constant 0 : index
    %0 = vector.load %arg1[%c0, %c0_0, %c0_1] : memref<1x4x128xbf16, #tpu.memory_space<vmem>>, vector<1x4x128xbf16>
    %1 = vector.shape_cast %0 : vector<1x4x128xbf16> to vector<4x128xbf16>
    %c0_2 = arith.constant 0 : index
    %c0_3 = arith.constant 0 : index
    %2 = vector.load %arg2[%c0_2, %c0_3] : memref<128x128xbf16, #tpu.memory_space<vmem>>, vector<128x128xbf16>
    %cst = arith.constant dense<0.000000e+00> : vector<4x128xf32>
    %3 = tpu.matmul %1, %2, %cst {dimension_numbers = #tpu.dot_dimension_numbers<[1], [0], [0], [1], [0, 0, 1, 1], [], []>} : vector<4x128xbf16>, vector<128x128xbf16>, vector<4x128xf32> -> vector<4x128xf32>
    %c0_4 = arith.constant 0 : index
    %c0_5 = arith.constant 0 : index
    %4 = vector.load %arg3[%c0_4, %c0_5] : memref<1x128xf32, #tpu.memory_space<vmem>>, vector<1x128xf32>
    %5 = vector.broadcast %4 : vector<1x128xf32> to vector<4x128xf32>
    %6 = arith.addf %3, %5 : vector<4x128xf32>
    %cst_6 = arith.constant 0.000000e+00 : f32
    %7 = vector.broadcast %cst_6 : f32 to vector<4x128xf32>
    %8 = arith.cmpf oge, %6, %7 : vector<4x128xf32>
    %c0_7 = arith.constant 0 : index
    %9 = memref.load %arg6[%c0_7] : memref<2xf32, #tpu.memory_space<smem>>
    %10 = vector.broadcast %9 : f32 to vector<4x128xf32>
    %11 = arith.mulf %10, %6 : vector<4x128xf32>
    %12 = arith.select %8, %6, %11 : vector<4x128xi1>, vector<4x128xf32>
    %13 = arith.truncf %12 : vector<4x128xf32> to vector<4x128xbf16>
    %c0_8 = arith.constant 0 : index
    %c0_9 = arith.constant 0 : index
    %14 = vector.load %arg4[%c0_8, %c0_9] : memref<128x128xbf16, #tpu.memory_space<vmem>>, vector<128x128xbf16>
    %cst_10 = arith.constant dense<0.000000e+00> : vector<4x128xf32>
    %15 = tpu.matmul %13, %14, %cst_10 {dimension_numbers = #tpu.dot_dimension_numbers<[1], [0], [0], [1], [0, 0, 1, 1], [], []>} : vector<4x128xbf16>, vector<128x128xbf16>, vector<4x128xf32> -> vector<4x128xf32>
    %c0_11 = arith.constant 0 : index
    %c0_12 = arith.constant 0 : index
    %16 = vector.load %arg5[%c0_11, %c0_12] : memref<1x128xf32, #tpu.memory_space<vmem>>, vector<1x128xf32>
    %17 = vector.broadcast %16 : vector<1x128xf32> to vector<4x128xf32>
    %18 = arith.addf %15, %17 : vector<4x128xf32>
    %19 = arith.extf %1 : vector<4x128xbf16> to vector<4x128xf32>
    %20 = arith.addf %18, %19 : vector<4x128xf32>
    %cst_13 = arith.constant 0.000000e+00 : f32
    %21 = vector.broadcast %cst_13 : f32 to vector<4x128xf32>
    %22 = arith.cmpf oge, %20, %21 : vector<4x128xf32>
    %c1 = arith.constant 1 : index
    %23 = memref.load %arg6[%c1] : memref<2xf32, #tpu.memory_space<smem>>
    %24 = vector.broadcast %23 : f32 to vector<4x128xf32>
    %25 = arith.mulf %24, %20 : vector<4x128xf32>
    %26 = arith.select %22, %20, %25 : vector<4x128xi1>, vector<4x128xf32>
    %27 = arith.truncf %26 : vector<4x128xf32> to vector<4x128xbf16>
    %c0_14 = arith.constant 0 : index
    %c0_15 = arith.constant 0 : index
    %c0_16 = arith.constant 0 : index
    %28 = vector.load %arg7[%c0_14, %c0_15, %c0_16] : memref<1x4x128xbf16, #tpu.memory_space<vmem>>, vector<1x4x128xbf16>
    %29 = vector.shape_cast %28 : vector<1x4x128xbf16> to vector<4x128xbf16>
    %30 = vector.shape_cast %27 : vector<4x128xbf16> to vector<1x4x128xbf16>
    tpu.vector_store %arg7[%c0_14, %c0_15, %c0_16], %30 {strides = array<i32>} : memref<1x4x128xbf16, #tpu.memory_space<vmem>>, vector<1x4x128xbf16>,
    return
  }
  func.func @transform_0(%arg0: i32) -> (i32, i32, i32) {
    %c0_i32 = arith.constant 0 : i32
    %c0_i32_0 = arith.constant 0 : i32
    %c0_i32_1 = arith.constant 0 : i32
    return %arg0, %c0_i32, %c0_i32_0 : i32, i32, i32
  }
  func.func @transform_1(%arg0: i32) -> (i32, i32) {
    %c0_i32 = arith.constant 0 : i32
    %c0_i32_0 = arith.constant 0 : i32
    %c0_i32_1 = arith.constant 0 : i32
    return %c0_i32, %c0_i32_0 : i32, i32
  }
  func.func @transform_2(%arg0: i32) -> (i32, i32) {
    %c0_i32 = arith.constant 0 : i32
    %c0_i32_0 = arith.constant 0 : i32
    %c0_i32_1 = arith.constant 0 : i32
    return %c0_i32, %c0_i32_0 : i32, i32
  }
  func.func @transform_3(%arg0: i32) -> (i32, i32) {
    %c0_i32 = arith.constant 0 : i32
    %c0_i32_0 = arith.constant 0 : i32
    %c0_i32_1 = arith.constant 0 : i32
    return %c0_i32, %c0_i32_0 : i32, i32
  }
  func.func @transform_4(%arg0: i32) -> (i32, i32) {
    %c0_i32 = arith.constant 0 : i32
    %c0_i32_0 = arith.constant 0 : i32
    %c0_i32_1 = arith.constant 0 : i32
    return %c0_i32, %c0_i32_0 : i32, i32
  }
  func.func @transform_5(%arg0: i32) -> i32 {
    %c0_i32 = arith.constant 0 : i32
    %c0_i32_0 = arith.constant 0 : i32
    return %c0_i32 : i32
  }
  func.func @transform_6(%arg0: i32) -> (i32, i32, i32) {
    %c0_i32 = arith.constant 0 : i32
    %c0_i32_0 = arith.constant 0 : i32
    %c0_i32_1 = arith.constant 0 : i32
    return %arg0, %c0_i32, %c0_i32_0 : i32, i32, i32
  }
}

module attributes {stable_mosaic.version = 11 : i64} {
  func.func @_dense_kernel(%arg0: i32, %arg1: memref<8x128xbf16, #tpu.memory_space<vmem>>, %arg2: memref<128x64xbf16, #tpu.memory_space<vmem>>, %arg3: memref<1x64xf32, #tpu.memory_space<vmem>>, %arg4: memref<8x64xf32, #tpu.memory_space<vmem>>) attributes {dimension_semantics = [#tpu.dimension_semantics<parallel>], iteration_bounds = array<i64: 1>, scalar_prefetch = 0 : i64, scratch_operands = 0 : i64, tpu.core_type = #tpu.core_type<tc>, window_params = [{transform_indices = @transform_0, window_bounds = array<i64: 8, 128>}, {pipeline_mode = #tpu.pipeline_mode<synchronous>, transform_indices = @transform_1, window_bounds = array<i64: 128, 64>}, {pipeline_mode = #tpu.pipeline_mode<synchronous>, transform_indices = @transform_2, window_bounds = array<i64: 1, 64>}, {transform_indices = @transform_3, window_bounds = array<i64: 8, 64>}]} {
    %c0 = arith.constant 0 : index
    %c0_0 = arith.constant 0 : index
    %0 = vector.load %arg1[%c0, %c0_0] : memref<8x128xbf16, #tpu.memory_space<vmem>>, vector<8x128xbf16>
    %c0_1 = arith.constant 0 : index
    %c0_2 = arith.constant 0 : index
    %1 = vector.load %arg2[%c0_1, %c0_2] : memref<128x64xbf16, #tpu.memory_space<vmem>>, vector<128x64xbf16>
    %cst = arith.constant dense<0.000000e+00> : vector<8x64xf32>
    %2 = tpu.matmul %0, %1, %cst {dimension_numbers = #tpu.dot_dimension_numbers<[1], [0], [0], [1], [0, 0, 1, 1], [], []>} : vector<8x128xbf16>, vector<128x64xbf16>, vector<8x64xf32> -> vector<8x64xf32>
    %c0_3 = arith.constant 0 : index
    %c0_4 = arith.constant 0 : index
    %3 = vector.load %arg3[%c0_3, %c0_4] : memref<1x64xf32, #tpu.memory_space<vmem>>, vector<1x64xf32>
    %4 = vector.broadcast %3 : vector<1x64xf32> to vector<8x64xf32>
    %5 = arith.addf %2, %4 : vector<8x64xf32>
    %c0_5 = arith.constant 0 : index
    %c0_6 = arith.constant 0 : index
    %6 = vector.load %arg4[%c0_5, %c0_6] : memref<8x64xf32, #tpu.memory_space<vmem>>, vector<8x64xf32>
    tpu.vector_store %arg4[%c0_5, %c0_6], %5 {strides = array<i32>} : memref<8x64xf32, #tpu.memory_space<vmem>>, vector<8x64xf32>,
    return
  }
  func.func @transform_0(%arg0: i32) -> (i32, i32) {
    %c0_i32 = arith.constant 0 : i32
    %c0_i32_0 = arith.constant 0 : i32
    return %arg0, %c0_i32 : i32, i32
  }
  func.func @transform_1(%arg0: i32) -> (i32, i32) {
    %c0_i32 = arith.constant 0 : i32
    %c0_i32_0 = arith.constant 0 : i32
    %c0_i32_1 = arith.constant 0 : i32
    return %c0_i32, %c0_i32_0 : i32, i32
  }
  func.func @transform_2(%arg0: i32) -> (i32, i32) {
    %c0_i32 = arith.constant 0 : i32
    %c0_i32_0 = arith.constant 0 : i32
    %c0_i32_1 = arith.constant 0 : i32
    return %c0_i32, %c0_i32_0 : i32, i32
  }
  func.func @transform_3(%arg0: i32) -> (i32, i32) {
    %c0_i32 = arith.constant 0 : i32
    %c0_i32_0 = arith.constant 0 : i32
    return %arg0, %c0_i32 : i32, i32
  }
}

module attributes {stable_mosaic.version = 11 : i64} {
  func.func @_dense_kernel(%arg0: i32, %arg1: memref<8x64xbf16, #tpu.memory_space<vmem>>, %arg2: memref<64x11xbf16, #tpu.memory_space<vmem>>, %arg3: memref<1x11xf32, #tpu.memory_space<vmem>>, %arg4: memref<8x11xf32, #tpu.memory_space<vmem>>) attributes {dimension_semantics = [#tpu.dimension_semantics<parallel>], iteration_bounds = array<i64: 1>, scalar_prefetch = 0 : i64, scratch_operands = 0 : i64, tpu.core_type = #tpu.core_type<tc>, window_params = [{transform_indices = @transform_0, window_bounds = array<i64: 8, 64>}, {pipeline_mode = #tpu.pipeline_mode<synchronous>, transform_indices = @transform_1, window_bounds = array<i64: 64, 11>}, {pipeline_mode = #tpu.pipeline_mode<synchronous>, transform_indices = @transform_2, window_bounds = array<i64: 1, 11>}, {transform_indices = @transform_3, window_bounds = array<i64: 8, 11>}]} {
    %c0 = arith.constant 0 : index
    %c0_0 = arith.constant 0 : index
    %0 = vector.load %arg1[%c0, %c0_0] : memref<8x64xbf16, #tpu.memory_space<vmem>>, vector<8x64xbf16>
    %c0_1 = arith.constant 0 : index
    %c0_2 = arith.constant 0 : index
    %1 = vector.load %arg2[%c0_1, %c0_2] : memref<64x11xbf16, #tpu.memory_space<vmem>>, vector<64x11xbf16>
    %cst = arith.constant dense<0.000000e+00> : vector<8x11xf32>
    %2 = tpu.matmul %0, %1, %cst {dimension_numbers = #tpu.dot_dimension_numbers<[1], [0], [0], [1], [0, 0, 1, 1], [], []>} : vector<8x64xbf16>, vector<64x11xbf16>, vector<8x11xf32> -> vector<8x11xf32>
    %c0_3 = arith.constant 0 : index
    %c0_4 = arith.constant 0 : index
    %3 = vector.load %arg3[%c0_3, %c0_4] : memref<1x11xf32, #tpu.memory_space<vmem>>, vector<1x11xf32>
    %4 = vector.broadcast %3 : vector<1x11xf32> to vector<8x11xf32>
    %5 = arith.addf %2, %4 : vector<8x11xf32>
    %c0_5 = arith.constant 0 : index
    %c0_6 = arith.constant 0 : index
    %6 = vector.load %arg4[%c0_5, %c0_6] : memref<8x11xf32, #tpu.memory_space<vmem>>, vector<8x11xf32>
    tpu.vector_store %arg4[%c0_5, %c0_6], %5 {strides = array<i32>} : memref<8x11xf32, #tpu.memory_space<vmem>>, vector<8x11xf32>,
    return
  }
  func.func @transform_0(%arg0: i32) -> (i32, i32) {
    %c0_i32 = arith.constant 0 : i32
    %c0_i32_0 = arith.constant 0 : i32
    return %arg0, %c0_i32 : i32, i32
  }
  func.func @transform_1(%arg0: i32) -> (i32, i32) {
    %c0_i32 = arith.constant 0 : i32
    %c0_i32_0 = arith.constant 0 : i32
    %c0_i32_1 = arith.constant 0 : i32
    return %c0_i32, %c0_i32_0 : i32, i32
  }
  func.func @transform_2(%arg0: i32) -> (i32, i32) {
    %c0_i32 = arith.constant 0 : i32
    %c0_i32_0 = arith.constant 0 : i32
    %c0_i32_1 = arith.constant 0 : i32
    return %c0_i32, %c0_i32_0 : i32, i32
  }
  func.func @transform_3(%arg0: i32) -> (i32, i32) {
    %c0_i32 = arith.constant 0 : i32
    %c0_i32_0 = arith.constant 0 : i32
    return %arg0, %c0_i32 : i32, i32
  }
}

module attributes {stable_mosaic.version = 11 : i64} {
  func.func @_dense_kernel(%arg0: i32, %arg1: memref<80x32xbf16, #tpu.memory_space<vmem>>, %arg2: memref<32x192xbf16, #tpu.memory_space<vmem>>, %arg3: memref<1x192xf32, #tpu.memory_space<vmem>>, %arg4: memref<80x192xbf16, #tpu.memory_space<vmem>>) attributes {dimension_semantics = [#tpu.dimension_semantics<parallel>], iteration_bounds = array<i64: 2>, scalar_prefetch = 0 : i64, scratch_operands = 0 : i64, tpu.core_type = #tpu.core_type<tc>, window_params = [{transform_indices = @transform_0, window_bounds = array<i64: 80, 32>}, {pipeline_mode = #tpu.pipeline_mode<synchronous>, transform_indices = @transform_1, window_bounds = array<i64: 32, 192>}, {pipeline_mode = #tpu.pipeline_mode<synchronous>, transform_indices = @transform_2, window_bounds = array<i64: 1, 192>}, {transform_indices = @transform_3, window_bounds = array<i64: 80, 192>}]} {
    %c0 = arith.constant 0 : index
    %c0_0 = arith.constant 0 : index
    %0 = vector.load %arg1[%c0, %c0_0] : memref<80x32xbf16, #tpu.memory_space<vmem>>, vector<80x32xbf16>
    %c0_1 = arith.constant 0 : index
    %c0_2 = arith.constant 0 : index
    %1 = vector.load %arg2[%c0_1, %c0_2] : memref<32x192xbf16, #tpu.memory_space<vmem>>, vector<32x192xbf16>
    %cst = arith.constant dense<0.000000e+00> : vector<80x192xf32>
    %2 = tpu.matmul %0, %1, %cst {dimension_numbers = #tpu.dot_dimension_numbers<[1], [0], [0], [1], [0, 0, 1, 1], [], []>} : vector<80x32xbf16>, vector<32x192xbf16>, vector<80x192xf32> -> vector<80x192xf32>
    %c0_3 = arith.constant 0 : index
    %c0_4 = arith.constant 0 : index
    %3 = vector.load %arg3[%c0_3, %c0_4] : memref<1x192xf32, #tpu.memory_space<vmem>>, vector<1x192xf32>
    %4 = vector.broadcast %3 : vector<1x192xf32> to vector<80x192xf32>
    %5 = arith.addf %2, %4 : vector<80x192xf32>
    %cst_5 = arith.constant 0.000000e+00 : f32
    %6 = vector.broadcast %cst_5 : f32 to vector<80x192xf32>
    %7 = arith.maximumf %5, %6 : vector<80x192xf32>
    %8 = arith.truncf %7 : vector<80x192xf32> to vector<80x192xbf16>
    %c0_6 = arith.constant 0 : index
    %c0_7 = arith.constant 0 : index
    %9 = vector.load %arg4[%c0_6, %c0_7] : memref<80x192xbf16, #tpu.memory_space<vmem>>, vector<80x192xbf16>
    tpu.vector_store %arg4[%c0_6, %c0_7], %8 {strides = array<i32>} : memref<80x192xbf16, #tpu.memory_space<vmem>>, vector<80x192xbf16>,
    return
  }
  func.func @transform_0(%arg0: i32) -> (i32, i32) {
    %c0_i32 = arith.constant 0 : i32
    %c0_i32_0 = arith.constant 0 : i32
    return %arg0, %c0_i32 : i32, i32
  }
  func.func @transform_1(%arg0: i32) -> (i32, i32) {
    %c0_i32 = arith.constant 0 : i32
    %c0_i32_0 = arith.constant 0 : i32
    %c0_i32_1 = arith.constant 0 : i32
    return %c0_i32, %c0_i32_0 : i32, i32
  }
  func.func @transform_2(%arg0: i32) -> (i32, i32) {
    %c0_i32 = arith.constant 0 : i32
    %c0_i32_0 = arith.constant 0 : i32
    %c0_i32_1 = arith.constant 0 : i32
    return %c0_i32, %c0_i32_0 : i32, i32
  }
  func.func @transform_3(%arg0: i32) -> (i32, i32) {
    %c0_i32 = arith.constant 0 : i32
    %c0_i32_0 = arith.constant 0 : i32
    return %arg0, %c0_i32 : i32, i32
  }
}

module attributes {stable_mosaic.version = 11 : i64} {
  func.func @_ln_dense_kernel(%arg0: i32, %arg1: memref<80x192xbf16, #tpu.memory_space<vmem>>, %arg2: memref<1x192xf32, #tpu.memory_space<vmem>>, %arg3: memref<1x192xf32, #tpu.memory_space<vmem>>, %arg4: memref<192x64xbf16, #tpu.memory_space<vmem>>, %arg5: memref<1x64xf32, #tpu.memory_space<vmem>>, %arg6: memref<80x64xbf16, #tpu.memory_space<vmem>>) attributes {dimension_semantics = [#tpu.dimension_semantics<parallel>], iteration_bounds = array<i64: 2>, scalar_prefetch = 0 : i64, scratch_operands = 0 : i64, tpu.core_type = #tpu.core_type<tc>, window_params = [{transform_indices = @transform_0, window_bounds = array<i64: 80, 192>}, {pipeline_mode = #tpu.pipeline_mode<synchronous>, transform_indices = @transform_1, window_bounds = array<i64: 1, 192>}, {pipeline_mode = #tpu.pipeline_mode<synchronous>, transform_indices = @transform_2, window_bounds = array<i64: 1, 192>}, {pipeline_mode = #tpu.pipeline_mode<synchronous>, transform_indices = @transform_3, window_bounds = array<i64: 192, 64>}, {pipeline_mode = #tpu.pipeline_mode<synchronous>, transform_indices = @transform_4, window_bounds = array<i64: 1, 64>}, {transform_indices = @transform_5, window_bounds = array<i64: 80, 64>}]} {
    %c0 = arith.constant 0 : index
    %c0_0 = arith.constant 0 : index
    %0 = vector.load %arg1[%c0, %c0_0] : memref<80x192xbf16, #tpu.memory_space<vmem>>, vector<80x192xbf16>
    %1 = arith.extf %0 : vector<80x192xbf16> to vector<80x192xf32>
    %cst = arith.constant dense<0.000000e+00> : vector<80xf32>
    %2 = vector.multi_reduction <add>, %1, %cst [1] : vector<80x192xf32> to vector<80xf32>
    %3 = vector.shape_cast %2 : vector<80xf32> to vector<80x1xf32>
    %cst_1 = arith.constant 1.920000e+02 : f32
    %4 = vector.broadcast %cst_1 : f32 to vector<80x1xf32>
    %5 = arith.divf %3, %4 : vector<80x1xf32>
    %6 = vector.broadcast %5 : vector<80x1xf32> to vector<80x192xf32>
    %7 = arith.subf %1, %6 : vector<80x192xf32>
    %8 = arith.mulf %7, %7 : vector<80x192xf32>
    %cst_2 = arith.constant dense<0.000000e+00> : vector<80xf32>
    %9 = vector.multi_reduction <add>, %8, %cst_2 [1] : vector<80x192xf32> to vector<80xf32>
    %10 = vector.shape_cast %9 : vector<80xf32> to vector<80x1xf32>
    %cst_3 = arith.constant 1.920000e+02 : f32
    %11 = vector.broadcast %cst_3 : f32 to vector<80x1xf32>
    %12 = arith.divf %10, %11 : vector<80x1xf32>
    %13 = vector.broadcast %5 : vector<80x1xf32> to vector<80x192xf32>
    %14 = arith.subf %1, %13 : vector<80x192xf32>
    %cst_4 = arith.constant 9.99999974E-6 : f32
    %15 = vector.broadcast %cst_4 : f32 to vector<80x1xf32>
    %16 = arith.addf %12, %15 : vector<80x1xf32>
    %17 = math.rsqrt %16 : vector<80x1xf32>
    %18 = vector.broadcast %17 : vector<80x1xf32> to vector<80x192xf32>
    %19 = arith.mulf %14, %18 : vector<80x192xf32>
    %c0_5 = arith.constant 0 : index
    %c0_6 = arith.constant 0 : index
    %20 = vector.load %arg2[%c0_5, %c0_6] : memref<1x192xf32, #tpu.memory_space<vmem>>, vector<1x192xf32>
    %21 = vector.broadcast %20 : vector<1x192xf32> to vector<80x192xf32>
    %22 = arith.mulf %19, %21 : vector<80x192xf32>
    %c0_7 = arith.constant 0 : index
    %c0_8 = arith.constant 0 : index
    %23 = vector.load %arg3[%c0_7, %c0_8] : memref<1x192xf32, #tpu.memory_space<vmem>>, vector<1x192xf32>
    %24 = vector.broadcast %23 : vector<1x192xf32> to vector<80x192xf32>
    %25 = arith.addf %22, %24 : vector<80x192xf32>
    %26 = arith.truncf %25 : vector<80x192xf32> to vector<80x192xbf16>
    %c0_9 = arith.constant 0 : index
    %c0_10 = arith.constant 0 : index
    %27 = vector.load %arg4[%c0_9, %c0_10] : memref<192x64xbf16, #tpu.memory_space<vmem>>, vector<192x64xbf16>
    %cst_11 = arith.constant dense<0.000000e+00> : vector<80x64xf32>
    %28 = tpu.matmul %26, %27, %cst_11 {dimension_numbers = #tpu.dot_dimension_numbers<[1], [0], [0], [1], [0, 0, 1, 1], [], []>} : vector<80x192xbf16>, vector<192x64xbf16>, vector<80x64xf32> -> vector<80x64xf32>
    %c0_12 = arith.constant 0 : index
    %c0_13 = arith.constant 0 : index
    %29 = vector.load %arg5[%c0_12, %c0_13] : memref<1x64xf32, #tpu.memory_space<vmem>>, vector<1x64xf32>
    %30 = vector.broadcast %29 : vector<1x64xf32> to vector<80x64xf32>
    %31 = arith.addf %28, %30 : vector<80x64xf32>
    %32 = arith.truncf %31 : vector<80x64xf32> to vector<80x64xbf16>
    %c0_14 = arith.constant 0 : index
    %c0_15 = arith.constant 0 : index
    %33 = vector.load %arg6[%c0_14, %c0_15] : memref<80x64xbf16, #tpu.memory_space<vmem>>, vector<80x64xbf16>
    tpu.vector_store %arg6[%c0_14, %c0_15], %32 {strides = array<i32>} : memref<80x64xbf16, #tpu.memory_space<vmem>>, vector<80x64xbf16>,
    return
  }
  func.func @transform_0(%arg0: i32) -> (i32, i32) {
    %c0_i32 = arith.constant 0 : i32
    %c0_i32_0 = arith.constant 0 : i32
    return %arg0, %c0_i32 : i32, i32
  }
  func.func @transform_1(%arg0: i32) -> (i32, i32) {
    %c0_i32 = arith.constant 0 : i32
    %c0_i32_0 = arith.constant 0 : i32
    %c0_i32_1 = arith.constant 0 : i32
    return %c0_i32, %c0_i32_0 : i32, i32
  }
  func.func @transform_2(%arg0: i32) -> (i32, i32) {
    %c0_i32 = arith.constant 0 : i32
    %c0_i32_0 = arith.constant 0 : i32
    %c0_i32_1 = arith.constant 0 : i32
    return %c0_i32, %c0_i32_0 : i32, i32
  }
  func.func @transform_3(%arg0: i32) -> (i32, i32) {
    %c0_i32 = arith.constant 0 : i32
    %c0_i32_0 = arith.constant 0 : i32
    %c0_i32_1 = arith.constant 0 : i32
    return %c0_i32, %c0_i32_0 : i32, i32
  }
  func.func @transform_4(%arg0: i32) -> (i32, i32) {
    %c0_i32 = arith.constant 0 : i32
    %c0_i32_0 = arith.constant 0 : i32
    %c0_i32_1 = arith.constant 0 : i32
    return %c0_i32, %c0_i32_0 : i32, i32
  }
  func.func @transform_5(%arg0: i32) -> (i32, i32) {
    %c0_i32 = arith.constant 0 : i32
    %c0_i32_0 = arith.constant 0 : i32
    return %arg0, %c0_i32 : i32, i32
  }
}

module attributes {stable_mosaic.version = 11 : i64} {
  func.func @_tcn_stack_kernel(%arg0: i32, %arg1: i32, %arg2: memref<8xi32, #tpu.memory_space<smem>>, %arg3: memref<1x79x64xbf16, #tpu.memory_space<vmem>>, %arg4: memref<1x1x1x128xf32, #tpu.memory_space<vmem>>, %arg5: memref<1x64x128xbf16, #tpu.memory_space<vmem>>, %arg6: memref<1x1x128xf32, #tpu.memory_space<vmem>>, %arg7: memref<1x1x128xf32, #tpu.memory_space<vmem>>, %arg8: memref<1x3x128xf32, #tpu.memory_space<vmem>>, %arg9: memref<1x1x128xf32, #tpu.memory_space<vmem>>, %arg10: memref<1x1x128xf32, #tpu.memory_space<vmem>>, %arg11: memref<1x1x128xf32, #tpu.memory_space<vmem>>, %arg12: memref<1x128x64xbf16, #tpu.memory_space<vmem>>, %arg13: memref<1x1x64xf32, #tpu.memory_space<vmem>>, %arg14: memref<8xf32, #tpu.memory_space<smem>>, %arg15: memref<8xf32, #tpu.memory_space<smem>>, %arg16: memref<1x79x64xbf16, #tpu.memory_space<vmem>>, %arg17: memref<79x64xf32, #tpu.memory_space<vmem>>, %arg18: memref<95x128xf32, #tpu.memory_space<vmem>>) attributes {dimension_semantics = [#tpu.dimension_semantics<parallel>, #tpu.dimension_semantics<arbitrary>], iteration_bounds = array<i64: 2, 8>, scalar_prefetch = 1 : i64, scratch_operands = 2 : i64, tpu.core_type = #tpu.core_type<tc>, window_params = [{transform_indices = @transform_0, window_bounds = array<i64: 1, 79, 64>}, {transform_indices = @transform_1, window_bounds = array<i64: 1, 1, 1, 128>}, {transform_indices = @transform_2, window_bounds = array<i64: 1, 64, 128>}, {transform_indices = @transform_3, window_bounds = array<i64: 1, 1, 128>}, {transform_indices = @transform_4, window_bounds = array<i64: 1, 1, 128>}, {transform_indices = @transform_5, window_bounds = array<i64: 1, 3, 128>}, {transform_indices = @transform_6, window_bounds = array<i64: 1, 1, 128>}, {transform_indices = @transform_7, window_bounds = array<i64: 1, 1, 128>}, {transform_indices = @transform_8, window_bounds = array<i64: 1, 1, 128>}, {transform_indices = @transform_9, window_bounds = array<i64: 1, 128, 64>}, {transform_indices = @transform_10, window_bounds = array<i64: 1, 1, 64>}, {transform_indices = @transform_11, window_bounds = array<i64: 8>}, {transform_indices = @transform_12, window_bounds = array<i64: 8>}, {transform_indices = @transform_13, window_bounds = array<i64: 1, 79, 64>}]} {
    %c0_i32 = arith.constant 0 : i32
    %0 = arith.cmpi eq, %arg1, %c0_i32 : i32
    %1 = arith.extui %0 : i1 to i32
    %c0_i32_0 = arith.constant 0 : i32
    %2 = arith.cmpi ne, %1, %c0_i32_0 : i32
    scf.if %2 {
      %c0_64 = arith.constant 0 : index
      %c0_65 = arith.constant 0 : index
      %c0_66 = arith.constant 0 : index
      %124 = vector.load %arg3[%c0_64, %c0_65, %c0_66] : memref<1x79x64xbf16, #tpu.memory_space<vmem>>, vector<1x79x64xbf16>
      %125 = vector.shape_cast %124 : vector<1x79x64xbf16> to vector<79x64xbf16>
      %126 = arith.extf %125 : vector<79x64xbf16> to vector<79x64xf32>
      %c0_67 = arith.constant 0 : index
      %c0_68 = arith.constant 0 : index
      %127 = vector.load %arg17[%c0_67, %c0_68] : memref<79x64xf32, #tpu.memory_space<vmem>>, vector<79x64xf32>
      tpu.vector_store %arg17[%c0_67, %c0_68], %126 {strides = array<i32>} : memref<79x64xf32, #tpu.memory_space<vmem>>, vector<79x64xf32>,
    } else {
    }
    %c0 = arith.constant 0 : index
    %c0_1 = arith.constant 0 : index
    %3 = vector.load %arg17[%c0, %c0_1] : memref<79x64xf32, #tpu.memory_space<vmem>>, vector<79x64xf32>
    %4 = arith.truncf %3 : vector<79x64xf32> to vector<79x64xbf16>
    %c0_2 = arith.constant 0 : index
    %c0_3 = arith.constant 0 : index
    %c0_4 = arith.constant 0 : index
    %5 = vector.load %arg5[%c0_2, %c0_3, %c0_4] : memref<1x64x128xbf16, #tpu.memory_space<vmem>>, vector<1x64x128xbf16>
    %6 = vector.shape_cast %5 : vector<1x64x128xbf16> to vector<64x128xbf16>
    %cst = arith.constant dense<0.000000e+00> : vector<79x128xf32>
    %7 = tpu.matmul %4, %6, %cst {dimension_numbers = #tpu.dot_dimension_numbers<[1], [0], [0], [1], [0, 0, 1, 1], [], []>} : vector<79x64xbf16>, vector<64x128xbf16>, vector<79x128xf32> -> vector<79x128xf32>
    %c0_5 = arith.constant 0 : index
    %c0_6 = arith.constant 0 : index
    %c0_7 = arith.constant 0 : index
    %c0_8 = arith.constant 0 : index
    %8 = vector.load %arg4[%c0_5, %c0_6, %c0_7, %c0_8] : memref<1x1x1x128xf32, #tpu.memory_space<vmem>>, vector<1x1x1x128xf32>
    %9 = vector.shape_cast %8 : vector<1x1x1x128xf32> to vector<1x128xf32>
    %10 = vector.broadcast %9 : vector<1x128xf32> to vector<79x128xf32>
    %11 = arith.addf %7, %10 : vector<79x128xf32>
    %12 = arith.index_cast %arg1 : i32 to index
    %13 = memref.load %arg14[%12] : memref<8xf32, #tpu.memory_space<smem>>
    %cst_9 = arith.constant 0.000000e+00 : f32
    %14 = vector.broadcast %cst_9 : f32 to vector<79x128xf32>
    %15 = arith.cmpf oge, %11, %14 : vector<79x128xf32>
    %16 = vector.broadcast %13 : f32 to vector<79x128xf32>
    %17 = arith.mulf %16, %11 : vector<79x128xf32>
    %18 = arith.select %15, %11, %17 : vector<79x128xi1>, vector<79x128xf32>
    %19 = vector.shape_cast %18 : vector<79x128xf32> to vector<1x79x128xf32>
    %cst_10 = arith.constant dense<0.000000e+00> : vector<1xf32>
    %20 = vector.multi_reduction <add>, %19, %cst_10 [1, 2] : vector<1x79x128xf32> to vector<1xf32>
    %21 = vector.shape_cast %20 : vector<1xf32> to vector<1x1x1xf32>
    %22 = vector.extract %21[0, 0, 0] : f32 from vector<1x1x1xf32>
    %cst_11 = arith.constant 9.88924075E-5 : f32
    %23 = arith.mulf %22, %cst_11 : f32
    %24 = vector.broadcast %23 : f32 to vector<79x128xf32>
    %25 = arith.subf %18, %24 : vector<79x128xf32>
    %26 = arith.mulf %25, %25 : vector<79x128xf32>
    %27 = vector.shape_cast %26 : vector<79x128xf32> to vector<1x79x128xf32>
    %cst_12 = arith.constant dense<0.000000e+00> : vector<1xf32>
    %28 = vector.multi_reduction <add>, %27, %cst_12 [1, 2] : vector<1x79x128xf32> to vector<1xf32>
    %29 = vector.shape_cast %28 : vector<1xf32> to vector<1x1x1xf32>
    %30 = vector.extract %29[0, 0, 0] : f32 from vector<1x1x1xf32>
    %cst_13 = arith.constant 9.88924075E-5 : f32
    %31 = arith.mulf %30, %cst_13 : f32
    %cst_14 = arith.constant 9.99999974E-6 : f32
    %32 = arith.addf %31, %cst_14 : f32
    %33 = math.rsqrt %32 : f32
    %34 = vector.broadcast %33 : f32 to vector<79x128xf32>
    %35 = arith.mulf %25, %34 : vector<79x128xf32>
    %c0_15 = arith.constant 0 : index
    %c0_16 = arith.constant 0 : index
    %c0_17 = arith.constant 0 : index
    %36 = vector.load %arg6[%c0_15, %c0_16, %c0_17] : memref<1x1x128xf32, #tpu.memory_space<vmem>>, vector<1x1x128xf32>
    %37 = vector.shape_cast %36 : vector<1x1x128xf32> to vector<1x128xf32>
    %38 = vector.broadcast %37 : vector<1x128xf32> to vector<79x128xf32>
    %39 = arith.mulf %35, %38 : vector<79x128xf32>
    %c0_18 = arith.constant 0 : index
    %c0_19 = arith.constant 0 : index
    %c0_20 = arith.constant 0 : index
    %40 = vector.load %arg7[%c0_18, %c0_19, %c0_20] : memref<1x1x128xf32, #tpu.memory_space<vmem>>, vector<1x1x128xf32>
    %41 = vector.shape_cast %40 : vector<1x1x128xf32> to vector<1x128xf32>
    %42 = vector.broadcast %41 : vector<1x128xf32> to vector<79x128xf32>
    %43 = arith.addf %39, %42 : vector<79x128xf32>
    %44 = arith.index_cast %arg1 : i32 to index
    %45 = memref.load %arg2[%44] : memref<8xi32, #tpu.memory_space<smem>>
    %cst_21 = arith.constant 0.000000e+00 : f32
    %46 = vector.broadcast %cst_21 : f32 to vector<8x128xf32>
    %c0_22 = arith.constant 0 : index
    %c0_23 = arith.constant 0 : index
    %47 = vector.load %arg18[%c0_22, %c0_23] : memref<95x128xf32, #tpu.memory_space<vmem>>, vector<8x128xf32>
    tpu.vector_store %arg18[%c0_22, %c0_23], %46 {strides = array<i32>} : memref<95x128xf32, #tpu.memory_space<vmem>>, vector<8x128xf32>,
    %c87 = arith.constant 87 : index
    %c0_24 = arith.constant 0 : index
    %48 = vector.load %arg18[%c87, %c0_24] : memref<95x128xf32, #tpu.memory_space<vmem>>, vector<8x128xf32>
    tpu.vector_store %arg18[%c87, %c0_24], %46 {strides = array<i32>} : memref<95x128xf32, #tpu.memory_space<vmem>>, vector<8x128xf32>,
    %c8 = arith.constant 8 : index
    %c0_25 = arith.constant 0 : index
    %49 = vector.load %arg18[%c8, %c0_25] : memref<95x128xf32, #tpu.memory_space<vmem>>, vector<79x128xf32>
    tpu.vector_store %arg18[%c8, %c0_25], %43 {strides = array<i32>} : memref<95x128xf32, #tpu.memory_space<vmem>>, vector<79x128xf32>,
    %cst_26 = arith.constant 0.000000e+00 : f32
    %50 = vector.broadcast %cst_26 : f32 to vector<79x128xf32>
    %c-1_i32 = arith.constant -1 : i32
    %51 = arith.muli %c-1_i32, %45 : i32
    %c8_i32 = arith.constant 8 : i32
    %52 = arith.addi %c8_i32, %51 : i32
    %53 = arith.index_cast %52 : i32 to index
    %c0_27 = arith.constant 0 : index
    %54 = vector.load %arg18[%53, %c0_27] : memref<95x128xf32, #tpu.memory_space<vmem>>, vector<79x128xf32>
    %c0_28 = arith.constant 0 : index
    %c0_29 = arith.constant 0 : index
    %c0_30 = arith.constant 0 : index
    %55 = vector.load %arg8[%c0_28, %c0_29, %c0_30] : memref<1x3x128xf32, #tpu.memory_space<vmem>>, vector<1x1x128xf32>
    %56 = vector.shape_cast %55 : vector<1x1x128xf32> to vector<1x128xf32>
    %57 = vector.broadcast %56 : vector<1x128xf32> to vector<79x128xf32>
    %58 = arith.mulf %54, %57 : vector<79x128xf32>
    %59 = arith.addf %50, %58 : vector<79x128xf32>
    %c8_31 = arith.constant 8 : index
    %c0_32 = arith.constant 0 : index
    %60 = vector.load %arg18[%c8_31, %c0_32] : memref<95x128xf32, #tpu.memory_space<vmem>>, vector<79x128xf32>
    %c0_33 = arith.constant 0 : index
    %c1 = arith.constant 1 : index
    %c0_34 = arith.constant 0 : index
    %61 = vector.load %arg8[%c0_33, %c1, %c0_34] : memref<1x3x128xf32, #tpu.memory_space<vmem>>, vector<1x1x128xf32>
    %62 = vector.shape_cast %61 : vector<1x1x128xf32> to vector<1x128xf32>
    %63 = vector.broadcast %62 : vector<1x128xf32> to vector<79x128xf32>
    %64 = arith.mulf %60, %63 : vector<79x128xf32>
    %65 = arith.addf %59, %64 : vector<79x128xf32>
    %c1_i32 = arith.constant 1 : i32
    %66 = arith.muli %c1_i32, %45 : i32
    %c8_i32_35 = arith.constant 8 : i32
    %67 = arith.addi %c8_i32_35, %66 : i32
    %68 = arith.index_cast %67 : i32 to index
    %c0_36 = arith.constant 0 : index
    %69 = vector.load %arg18[%68, %c0_36] : memref<95x128xf32, #tpu.memory_space<vmem>>, vector<79x128xf32>
    %c0_37 = arith.constant 0 : index
    %c2 = arith.constant 2 : index
    %c0_38 = arith.constant 0 : index
    %70 = vector.load %arg8[%c0_37, %c2, %c0_38] : memref<1x3x128xf32, #tpu.memory_space<vmem>>, vector<1x1x128xf32>
    %71 = vector.shape_cast %70 : vector<1x1x128xf32> to vector<1x128xf32>
    %72 = vector.broadcast %71 : vector<1x128xf32> to vector<79x128xf32>
    %73 = arith.mulf %69, %72 : vector<79x128xf32>
    %74 = arith.addf %65, %73 : vector<79x128xf32>
    %c0_39 = arith.constant 0 : index
    %c0_40 = arith.constant 0 : index
    %c0_41 = arith.constant 0 : index
    %75 = vector.load %arg9[%c0_39, %c0_40, %c0_41] : memref<1x1x128xf32, #tpu.memory_space<vmem>>, vector<1x1x128xf32>
    %76 = vector.shape_cast %75 : vector<1x1x128xf32> to vector<1x128xf32>
    %77 = vector.broadcast %76 : vector<1x128xf32> to vector<79x128xf32>
    %78 = arith.addf %74, %77 : vector<79x128xf32>
    %79 = arith.index_cast %arg1 : i32 to index
    %80 = memref.load %arg15[%79] : memref<8xf32, #tpu.memory_space<smem>>
    %cst_42 = arith.constant 0.000000e+00 : f32
    %81 = vector.broadcast %cst_42 : f32 to vector<79x128xf32>
    %82 = arith.cmpf oge, %78, %81 : vector<79x128xf32>
    %83 = vector.broadcast %80 : f32 to vector<79x128xf32>
    %84 = arith.mulf %83, %78 : vector<79x128xf32>
    %85 = arith.select %82, %78, %84 : vector<79x128xi1>, vector<79x128xf32>
    %86 = vector.shape_cast %85 : vector<79x128xf32> to vector<1x79x128xf32>
    %cst_43 = arith.constant dense<0.000000e+00> : vector<1xf32>
    %87 = vector.multi_reduction <add>, %86, %cst_43 [1, 2] : vector<1x79x128xf32> to vector<1xf32>
    %88 = vector.shape_cast %87 : vector<1xf32> to vector<1x1x1xf32>
    %89 = vector.extract %88[0, 0, 0] : f32 from vector<1x1x1xf32>
    %cst_44 = arith.constant 9.88924075E-5 : f32
    %90 = arith.mulf %89, %cst_44 : f32
    %91 = vector.broadcast %90 : f32 to vector<79x128xf32>
    %92 = arith.subf %85, %91 : vector<79x128xf32>
    %93 = arith.mulf %92, %92 : vector<79x128xf32>
    %94 = vector.shape_cast %93 : vector<79x128xf32> to vector<1x79x128xf32>
    %cst_45 = arith.constant dense<0.000000e+00> : vector<1xf32>
    %95 = vector.multi_reduction <add>, %94, %cst_45 [1, 2] : vector<1x79x128xf32> to vector<1xf32>
    %96 = vector.shape_cast %95 : vector<1xf32> to vector<1x1x1xf32>
    %97 = vector.extract %96[0, 0, 0] : f32 from vector<1x1x1xf32>
    %cst_46 = arith.constant 9.88924075E-5 : f32
    %98 = arith.mulf %97, %cst_46 : f32
    %cst_47 = arith.constant 9.99999974E-6 : f32
    %99 = arith.addf %98, %cst_47 : f32
    %100 = math.rsqrt %99 : f32
    %101 = vector.broadcast %100 : f32 to vector<79x128xf32>
    %102 = arith.mulf %92, %101 : vector<79x128xf32>
    %c0_48 = arith.constant 0 : index
    %c0_49 = arith.constant 0 : index
    %c0_50 = arith.constant 0 : index
    %103 = vector.load %arg10[%c0_48, %c0_49, %c0_50] : memref<1x1x128xf32, #tpu.memory_space<vmem>>, vector<1x1x128xf32>
    %104 = vector.shape_cast %103 : vector<1x1x128xf32> to vector<1x128xf32>
    %105 = vector.broadcast %104 : vector<1x128xf32> to vector<79x128xf32>
    %106 = arith.mulf %102, %105 : vector<79x128xf32>
    %c0_51 = arith.constant 0 : index
    %c0_52 = arith.constant 0 : index
    %c0_53 = arith.constant 0 : index
    %107 = vector.load %arg11[%c0_51, %c0_52, %c0_53] : memref<1x1x128xf32, #tpu.memory_space<vmem>>, vector<1x1x128xf32>
    %108 = vector.shape_cast %107 : vector<1x1x128xf32> to vector<1x128xf32>
    %109 = vector.broadcast %108 : vector<1x128xf32> to vector<79x128xf32>
    %110 = arith.addf %106, %109 : vector<79x128xf32>
    %111 = arith.truncf %110 : vector<79x128xf32> to vector<79x128xbf16>
    %c0_54 = arith.constant 0 : index
    %c0_55 = arith.constant 0 : index
    %c0_56 = arith.constant 0 : index
    %112 = vector.load %arg12[%c0_54, %c0_55, %c0_56] : memref<1x128x64xbf16, #tpu.memory_space<vmem>>, vector<1x128x64xbf16>
    %113 = vector.shape_cast %112 : vector<1x128x64xbf16> to vector<128x64xbf16>
    %cst_57 = arith.constant dense<0.000000e+00> : vector<79x64xf32>
    %114 = tpu.matmul %111, %113, %cst_57 {dimension_numbers = #tpu.dot_dimension_numbers<[1], [0], [0], [1], [0, 0, 1, 1], [], []>} : vector<79x128xbf16>, vector<128x64xbf16>, vector<79x64xf32> -> vector<79x64xf32>
    %c0_58 = arith.constant 0 : index
    %c0_59 = arith.constant 0 : index
    %c0_60 = arith.constant 0 : index
    %115 = vector.load %arg13[%c0_58, %c0_59, %c0_60] : memref<1x1x64xf32, #tpu.memory_space<vmem>>, vector<1x1x64xf32>
    %116 = vector.shape_cast %115 : vector<1x1x64xf32> to vector<1x64xf32>
    %117 = vector.broadcast %116 : vector<1x64xf32> to vector<79x64xf32>
    %118 = arith.addf %114, %117 : vector<79x64xf32>
    %119 = arith.addf %3, %118 : vector<79x64xf32>
    %c0_61 = arith.constant 0 : index
    %c0_62 = arith.constant 0 : index
    %120 = vector.load %arg17[%c0_61, %c0_62] : memref<79x64xf32, #tpu.memory_space<vmem>>, vector<79x64xf32>
    tpu.vector_store %arg17[%c0_61, %c0_62], %119 {strides = array<i32>} : memref<79x64xf32, #tpu.memory_space<vmem>>, vector<79x64xf32>,
    %c7_i32 = arith.constant 7 : i32
    %121 = arith.cmpi eq, %arg1, %c7_i32 : i32
    %122 = arith.extui %121 : i1 to i32
    %c0_i32_63 = arith.constant 0 : i32
    %123 = arith.cmpi ne, %122, %c0_i32_63 : i32
    scf.if %123 {
      %124 = arith.truncf %119 : vector<79x64xf32> to vector<79x64xbf16>
      %c0_64 = arith.constant 0 : index
      %c0_65 = arith.constant 0 : index
      %c0_66 = arith.constant 0 : index
      %125 = vector.load %arg16[%c0_64, %c0_65, %c0_66] : memref<1x79x64xbf16, #tpu.memory_space<vmem>>, vector<1x79x64xbf16>
      %126 = vector.shape_cast %125 : vector<1x79x64xbf16> to vector<79x64xbf16>
      %127 = vector.shape_cast %124 : vector<79x64xbf16> to vector<1x79x64xbf16>
      tpu.vector_store %arg16[%c0_64, %c0_65, %c0_66], %127 {strides = array<i32>} : memref<1x79x64xbf16, #tpu.memory_space<vmem>>, vector<1x79x64xbf16>,
    } else {
    }
    return
  }
  func.func @transform_0(%arg0: i32, %arg1: i32, %arg2: memref<8xi32, #tpu.memory_space<smem>>) -> (i32, i32, i32) {
    %c0_i32 = arith.constant 0 : i32
    %c0_i32_0 = arith.constant 0 : i32
    %c0_i32_1 = arith.constant 0 : i32
    return %arg0, %c0_i32, %c0_i32_0 : i32, i32, i32
  }
  func.func @transform_1(%arg0: i32, %arg1: i32, %arg2: memref<8xi32, #tpu.memory_space<smem>>) -> (i32, i32, i32, i32) {
    %c0_i32 = arith.constant 0 : i32
    %c0_i32_0 = arith.constant 0 : i32
    %c0_i32_1 = arith.constant 0 : i32
    return %arg1, %arg0, %c0_i32, %c0_i32_0 : i32, i32, i32, i32
  }
  func.func @transform_2(%arg0: i32, %arg1: i32, %arg2: memref<8xi32, #tpu.memory_space<smem>>) -> (i32, i32, i32) {
    %c0_i32 = arith.constant 0 : i32
    %c0_i32_0 = arith.constant 0 : i32
    %c0_i32_1 = arith.constant 0 : i32
    return %arg1, %c0_i32, %c0_i32_0 : i32, i32, i32
  }
  func.func @transform_3(%arg0: i32, %arg1: i32, %arg2: memref<8xi32, #tpu.memory_space<smem>>) -> (i32, i32, i32) {
    %c0_i32 = arith.constant 0 : i32
    %c0_i32_0 = arith.constant 0 : i32
    %c0_i32_1 = arith.constant 0 : i32
    return %arg1, %c0_i32, %c0_i32_0 : i32, i32, i32
  }
  func.func @transform_4(%arg0: i32, %arg1: i32, %arg2: memref<8xi32, #tpu.memory_space<smem>>) -> (i32, i32, i32) {
    %c0_i32 = arith.constant 0 : i32
    %c0_i32_0 = arith.constant 0 : i32
    %c0_i32_1 = arith.constant 0 : i32
    return %arg1, %c0_i32, %c0_i32_0 : i32, i32, i32
  }
  func.func @transform_5(%arg0: i32, %arg1: i32, %arg2: memref<8xi32, #tpu.memory_space<smem>>) -> (i32, i32, i32) {
    %c0_i32 = arith.constant 0 : i32
    %c0_i32_0 = arith.constant 0 : i32
    %c0_i32_1 = arith.constant 0 : i32
    return %arg1, %c0_i32, %c0_i32_0 : i32, i32, i32
  }
  func.func @transform_6(%arg0: i32, %arg1: i32, %arg2: memref<8xi32, #tpu.memory_space<smem>>) -> (i32, i32, i32) {
    %c0_i32 = arith.constant 0 : i32
    %c0_i32_0 = arith.constant 0 : i32
    %c0_i32_1 = arith.constant 0 : i32
    return %arg1, %c0_i32, %c0_i32_0 : i32, i32, i32
  }
  func.func @transform_7(%arg0: i32, %arg1: i32, %arg2: memref<8xi32, #tpu.memory_space<smem>>) -> (i32, i32, i32) {
    %c0_i32 = arith.constant 0 : i32
    %c0_i32_0 = arith.constant 0 : i32
    %c0_i32_1 = arith.constant 0 : i32
    return %arg1, %c0_i32, %c0_i32_0 : i32, i32, i32
  }
  func.func @transform_8(%arg0: i32, %arg1: i32, %arg2: memref<8xi32, #tpu.memory_space<smem>>) -> (i32, i32, i32) {
    %c0_i32 = arith.constant 0 : i32
    %c0_i32_0 = arith.constant 0 : i32
    %c0_i32_1 = arith.constant 0 : i32
    return %arg1, %c0_i32, %c0_i32_0 : i32, i32, i32
  }
  func.func @transform_9(%arg0: i32, %arg1: i32, %arg2: memref<8xi32, #tpu.memory_space<smem>>) -> (i32, i32, i32) {
    %c0_i32 = arith.constant 0 : i32
    %c0_i32_0 = arith.constant 0 : i32
    %c0_i32_1 = arith.constant 0 : i32
    return %arg1, %c0_i32, %c0_i32_0 : i32, i32, i32
  }
  func.func @transform_10(%arg0: i32, %arg1: i32, %arg2: memref<8xi32, #tpu.memory_space<smem>>) -> (i32, i32, i32) {
    %c0_i32 = arith.constant 0 : i32
    %c0_i32_0 = arith.constant 0 : i32
    %c0_i32_1 = arith.constant 0 : i32
    return %arg1, %c0_i32, %c0_i32_0 : i32, i32, i32
  }
  func.func @transform_11(%arg0: i32, %arg1: i32, %arg2: memref<8xi32, #tpu.memory_space<smem>>) -> i32 {
    %c0_i32 = arith.constant 0 : i32
    %c0_i32_0 = arith.constant 0 : i32
    return %c0_i32 : i32
  }
  func.func @transform_12(%arg0: i32, %arg1: i32, %arg2: memref<8xi32, #tpu.memory_space<smem>>) -> i32 {
    %c0_i32 = arith.constant 0 : i32
    %c0_i32_0 = arith.constant 0 : i32
    return %c0_i32 : i32
  }
  func.func @transform_13(%arg0: i32, %arg1: i32, %arg2: memref<8xi32, #tpu.memory_space<smem>>) -> (i32, i32, i32) {
    %c0_i32 = arith.constant 0 : i32
    %c0_i32_0 = arith.constant 0 : i32
    %c0_i32_1 = arith.constant 0 : i32
    return %arg0, %c0_i32, %c0_i32_0 : i32, i32, i32
  }
}

module attributes {stable_mosaic.version = 11 : i64} {
  func.func @_mask_mul_kernel(%arg0: i32, %arg1: memref<80x64xbf16, #tpu.memory_space<vmem>>, %arg2: memref<80x192xbf16, #tpu.memory_space<vmem>>, %arg3: memref<64x192xbf16, #tpu.memory_space<vmem>>, %arg4: memref<1x192xf32, #tpu.memory_space<vmem>>, %arg5: memref<80x192xbf16, #tpu.memory_space<vmem>>) attributes {dimension_semantics = [#tpu.dimension_semantics<parallel>], iteration_bounds = array<i64: 2>, scalar_prefetch = 0 : i64, scratch_operands = 0 : i64, tpu.core_type = #tpu.core_type<tc>, window_params = [{transform_indices = @transform_0, window_bounds = array<i64: 80, 64>}, {transform_indices = @transform_1, window_bounds = array<i64: 80, 192>}, {pipeline_mode = #tpu.pipeline_mode<synchronous>, transform_indices = @transform_2, window_bounds = array<i64: 64, 192>}, {pipeline_mode = #tpu.pipeline_mode<synchronous>, transform_indices = @transform_3, window_bounds = array<i64: 1, 192>}, {transform_indices = @transform_4, window_bounds = array<i64: 80, 192>}]} {
    %c0 = arith.constant 0 : index
    %c0_0 = arith.constant 0 : index
    %0 = vector.load %arg1[%c0, %c0_0] : memref<80x64xbf16, #tpu.memory_space<vmem>>, vector<80x64xbf16>
    %c0_1 = arith.constant 0 : index
    %c0_2 = arith.constant 0 : index
    %1 = vector.load %arg3[%c0_1, %c0_2] : memref<64x192xbf16, #tpu.memory_space<vmem>>, vector<64x192xbf16>
    %cst = arith.constant dense<0.000000e+00> : vector<80x192xf32>
    %2 = tpu.matmul %0, %1, %cst {dimension_numbers = #tpu.dot_dimension_numbers<[1], [0], [0], [1], [0, 0, 1, 1], [], []>} : vector<80x64xbf16>, vector<64x192xbf16>, vector<80x192xf32> -> vector<80x192xf32>
    %c0_3 = arith.constant 0 : index
    %c0_4 = arith.constant 0 : index
    %3 = vector.load %arg4[%c0_3, %c0_4] : memref<1x192xf32, #tpu.memory_space<vmem>>, vector<1x192xf32>
    %4 = vector.broadcast %3 : vector<1x192xf32> to vector<80x192xf32>
    %5 = arith.addf %2, %4 : vector<80x192xf32>
    %cst_5 = arith.constant 0.000000e+00 : f32
    %6 = vector.broadcast %cst_5 : f32 to vector<80x192xf32>
    %7 = arith.maximumf %5, %6 : vector<80x192xf32>
    %c0_6 = arith.constant 0 : index
    %c0_7 = arith.constant 0 : index
    %8 = vector.load %arg2[%c0_6, %c0_7] : memref<80x192xbf16, #tpu.memory_space<vmem>>, vector<80x192xbf16>
    %9 = arith.extf %8 : vector<80x192xbf16> to vector<80x192xf32>
    %10 = arith.mulf %7, %9 : vector<80x192xf32>
    %11 = arith.truncf %10 : vector<80x192xf32> to vector<80x192xbf16>
    %c0_8 = arith.constant 0 : index
    %c0_9 = arith.constant 0 : index
    %12 = vector.load %arg5[%c0_8, %c0_9] : memref<80x192xbf16, #tpu.memory_space<vmem>>, vector<80x192xbf16>
    tpu.vector_store %arg5[%c0_8, %c0_9], %11 {strides = array<i32>} : memref<80x192xbf16, #tpu.memory_space<vmem>>, vector<80x192xbf16>,
    return
  }
  func.func @transform_0(%arg0: i32) -> (i32, i32) {
    %c0_i32 = arith.constant 0 : i32
    %c0_i32_0 = arith.constant 0 : i32
    return %arg0, %c0_i32 : i32, i32
  }
  func.func @transform_1(%arg0: i32) -> (i32, i32) {
    %c0_i32 = arith.constant 0 : i32
    %c0_i32_0 = arith.constant 0 : i32
    return %arg0, %c0_i32 : i32, i32
  }
  func.func @transform_2(%arg0: i32) -> (i32, i32) {
    %c0_i32 = arith.constant 0 : i32
    %c0_i32_0 = arith.constant 0 : i32
    %c0_i32_1 = arith.constant 0 : i32
    return %c0_i32, %c0_i32_0 : i32, i32
  }
  func.func @transform_3(%arg0: i32) -> (i32, i32) {
    %c0_i32 = arith.constant 0 : i32
    %c0_i32_0 = arith.constant 0 : i32
    %c0_i32_1 = arith.constant 0 : i32
    return %c0_i32, %c0_i32_0 : i32, i32
  }
  func.func @transform_4(%arg0: i32) -> (i32, i32) {
    %c0_i32 = arith.constant 0 : i32
    %c0_i32_0 = arith.constant 0 : i32
    return %arg0, %c0_i32 : i32, i32
  }
}

module attributes {stable_mosaic.version = 11 : i64} {
  func.func @_dense_kernel(%arg0: i32, %arg1: memref<80x192xbf16, #tpu.memory_space<vmem>>, %arg2: memref<192x56xbf16, #tpu.memory_space<vmem>>, %arg3: memref<1x56xf32, #tpu.memory_space<vmem>>, %arg4: memref<80x56xf32, #tpu.memory_space<vmem>>) attributes {dimension_semantics = [#tpu.dimension_semantics<parallel>], iteration_bounds = array<i64: 2>, scalar_prefetch = 0 : i64, scratch_operands = 0 : i64, tpu.core_type = #tpu.core_type<tc>, window_params = [{transform_indices = @transform_0, window_bounds = array<i64: 80, 192>}, {pipeline_mode = #tpu.pipeline_mode<synchronous>, transform_indices = @transform_1, window_bounds = array<i64: 192, 56>}, {pipeline_mode = #tpu.pipeline_mode<synchronous>, transform_indices = @transform_2, window_bounds = array<i64: 1, 56>}, {transform_indices = @transform_3, window_bounds = array<i64: 80, 56>}]} {
    %c0 = arith.constant 0 : index
    %c0_0 = arith.constant 0 : index
    %0 = vector.load %arg1[%c0, %c0_0] : memref<80x192xbf16, #tpu.memory_space<vmem>>, vector<80x192xbf16>
    %c0_1 = arith.constant 0 : index
    %c0_2 = arith.constant 0 : index
    %1 = vector.load %arg2[%c0_1, %c0_2] : memref<192x56xbf16, #tpu.memory_space<vmem>>, vector<192x56xbf16>
    %cst = arith.constant dense<0.000000e+00> : vector<80x56xf32>
    %2 = tpu.matmul %0, %1, %cst {dimension_numbers = #tpu.dot_dimension_numbers<[1], [0], [0], [1], [0, 0, 1, 1], [], []>} : vector<80x192xbf16>, vector<192x56xbf16>, vector<80x56xf32> -> vector<80x56xf32>
    %c0_3 = arith.constant 0 : index
    %c0_4 = arith.constant 0 : index
    %3 = vector.load %arg3[%c0_3, %c0_4] : memref<1x56xf32, #tpu.memory_space<vmem>>, vector<1x56xf32>
    %4 = vector.broadcast %3 : vector<1x56xf32> to vector<80x56xf32>
    %5 = arith.addf %2, %4 : vector<80x56xf32>
    %c0_5 = arith.constant 0 : index
    %c0_6 = arith.constant 0 : index
    %6 = vector.load %arg4[%c0_5, %c0_6] : memref<80x56xf32, #tpu.memory_space<vmem>>, vector<80x56xf32>
    tpu.vector_store %arg4[%c0_5, %c0_6], %5 {strides = array<i32>} : memref<80x56xf32, #tpu.memory_space<vmem>>, vector<80x56xf32>,
    return
  }
  func.func @transform_0(%arg0: i32) -> (i32, i32) {
    %c0_i32 = arith.constant 0 : i32
    %c0_i32_0 = arith.constant 0 : i32
    return %arg0, %c0_i32 : i32, i32
  }
  func.func @transform_1(%arg0: i32) -> (i32, i32) {
    %c0_i32 = arith.constant 0 : i32
    %c0_i32_0 = arith.constant 0 : i32
    %c0_i32_1 = arith.constant 0 : i32
    return %c0_i32, %c0_i32_0 : i32, i32
  }
  func.func @transform_2(%arg0: i32) -> (i32, i32) {
    %c0_i32 = arith.constant 0 : i32
    %c0_i32_0 = arith.constant 0 : i32
    %c0_i32_1 = arith.constant 0 : i32
    return %c0_i32, %c0_i32_0 : i32, i32
  }
  func.func @transform_3(%arg0: i32) -> (i32, i32) {
    %c0_i32 = arith.constant 0 : i32
    %c0_i32_0 = arith.constant 0 : i32
    return %arg0, %c0_i32 : i32, i32
  }
}

</mosaic_0001>

<bundles_post_ra>
// kernel: _lambda_.14
= control target key start
LH: loop header
LB: loop body
LE: loop exit
PB: predicated region body
PF: predicated region fallthrough
CT: control target
= control target key end

     0   :  { %s492_s12 = smov 0   ;;  %s544_s0 = inlined_call_operand.vmem [shape: bf16[78,32], index: 0, kind: input, shape index: {}]   ;;  %s545_s1 = inlined_call_operand.vmem [shape: bf16[32,192], index: 1, kind: input, shape index: {}]   ;;  %s546_s2 = inlined_call_operand.vmem [shape: f32[1,192], index: 2, kind: input, shape index: {}]   ;;  %s547_s3 = inlined_call_operand.vmem [shape: bf16[78,192], index: 3, kind: output, shape index: {}]  }
   0x1 LB: > { %s410_s13 = sadd.s32 4294967295, %s469_s12   ;;  %p414_p0 = scmp.ge.s32.totalorder %s469_s12, 1  ;;  %s469_s12 = sphi %s492_s12, %s13_s12  }
   0x2   : > { %p138_p1 = scmp.lt.s32.totalorder %s469_s12, 3 }
   0x4   : > { %p139_p2 = pnand %p414_p0, %p138_p1 }
   0x5   : > { %v454_v0 = vld [vmem:[%s545_s1 + $0x4] ss:$8 sps:$4 sm:$0xff] (!%p139_p2)   ;;  %s163_s16 = smul.u32 (!%p139_p2), 5, %s410_s13  ;;  %v456_v1 = vld [vmem:[%s545_s1] ss:$8 sps:$4 sm:$0xff] (!%p139_p2)   ;;  %v471_v2 = vmov (!%p139_p2), 0   ;;  %v188_v8 = vlaneseq (!%p139_p2) }
   0x6   : > { %142 = sbr.rel (%p139_p2) target bundleno = 245 (0xf5), region = 32  ;;  %283 = vmatprep.mubr.bf16.mxu1 (!%p139_p2), %v471_v2  ;;  %273 = vmatprep.mubr.bf16.mxu0 (!%p139_p2), %v471_v2  ;;  %v457_v3 = vld [vmem:[%s545_s1 + $0x14] ss:$8 sps:$4 sm:$0xff] (!%p139_p2)   ;;  %v459_v4 = vld [vmem:[%s545_s1 + $0x10] ss:$8 sps:$4 sm:$0xff] (!%p139_p2)   ;;  %vm231_vm0 = vcmask (!%p139_p2), 261120  }
   0x7   : > { %441 = vmatprep.subr.bf16.mxu1 (!%p139_p2), %v454_v0  ;;  %241 = vmatprep.subr.bf16.mxu0 (!%p139_p2), %v454_v0  ;;  %p164_p3 = scmp.lt.s32.totalorder (!%p139_p2), %s163_s16, 9  ;;  %v189_v9 = vshrl.u32 (!%p139_p2), %v188_v8, 7  ;;  %v186_v11 = vld [vmem:[%s546_s2] sm:$0x3] (!%p139_p2)  ;;  %vm344_vm1 = vcmask (!%p139_p2), 1043456   ;;  %vm345_vm2 = vcmask (!%p139_p2), 523268  }
   0x8   : > { %443 = vmatpush1.bf16.msra.mxu1 (!%p139_p2), %v456_v1  ;;  %242 = vmatpush1.bf16.msra.mxu0 (!%p139_p2), %v456_v1  ;;  %vm527_vm3 = vmor (!%p139_p2), %vm345_vm2, %vm344_vm1 }
   0x9   : > { %442 = vmatprep.subr.bf16.mxu1 (!%p139_p2), %v457_v3  ;;  %243 = vmatprep.subr.bf16.mxu0 (!%p139_p2), %v457_v3  ;;  %v190_v10 = vsub.s32 (!%p139_p2), 0, %v189_v9  ;;  %v194_v12 = vsub.s32 (!%p139_p2), 1, %v189_v9 }
   0xb   : > { %v191_v13 = vrot.slane (!%p139_p2), %v186_v11, %v190_v10  ;;  %v195_v14 = vrot.slane (!%p139_p2), %v186_v11, %v194_v12 }
   0xc   : > { %444 = vmatpush1.bf16.msra.mxu1 (!%p139_p2), %v459_v4  ;;  %244 = vmatpush1.bf16.msra.mxu0 (!%p139_p2), %v459_v4 }
   0xd   : > { %s551_s16 = smov (!%p164_p3, %s163_s16), 9 }
   0xe   : > { %s415_s23 = sshll.u32 %s551_s16, 2  ;;  %s435_s29 = sshll.u32 %s551_s16, 3 }
   0xf   : > { %s167_s26 = scalar_lea.vmem %s544_s0, %s415_s23  ;;  %s174_s5 = scalar_lea.vmem %s547_s3, %s435_s29 }
  0x10   : > { %v460_v5 = vld [vmem:[%s167_s26 + $0x8] sm:$0xff]   ;;  %v461_v6 = vld [vmem:[%s167_s26] sm:$0xff]   ;;  %v462_v7 = vld [vmem:[%s167_s26 + $0x10] ss:$0 sps:$4 sm:$0xff]  }
  0x11   : > { %426 = vmatmul.mubr.msk.bf16.vlgmr.msra.gmra.mrb[0].mxu1 %vm231_vm0, %v460_v5  ;;  %425 = vmatmul.mubr.msk.bf16.vlgmr.msra.gmra.mrb[0].mxu0 %vm231_vm0, %v461_v6 }
  0x12   : > { %293 = vmatprep.mubr.bf16.mxu1 %v471_v2 }
  0x19   : > { %427 = vmatmul.mubr.msk.bf16.gmra.mrb[4].mxu1 %vm231_vm0, %v462_v7 }
  0xe4   : > { %v285_v15 = vpop.f32.mrb[0].mxu1  ;;  %v275_v18 = vpop.f32.mrb[0].mxu0 }
  0xe5   : > { %v286_v16 = vadd.f32 %v285_v15, %v191_v13  ;;  %v287_v17 = vpop.f32.mrb[1].mxu1  ;;  %v276_v21 = vadd.f32 %v275_v18, %v191_v13  ;;  %v277_v22 = vpop.f32.mrb[1].mxu0 }
  0xe6   : > { %v288_v19 = vadd.f32 %v287_v17, %v195_v14  ;;  %v289_v20 = vpop.f32.mrb[2].mxu1  ;;  %v278_v26 = vadd.f32 %v277_v22, %v195_v14  ;;  %v279_v27 = vpop.f32.mrb[2].mxu0 }
  0xe7   : > { %v306_v23 = vmax.f32 %v286_v16, 0.0  ;;  %v290_v24 = vadd.f32 %v289_v20, %v191_v13  ;;  %v291_v25 = vpop.f32.mrb[3].mxu1  ;;  %v302_v29 = vmax.f32 %v276_v21, 0.0  ;;  %v280_v31 = vadd.f32 %v279_v27, %v191_v13  ;;  %v281_v32 = vpop.f32.mrb[3].mxu0 }
  0xe8   : > { %v307_v28 = vmax.f32 %v288_v19, 0.0  ;;  %v292_v30 = vadd.f32 %v291_v25, %v195_v14  ;;  %v303_v35 = vmax.f32 %v278_v26, 0.0  ;;  %v282_v36 = vadd.f32 %v281_v32, %v195_v14 }
  0xe9   : > { %v308_v34 = vmax.f32 %v290_v24, 0.0  ;;  %v304_v39 = vmax.f32 %v280_v31, 0.0 }
  0xea   : > { %v438_v37 = vpack.c.bf16 %v307_v28, %v306_v23  ;;  %v309_v38 = vmax.f32 %v292_v30, 0.0  ;;  %v436_v40 = vpack.c.bf16 %v303_v35, %v302_v29  ;;  %v305_v41 = vmax.f32 %v282_v36, 0.0 }
  0xec   : > { %349 = vst.msk [vmem:[%s174_s5 + $0x10] sm:$0xff] %vm527_vm3, %v438_v37  ;;  %v439_v42 = vpack.c.bf16 %v309_v38, %v308_v34  ;;  %v295_v43 = vpop.f32.mrb[4].mxu1  ;;  %347 = vst.msk [vmem:[%s174_s5] sm:$0xff] %vm527_vm3, %v436_v40  ;;  %v437_v44 = vpack.c.bf16 %v305_v41, %v304_v39 }
  0xed   : > { %v296_v45 = vadd.f32 %v295_v43, %v191_v13  ;;  %v297_v46 = vpop.f32.mrb[5].mxu1 }
  0xee   : > { %350 = vst.msk [vmem:[%s174_s5 + $0x18] sm:$0xff] %vm527_vm3, %v439_v42  ;;  %v298_v47 = vadd.f32 %v297_v46, %v195_v14  ;;  %v299_v48 = vpop.f32.mrb[6].mxu1  ;;  %348 = vst.msk [vmem:[%s174_s5 + $0x8] sm:$0xff] %vm527_vm3, %v437_v44 }
  0xef   : > { %v310_v49 = vmax.f32 %v296_v45, 0.0  ;;  %v300_v50 = vpop.f32.mrb[7].mxu1 }
  0xf0   : > { %v311_v51 = vmax.f32 %v298_v47, 0.0 }
  0xf2   : > { %v440_v52 = vpack.c.bf16 %v311_v51, %v310_v49 }
  0xf4   : > { %351 = vst.msk [vmem:[%s174_s5 + $0x20] sm:$0xff] %vm527_vm3, %v440_v52 }
  0xf5 PF: > { %s13_s12 = sadd.s32 1, %s469_s12  }
  0xf6   : > { %p10_p4 = scmp.ge.s32.totalorder %s13_s12, 4  }
  0xf8   :  { %12 = sbr.rel (!%p10_p4) target bundleno = 1 (0x1), region = 62 }

// kernel: _lambda_.15
= control target key start
LH: loop header
LB: loop body
LE: loop exit
PB: predicated region body
PF: predicated region fallthrough
CT: control target
= control target key end

     0   :  { %s771_s18 = smov 0   ;;  %s973_s0 = inlined_call_operand.vmem [shape: bf16[78,192], index: 0, kind: input, shape index: {}]   ;;  %s974_s1 = inlined_call_operand.vmem [shape: f32[1,192], index: 1, kind: input, shape index: {}]   ;;  %s975_s2 = inlined_call_operand.vmem [shape: f32[1,192], index: 2, kind: input, shape index: {}]   ;;  %s976_s3 = inlined_call_operand.vmem [shape: bf16[192,64], index: 3, kind: input, shape index: {}]   ;;  %s977_s4 = inlined_call_operand.vmem [shape: f32[1,64], index: 4, kind: input, shape index: {}]   ;;  %s978_s5 = inlined_call_operand.vmem [shape: bf16[78,64], index: 5, kind: output, shape index: {}]  }
   0x1 LB: > { %s640_s19 = sadd.s32 4294967295, %s738_s18   ;;  %p644_p0 = scmp.ge.s32.totalorder %s738_s18, 1  ;;  %s738_s18 = sphi %s771_s18, %s15_s18  }
   0x2   : > { %p189_p1 = scmp.lt.s32.totalorder %s738_s18, 3 }
   0x4   : > { %p190_p2 = pnand %p644_p0, %p189_p1 }
   0x5   : > { %s218_s20 = smul.u32 (!%p190_p2), 5, %s640_s19  ;;  %vm247_vm0 = vcmask (!%p190_p2), 523264   ;;  %v710_v25 = vld [vmem:[%s976_s3] sm:$0xff] (!%p190_p2)   ;;  %v740_v26 = vmov (!%p190_p2), 0   ;;  %v711_v27 = vld [vmem:[%s976_s3 + $0x8] sm:$0xff] (!%p190_p2)   ;;  %v712_v28 = vld [vmem:[%s976_s3 + $0x10] sm:$0xff] (!%p190_p2)  }
   0x6   : > { %193 = sbr.rel (%p190_p2) target bundleno = 568 (0x238), region = 40  ;;  %677 = vmatprep.subr.bf16.mxu1 (!%p190_p2), %v740_v26  ;;  %501 = vmatprep.subr.bf16.mxu0 (!%p190_p2), %v740_v26  ;;  %v713_v29 = vld [vmem:[%s976_s3 + $0x18] sm:$0xff] (!%p190_p2)   ;;  %v714_v30 = vld [vmem:[%s976_s3 + $0x20] sm:$0xff] (!%p190_p2)   ;;  %vm578_vm1 = vcmask (!%p190_p2), 519168  }
   0x7   : > { %p219_p3 = scmp.lt.s32.totalorder (!%p190_p2), %s218_s20, 9  ;;  %689 = vmatpush1.bf16.msra.mxu1 (!%p190_p2), %v710_v25  ;;  %502 = vmatpush1.bf16.msra.mxu0 (!%p190_p2), %v710_v25 }
   0x8   : > { %678 = vmatprep.subr.bf16.mxu1 (!%p190_p2), %v740_v26  ;;  %503 = vmatprep.subr.bf16.mxu0 (!%p190_p2), %v740_v26 }
   0xb   : > { %690 = vmatpush1.bf16.msra.mxu1 (!%p190_p2), %v711_v27  ;;  %504 = vmatpush1.bf16.msra.mxu0 (!%p190_p2), %v711_v27 }
   0xc   : > { %679 = vmatprep.subr.bf16.mxu1 (!%p190_p2), %v740_v26  ;;  %505 = vmatprep.subr.bf16.mxu0 (!%p190_p2), %v740_v26 }
   0xd   : > { %s980_s20 = smov (!%p219_p3, %s218_s20), 9 }
   0xe   : > { %s671_s21 = sshll.u32 %s980_s20, 3  ;;  %s647_s7 = sshll.u32 %s980_s20, 2 }
   0xf   : > { %s223_s24 = scalar_lea.vmem %s973_s0, %s671_s21  ;;  %691 = vmatpush1.bf16.msra.mxu1 %v712_v28  ;;  %506 = vmatpush1.bf16.msra.mxu0 %v712_v28  ;;  %s229_s10 = scalar_lea.vmem %s978_s5, %s647_s7 }
  0x10   : > { %v785_v0 = vld [vmem:[%s223_s24 + $0x10] sm:$0xff]  ;;  %v787_v1 = vld [vmem:[%s223_s24 + $0x18] sm:$0xff]  ;;  %v789_v2 = vld [vmem:[%s223_s24] sm:$0xff]  ;;  %680 = vmatprep.subr.bf16.mxu1 %v740_v26  ;;  %507 = vmatprep.subr.bf16.mxu0 %v740_v26 }
  0x11   : > { %v241_v3 = vunpack.c.l.bf16 %v785_v0  ;;  %v242_v4 = vunpack.c.h.bf16 %v785_v0  ;;  %v244_v5 = vunpack.c.h.bf16 %v787_v1  ;;  %v794_v6 = vld [vmem:[%s223_s24 + $0x20] sm:$0xff]  ;;  %v796_v7 = vld [vmem:[%s223_s24 + $0x8] sm:$0xff]  ;;  %v243_v8 = vunpack.c.l.bf16 %v787_v1 }
  0x12   : > { %v237_v9 = vunpack.c.l.bf16 %v789_v2  ;;  %v238_v10 = vunpack.c.h.bf16 %v789_v2  ;;  %v246_v11 = vunpack.c.h.bf16 %v794_v6  ;;  %v239_v14 = vunpack.c.l.bf16 %v796_v7 }
  0x13   : > { %v256_v12 = vsel %vm247_vm0, %v242_v4, 0.0  ;;  %v260_v13 = vsel %vm247_vm0, %v244_v5, 0.0  ;;  %v240_v15 = vunpack.c.h.bf16 %v796_v7  ;;  %v245_v21 = vunpack.c.l.bf16 %v794_v6  ;;  %692 = vmatpush1.bf16.msra.mxu1 %v713_v29  ;;  %508 = vmatpush1.bf16.msra.mxu0 %v713_v29  ;;  %v715_v6 = vld [vmem:[%s976_s3 + $0x28] sm:$0xff]  }
  0x14   : > { %v257_v16 = vadd.f32 %v256_v12, %v241_v3  ;;  %v248_v17 = vsel %vm247_vm0, %v238_v10, 0.0  ;;  %v261_v20 = vadd.f32 %v260_v13, %v243_v8  ;;  %v264_v22 = vsel %vm247_vm0, %v246_v11, 0.0  ;;  %681 = vmatprep.subr.bf16.mxu1 %v740_v26  ;;  %509 = vmatprep.subr.bf16.mxu0 %v740_v26  ;;  %v720_v12 = vld [vmem:[%s976_s3 + $0x50] sm:$0xff]   ;;  %v721_v13 = vld [vmem:[%s976_s3 + $0x58] sm:$0xff]  }
  0x15   : > { %v249_v18 = vadd.f32 %v248_v17, %v237_v9  ;;  %v252_v19 = vsel %vm247_vm0, %v240_v15, 0.0  ;;  %v265_v24 = vadd.f32 %v264_v22, %v245_v21  ;;  %v341_v17 = vlaneseq }
  0x16   : > { %258 = vadd.xlane.f32.xlu0 %v257_v16  ;;  %v253_v23 = vadd.f32 %v252_v19, %v239_v14 }
  0x17   : > { %250 = vadd.xlane.f32.xlu1 %v249_v18  ;;  %693 = vmatpush1.bf16.msra.mxu1 %v714_v30 }
  0x18   : > { %510 = vmatpush1.bf16.msra.mxu0 %v714_v30  ;;  %682 = vmatprep.subr.bf16.mxu1 %v740_v26 }
  0x19   : > { %511 = vmatprep.subr.bf16.mxu0 %v740_v26 }
  0x1a   : > { %262 = vadd.xlane.f32.xlu0 %v261_v20 }
  0x1b   : > { %254 = vadd.xlane.f32.xlu1 %v253_v23  ;;  %694 = vmatpush1.bf16.msra.mxu1 %v715_v6 }
  0x1c   : > { %512 = vmatpush1.bf16.msra.mxu0 %v715_v6  ;;  %683 = vmatprep.subr.bf16.mxu1 %v740_v26 }
  0x1d   : > { %513 = vmatprep.subr.bf16.mxu0 %v740_v26 }
  0x1e   : > { %266 = vadd.xlane.f32.xlu0 %v265_v24  ;;  %v342_v24 = vshrl.u32 %v341_v17, 7 }
  0xa3   : > { %v259_v31 = vpop.xlane.xlu0 %258 }
  0xa4   : > { %v271_v32 = vmul.f32 0.0052083335, %v259_v31  ;;  %v251_v33 = vpop.xlane.xlu1 %250  ;;  %v343_v31 = vsub.s32 0, %v342_v24 }
  0xa5   : > { %v269_v34 = vmul.f32 0.0052083335, %v251_v33  ;;  %v339_v33 = vld [vmem:[%s974_s1] sm:$0x3] }
  0xa6   : > { %v849_v35 = vsub.f32 %v241_v3, %v271_v32  ;;  %v851_v36 = vsub.f32 %v242_v4, %v271_v32  ;;  %v347_v32 = vsub.s32 1, %v342_v24 }
  0xa7   : > { %v263_v37 = vpop.xlane.xlu0 %262  ;;  %v853_v38 = vsub.f32 %v237_v9, %v269_v34  ;;  %v855_v39 = vsub.f32 %v238_v10, %v269_v34  ;;  %v717_v9 = vld [vmem:[%s976_s3 + $0x38] sm:$0xff]   ;;  %v718_v10 = vld [vmem:[%s976_s3 + $0x40] sm:$0xff]  }
  0xa8   : > { %v272_v40 = vmul.f32 0.0052083335, %v263_v37  ;;  %v255_v41 = vpop.xlane.xlu1 %254  ;;  %v288_v42 = vmul.f32 %v849_v35, %v849_v35  ;;  %v289_v43 = vmul.f32 %v851_v36, %v851_v36  ;;  %v344_v37 = vrot.slane %v339_v33, %v343_v31 }
  0xa9   : > { %v270_v44 = vmul.f32 0.0052083335, %v255_v41  ;;  %v284_v45 = vmul.f32 %v853_v38, %v853_v38  ;;  %v285_v46 = vmul.f32 %v855_v39, %v855_v39 }
  0xaa   : > { %v867_v47 = vsub.f32 %v243_v8, %v272_v40  ;;  %v871_v48 = vsub.f32 %v244_v5, %v272_v40  ;;  %v302_v49 = vsel %vm247_vm0, %v289_v43, 0.0  ;;  %v716_v8 = vld [vmem:[%s976_s3 + $0x30] sm:$0xff]   ;;  %v348_v40 = vrot.slane %v339_v33, %v347_v32 }
  0xab   : > { %v267_v50 = vpop.xlane.xlu0 %266  ;;  %v876_v51 = vsub.f32 %v239_v14, %v270_v44  ;;  %v880_v52 = vsub.f32 %v240_v15, %v270_v44  ;;  %v303_v53 = vadd.f32 %v302_v49, %v288_v42  ;;  %v294_v54 = vsel %vm247_vm0, %v285_v46, 0.0  ;;  %695 = vmatpush1.bf16.msra.mxu1 %v716_v8  ;;  %514 = vmatpush1.bf16.msra.mxu0 %v716_v8  ;;  %v361_v42 = vld [vmem:[%s975_s2] sm:$0x3] }
  0xac   : > { %v273_v55 = vmul.f32 0.0052083335, %v267_v50  ;;  %v290_v56 = vmul.f32 %v867_v47, %v867_v47  ;;  %v291_v57 = vmul.f32 %v871_v48, %v871_v48  ;;  %v295_v58 = vadd.f32 %v294_v54, %v284_v45  ;;  %684 = vmatprep.subr.bf16.mxu1 %v740_v26  ;;  %515 = vmatprep.subr.bf16.mxu0 %v740_v26 }
  0xad   : > { %304 = vadd.xlane.f32.xlu1 %v303_v53  ;;  %v286_v59 = vmul.f32 %v876_v51, %v876_v51  ;;  %v287_v60 = vmul.f32 %v880_v52, %v880_v52  ;;  %v366_v46 = vrot.slane %v361_v42, %v343_v31  ;;  %v370_v49 = vrot.slane %v361_v42, %v347_v32 }
  0xae   : > { %v893_v61 = vsub.f32 %v245_v21, %v273_v55  ;;  %v897_v62 = vsub.f32 %v246_v11, %v273_v55  ;;  %v306_v63 = vsel %vm247_vm0, %v291_v57, 0.0  ;;  %v719_v11 = vld [vmem:[%s976_s3 + $0x48] sm:$0xff]  }
  0xaf   : > { %v307_v0 = vadd.f32 %v306_v63, %v290_v56  ;;  %v298_v1 = vsel %vm247_vm0, %v287_v60, 0.0  ;;  %696 = vmatpush1.bf16.msra.mxu1 %v717_v9  ;;  %516 = vmatpush1.bf16.msra.mxu0 %v717_v9 }
  0xb0   : > { %v292_v2 = vmul.f32 %v893_v61, %v893_v61  ;;  %v293_v3 = vmul.f32 %v897_v62, %v897_v62  ;;  %v299_v4 = vadd.f32 %v298_v1, %v286_v59  ;;  %685 = vmatprep.subr.bf16.mxu1 %v740_v26  ;;  %517 = vmatprep.subr.bf16.mxu0 %v740_v26 }
  0xb1   : > { %308 = vadd.xlane.f32.xlu0 %v307_v0  ;;  %296 = vadd.xlane.f32.xlu1 %v295_v58 }
  0xb2   : > { %v310_v5 = vsel %vm247_vm0, %v293_v3, 0.0 }
  0xb3   : > { %v311_v7 = vadd.f32 %v310_v5, %v292_v2  ;;  %697 = vmatpush1.bf16.msra.mxu1 %v718_v10  ;;  %518 = vmatpush1.bf16.msra.mxu0 %v718_v10 }
  0xb4   : > { %686 = vmatprep.subr.bf16.mxu1 %v740_v26  ;;  %519 = vmatprep.subr.bf16.mxu0 %v740_v26 }
  0xb5   : > { %312 = vadd.xlane.f32.xlu1 %v311_v7  ;;  %300 = vadd.xlane.f32.xlu0 %v299_v4 }
  0xb7   : > { %698 = vmatpush1.bf16.msra.mxu1 %v719_v11  ;;  %520 = vmatpush1.bf16.msra.mxu0 %v719_v11 }
  0xb8   : > { %687 = vmatprep.subr.bf16.mxu1 %v740_v26  ;;  %521 = vmatprep.subr.bf16.mxu0 %v740_v26 }
  0xbb   : > { %699 = vmatpush1.bf16.msra.mxu1 %v720_v12  ;;  %522 = vmatpush1.bf16.msra.mxu0 %v720_v12 }
  0xbc   : > { %688 = vmatprep.subr.bf16.mxu1 %v740_v26  ;;  %523 = vmatprep.subr.bf16.mxu0 %v740_v26 }
  0xbf   : > { %700 = vmatpush1.bf16.msra.mxu1 %v721_v13  ;;  %524 = vmatpush1.bf16.msra.mxu0 %v721_v13 }
 0x13a   : > { %v305_v14 = vpop.xlane.xlu1 %304 }
 0x13b   : > { %v316_v15 = vmul.f32 0.0052083335, %v305_v14 }
 0x13d   : > { %v321_v16 = vadd.f32 1e-05, %v316_v15 }
 0x13e   : > { %v309_v18 = vpop.xlane.xlu0 %308  ;;  %v297_v19 = vpop.xlane.xlu1 %296 }
 0x13f   : > { %722 = vrsqrt.f32 %v321_v16  ;;  %v317_v20 = vmul.f32 0.0052083335, %v309_v18  ;;  %v314_v21 = vmul.f32 0.0052083335, %v297_v19  ;;  %v648_v16 = vld [vmem:[%s977_s4] ss:$0 sm:$0xff] }
 0x141   : > { %v322_v22 = vadd.f32 1e-05, %v317_v20  ;;  %v319_v23 = vadd.f32 1e-05, %v314_v21 }
 0x142   : > { %v301_v25 = vpop.xlane.xlu0 %300  ;;  %v313_v26 = vpop.xlane.xlu1 %312 }
 0x143   : > { %724 = vrsqrt.f32 %v322_v22  ;;  %v315_v27 = vmul.f32 0.0052083335, %v301_v25  ;;  %v318_v28 = vmul.f32 0.0052083335, %v313_v26 }
 0x144   : > { %726 = vrsqrt.f32 %v319_v23 }
 0x145   : > { %v320_v29 = vadd.f32 1e-05, %v315_v27  ;;  %v323_v30 = vadd.f32 1e-05, %v318_v28 }
 0x147   : > { %728 = vrsqrt.f32 %v320_v29 }
 0x148   : > { %730 = vrsqrt.f32 %v323_v30 }
 0x149   : > { %v723_v34 = vpop.eup %722 }
 0x14a   : > { %v334_v41 = vmul.f32 %v723_v34, %v851_v36  ;;  %v333_v43 = vmul.f32 %v723_v34, %v849_v35 }
 0x14c   : > { %v356_v45 = vmul.f32 %v348_v40, %v334_v41  ;;  %v355_v50 = vmul.f32 %v344_v37, %v333_v43 }
 0x14d   : > { %v725_v44 = vpop.eup %724 }
 0x14e   : > { %v727_v53 = vpop.eup %726  ;;  %v336_v54 = vmul.f32 %v725_v44, %v871_v48  ;;  %v335_v55 = vmul.f32 %v725_v44, %v867_v47  ;;  %v378_v60 = vadd.f32 %v370_v49, %v356_v45  ;;  %v377_v63 = vadd.f32 %v366_v46, %v355_v50 }
 0x14f   : > { %v330_v56 = vmul.f32 %v727_v53, %v855_v39  ;;  %v329_v36 = vmul.f32 %v727_v53, %v853_v38 }
 0x150   : > { %v358_v57 = vmul.f32 %v348_v40, %v336_v54  ;;  %v357_v58 = vmul.f32 %v344_v37, %v335_v55 }
 0x151   : > { %v729_v59 = vpop.eup %728  ;;  %v352_v35 = vmul.f32 %v348_v40, %v330_v56  ;;  %v351_v0 = vmul.f32 %v344_v37, %v329_v36 }
 0x152   : > { %v731_v1 = vpop.eup %730  ;;  %v380_v2 = vadd.f32 %v370_v49, %v358_v57  ;;  %v379_v3 = vadd.f32 %v366_v46, %v357_v58  ;;  %v332_v4 = vmul.f32 %v729_v59, %v880_v52  ;;  %v331_v48 = vmul.f32 %v729_v59, %v876_v51 }
 0x153   : > { %v338_v47 = vmul.f32 %v731_v1, %v897_v62  ;;  %v337_v39 = vmul.f32 %v731_v1, %v893_v61  ;;  %v374_v10 = vadd.f32 %v370_v49, %v352_v35  ;;  %v373_v12 = vadd.f32 %v366_v46, %v351_v0 }
 0x154   : > { %v386_v5 = vpack.c.bf16 %v380_v2, %v378_v60  ;;  %v385_v38 = vpack.c.bf16 %v379_v3, %v377_v63  ;;  %v354_v7 = vmul.f32 %v348_v40, %v332_v4  ;;  %v353_v6 = vmul.f32 %v344_v37, %v331_v48 }
 0x155   : > { %v360_v8 = vmul.f32 %v348_v40, %v338_v47  ;;  %v359_v9 = vmul.f32 %v344_v37, %v337_v39 }
 0x156   : > { %662 = vmatprep.mubr.msk.bf16.mxu1 %vm247_vm0, %v386_v5  ;;  %v376_v11 = vadd.f32 %v370_v49, %v354_v7  ;;  %v375_v13 = vadd.f32 %v366_v46, %v353_v6 }
 0x157   : > { %542 = vmatmul.mubr.bf16.vlgmr.msra.gmra.mrb[0].mxu1 %v385_v38  ;;  %v382_v52 = vadd.f32 %v370_v49, %v360_v8  ;;  %v381_v15 = vadd.f32 %v366_v46, %v359_v9 }
 0x158   : > { %v384_v51 = vpack.c.bf16 %v376_v11, %v374_v10  ;;  %v383_v14 = vpack.c.bf16 %v375_v13, %v373_v12 }
 0x159   : > { %v388_v62 = vpack.c.bf16 %v382_v52, %v382_v52  ;;  %v387_v61 = vpack.c.bf16 %v381_v15, %v381_v15 }
 0x15a   : > { %661 = vmatprep.mubr.msk.bf16.mxu0 %vm247_vm0, %v384_v51 }
 0x15b   : > { %663 = vmatprep.mubr.msk.bf16.mxu1 %vm247_vm0, %v388_v62  ;;  %534 = vmatmul.mubr.bf16.vlgmr.msra.gmra.mrb[0].mxu0 %v383_v14 }
 0x15f   : > { %550 = vmatmul.mubr.bf16.gmra.mrb[4].mxu1 %v387_v61 }
 0x22a   : > { %v543_v17 = vpop.f32.mrb[0].mxu1 }
 0x22b   : > { %v544_v18 = vadd.f32 %v648_v16, %v543_v17  ;;  %v545_v19 = vpop.f32.mrb[1].mxu1 }
 0x22c   : > { %v546_v20 = vpop.f32.mrb[2].mxu1 }
 0x22d   : > { %v674_v21 = vpack.c.bf16 %v544_v18, %v544_v18  ;;  %v547_v22 = vadd.f32 %v648_v16, %v546_v20  ;;  %v548_v23 = vpop.f32.mrb[3].mxu1 }
 0x22e   : > { %v535_v24 = vpop.f32.mrb[0].mxu0 }
 0x22f   : > { %581 = vst.msk [vmem:[%s229_s10 + $0x8] sm:$0xf] %vm578_vm1, %v674_v21  ;;  %v675_v25 = vpack.c.bf16 %v547_v22, %v547_v22  ;;  %v536_v26 = vadd.f32 %v648_v16, %v535_v24  ;;  %v537_v27 = vpop.f32.mrb[1].mxu0 }
 0x230   : > { %v538_v28 = vpop.f32.mrb[2].mxu0 }
 0x231   : > { %582 = vst.msk [vmem:[%s229_s10 + $0xc] sm:$0xf] %vm578_vm1, %v675_v25  ;;  %v672_v29 = vpack.c.bf16 %v536_v26, %v536_v26  ;;  %v539_v30 = vadd.f32 %v648_v16, %v538_v28  ;;  %v540_v31 = vpop.f32.mrb[3].mxu0 }
 0x232   : > { %v551_v32 = vpop.f32.mrb[4].mxu1 }
 0x233   : > { %579 = vst.msk [vmem:[%s229_s10] sm:$0xf] %vm578_vm1, %v672_v29  ;;  %v673_v33 = vpack.c.bf16 %v539_v30, %v539_v30  ;;  %v552_v34 = vadd.f32 %v648_v16, %v551_v32  ;;  %v553_v37 = vpop.f32.mrb[5].mxu1 }
 0x234   : > { %v554_v40 = vpop.f32.mrb[6].mxu1 }
 0x235   : > { %580 = vst.msk [vmem:[%s229_s10 + $0x4] sm:$0xf] %vm578_vm1, %v673_v33  ;;  %v676_v41 = vpack.c.bf16 %v552_v34, %v552_v34  ;;  %v555_v42 = vpop.f32.mrb[7].mxu1 }
 0x237   : > { %583 = vst.msk [vmem:[%s229_s10 + $0x10] sm:$0xf] %vm578_vm1, %v676_v41 }
 0x238 PF: > { %s15_s18 = sadd.s32 1, %s738_s18  }
 0x239   : > { %p12_p4 = scmp.ge.s32.totalorder %s15_s18, 4  }
 0x23b   :  { %14 = sbr.rel (!%p12_p4) target bundleno = 1 (0x1), region = 70 }

// kernel: _lambda_.16
= control target key start
LH: loop header
LB: loop body
LE: loop exit
PB: predicated region body
PF: predicated region fallthrough
CT: control target
= control target key end

     0   :  { %11 = vsyncpa [#allocation3], 0  ;;  %s835_s21 = smov 0   ;;  %s965_s0 = inlined_call_operand.vmem [shape: bf16[2,39,64], index: 0, kind: input, shape index: {}]   ;;  %s966_s1 = inlined_call_operand.vmem [shape: bf16[64,64], index: 1, kind: input, shape index: {}]   ;;  %s967_s2 = inlined_call_operand.vmem [shape: f32[1,64], index: 2, kind: input, shape index: {}, may-alias: {2,4}]   ;;  %s968_s3 = inlined_call_operand.vmem [shape: bf16[64,64], index: 3, kind: input, shape index: {}]   ;;  %s969_s4 = inlined_call_operand.vmem [shape: f32[1,64], index: 4, kind: input, shape index: {}, may-alias: {2,4}]   ;;  %s970_s5 = inlined_call_operand.vmem [shape: f32[2], index: 5, kind: input, shape index: {}]   ;;  %s971_s6 = inlined_call_operand.vmem [shape: bf16[2,39,64], index: 6, kind: output, shape index: {}]  }
   0x1 LB: > { %s841_s22 = sadd.s32 4294967295, %s795_s21   ;;  %p642_p0 = scmp.ge.s32.totalorder %s795_s21, 1  ;;  %s795_s21 = sphi %s835_s21, %s17_s21  }
   0x2   : > { %p179_p1 = scmp.lt.s32.totalorder %s795_s21, 3  ;;  %s204_s25 = sshll.u32 %s970_s5, 4  ;;  %s205_s25 = int_to_ptr.vmem [resolvable:$true] %s204_s25 }
   0x3   : > { %p744_p3 = scmp.eq.s32.totalorder %s841_s22, 0  ;;  %s770_s27 = scalar_lea.vmem %s205_s25, 16 }
   0x4   : > { %p848_p2 = pnand %p642_p0, %p179_p1  ;;  %p771_p6 = scmp.ne.s32.totalorder %s205_s25, %s770_s27 }
   0x5   : > { %p778_p10 = scmp.lt.s32.totalorder %s205_s25, %s205_s25  ;;  %p779_p11 = scmp.lt.s32.totalorder %s770_s27, %s770_s27 }
   0x6   : > { %p740_p4 = pneg %p848_p2 }
   0x7   : > { %p780_p12 = por %p779_p11, %p778_p10 }
   0x8   : > { %p741_p5 = pnand %p744_p3, %p740_p4 }
   0xa   : > { %p772_p7 = pneg %p741_p5 }
   0xc   : > { %p773_p8 = pnand %p772_p7, %p771_p6 }
   0xe   : > { %p774_p9 = pneg %p773_p8 }
  0x10   : > { %p781_p13 = pnand %p780_p12, %p774_p9 }
  0x12   : > { %784 = shalt.err (!%p781_p13)
}
  0x13   : > { %s797_s28 = smov [#allocation2]   ;;  %225 = sbr.rel (%p848_p2) target bundleno = 506 (0x1fa), region = 44 }
  0x14   : > { %743 = dma.vmem_to_smem (!%p741_p5), %s205_s25, 16, %s797_s28, [#allocation3]  }
  0x1a   : > { %790 = dma.done.wait (%p744_p3), [#allocation3], 16  }
  0x1b   : > { %792 = vsyncadd (%p744_p3), [#allocation3], 4294967280 }
  0x1c   : > { %231 = sfence }
  0x1d   : > { %v757_v0 = vld [vmem:[%s966_s1] sm:$0xff]   ;;  %v798_v1 = vmov 0.0   ;;  %v758_v2 = vld [vmem:[%s966_s1 + $0x8] sm:$0xff]   ;;  %vm799_vm0 = vmmov 0   ;;  %p256_p0 = scmp.lt.s32.totalorder %s841_s22, 1  ;;  %v759_v4 = vld [vmem:[%s966_s1 + $0x10] sm:$0xff]  }
  0x1e   : > { %695 = vmatprep.subr.bf16.mxu0 %v798_v1  ;;  %715 = vmatprep.subr.bf16.mxu1 %v798_v1  ;;  %v764_v3 = vld [vmem:[%s968_s3] sm:$0xff]   ;;  %v765_v5 = vld [vmem:[%s968_s3 + $0x8] sm:$0xff]   ;;  %v760_v6 = vld [vmem:[%s966_s1 + $0x18] sm:$0xff]   ;;  %vm324_vm1 = vcmask 523264   ;;  %s395_s27 = sld [smem:[#allocation2]]  ;;  %s668_s30 = sld [smem:[#allocation2 + $0x1]] }
  0x1f   : > { %696 = vmatpush3.bf16.msra.mxu0 %v757_v0  ;;  %703 = vmatprep.mubr.msk.bf16.mxu0 %vm799_vm0, %v798_v1  ;;  %s974_s22 = smov (!%p256_p0, %s841_s22), 1  ;;  %v766_v11 = vld [vmem:[%s968_s3 + $0x10] sm:$0xff]   ;;  %v767_v12 = vld [vmem:[%s968_s3 + $0x18] sm:$0xff]   ;;  %v649_v13 = vld [vmem:[%s967_s2] ss:$0 sm:$0xff]  ;;  %vm562_vm8 = vcmask 519168  }
  0x20   : > { %697 = vmatprep.subr.bf16.mxu0 %v798_v1  ;;  %723 = vmatprep.mubr.msk.bf16.mxu1 %vm799_vm0, %v798_v1  ;;  %s735_s13 = smul.u32 20, %s974_s22  ;;  %v660_v45 = vld [vmem:[%s969_s4] ss:$0 sm:$0xff]  ;;  %vm568_vm12 = vsmask.f32 3328 }
  0x21   : > { %716 = vmatpush3.bf16.msra.mxu1 %v764_v3  ;;  %vm569_vm14 = vmand %vm562_vm8, %vm568_vm12 }
  0x22   : > { %717 = vmatprep.subr.bf16.mxu1 %v798_v1  ;;  %s260_s18 = scalar_lea.vmem %s965_s0, %s735_s13  ;;  %s946_s11 = scalar_lea.vmem %s971_s6, %s735_s13 }
  0x23   : > { %698 = vmatpush3.bf16.msra.mxu0 %v758_v2  ;;  %v900_v7 = vld [vmem:[%s260_s18] sm:$0xff]   ;;  %v908_v8 = vld [vmem:[%s260_s18 + $0x8] sm:$0xff]   ;;  %v914_v9 = vld [vmem:[%s260_s18 + $0x10] sm:$0xf] }
  0x24   : > { %699 = vmatprep.subr.bf16.mxu0 %v798_v1  ;;  %v652_v10 = vcombine.low %v914_v9, %v914_v9  ;;  %v396_v15 = vstv %s395_s27  ;;  %v514_v46 = vunpack.c.l.bf16 %v900_v7  ;;  %v515_v50 = vunpack.c.h.bf16 %v900_v7 }
  0x25   : > { %718 = vmatpush3.bf16.msra.mxu1 %v765_v5  ;;  %v530_v51 = vstv %s668_s30  ;;  %v516_v60 = vunpack.c.l.bf16 %v908_v8  ;;  %v517_v2 = vunpack.c.h.bf16 %v908_v8 }
  0x26   : > { %719 = vmatprep.subr.bf16.mxu1 %v798_v1 }
  0x27   : > { %700 = vmatpush3.bf16.msra.mxu0 %v759_v4 }
  0x28   : > { %701 = vmatprep.subr.bf16.mxu0 %v798_v1 }
  0x29   : > { %720 = vmatpush3.bf16.msra.mxu1 %v766_v11 }
  0x2a   : > { %721 = vmatprep.subr.bf16.mxu1 %v798_v1 }
  0x2b   : > { %702 = vmatpush3.bf16.msra.mxu0 %v760_v6 }
  0x2d   : > { %722 = vmatpush3.bf16.msra.mxu1 %v767_v12 }
  0x2e   : > { %704 = vmatmul.mubr.msk.bf16.vlgmr.msra.gmra.mrb[0].mxu0 %vm324_vm1, %v900_v7 }
  0x2f   : > { %707 = vmatprep.mubr.msk.bf16.mxu0 %vm799_vm0, %v798_v1 }
  0x36   : > { %708 = vmatmul.mubr.msk.bf16.gmra.mrb[4].mxu0 %vm324_vm1, %v908_v8 }
  0x37   : > { %711 = vmatprep.mubr.msk.bf16.mxu0 %vm799_vm0, %v798_v1 }
  0x3e   : > { %712 = vmatmul.mubr.msk.bf16.gmra.mrb[8].mxu0 %vm324_vm1, %v652_v10 }
 0x101   : > { %v368_v14 = vpop.f32.mrb[0].mxu0 }
 0x102   : > { %v369_v16 = vadd.f32 %v649_v13, %v368_v14  ;;  %v705_v17 = vpop.f32.mrb[1].mxu0  ;;  %v518_v14 = vunpack.c.l.bf16 %v914_v9  ;;  %v570_v9 = vld [vmem:[%s946_s11 + $0x10] sm:$0xf] }
 0x103   : > { %v371_v18 = vpop.f32.mrb[2].mxu0 }
 0x104   : > { %v397_v19 = vmul.f32 %v396_v15, %v369_v16  ;;  %v372_v20 = vadd.f32 %v649_v13, %v371_v18  ;;  %v706_v21 = vpop.f32.mrb[3].mxu0  ;;  %vm390_vm2 = vcmp.ge.f32.partialorder %v369_v16, 0.0 }
 0x106   : > { %vm391_vm3 = vcmp.ge.f32.partialorder %v372_v20, 0.0  ;;  %v398_v22 = vmul.f32 %v396_v15, %v372_v20  ;;  %v402_v23 = vsel %vm390_vm2, %v369_v16, %v397_v19 }
 0x108   : > { %v403_v24 = vsel %vm391_vm3, %v372_v20, %v398_v22 }
 0x109   : > { %v407_v25 = vpack.c.bf16 %v403_v24, %v402_v23  ;;  %v376_v26 = vpop.f32.mrb[4].mxu0 }
 0x10a   : > { %v377_v27 = vadd.f32 %v649_v13, %v376_v26  ;;  %v709_v28 = vpop.f32.mrb[5].mxu0 }
 0x10b   : > { %v379_v29 = vpop.f32.mrb[6].mxu0  ;;  %724 = vmatmul.mubr.msk.bf16.vlgmr.msra.gmra.mrb[0].mxu1 %vm324_vm1, %v407_v25 }
 0x10c   : > { %v399_v30 = vmul.f32 %v396_v15, %v377_v27  ;;  %v380_v31 = vadd.f32 %v649_v13, %v379_v29  ;;  %v710_v32 = vpop.f32.mrb[7].mxu0  ;;  %727 = vmatprep.mubr.msk.bf16.mxu1 %vm799_vm0, %v798_v1  ;;  %vm392_vm4 = vcmp.ge.f32.partialorder %v377_v27, 0.0 }
 0x10e   : > { %vm393_vm5 = vcmp.ge.f32.partialorder %v380_v31, 0.0  ;;  %v400_v33 = vmul.f32 %v396_v15, %v380_v31  ;;  %v404_v34 = vsel %vm392_vm4, %v377_v27, %v399_v30 }
 0x110   : > { %v405_v35 = vsel %vm393_vm5, %v380_v31, %v400_v33 }
 0x111   : > { %v408_v36 = vpack.c.bf16 %v405_v35, %v404_v34  ;;  %v384_v37 = vpop.f32.mrb[8].mxu0 }
 0x112   : > { %v385_v38 = vadd.f32 %v649_v13, %v384_v37  ;;  %v713_v39 = vpop.f32.mrb[9].mxu0 }
 0x113   : > { %v387_v40 = vpop.f32.mrb[10].mxu0  ;;  %728 = vmatmul.mubr.msk.bf16.gmra.mrb[4].mxu1 %vm324_vm1, %v408_v36 }
 0x114   : > { %vm394_vm6 = vcmp.ge.f32.partialorder %v385_v38, 0.0  ;;  %v401_v41 = vmul.f32 %v396_v15, %v385_v38  ;;  %v714_v42 = vpop.f32.mrb[11].mxu0  ;;  %731 = vmatprep.mubr.msk.bf16.mxu1 %vm799_vm0, %v798_v1 }
 0x116   : > { %v406_v43 = vsel %vm394_vm6, %v385_v38, %v401_v41 }
 0x117   : > { %v409_v44 = vpack.c.bf16 %v406_v43, %v406_v43 }
 0x11b   : > { %732 = vmatmul.mubr.msk.bf16.gmra.mrb[8].mxu1 %vm324_vm1, %v409_v44 }
 0x1de   : > { %v492_v47 = vpop.f32.mrb[0].mxu1 }
 0x1df   : > { %v493_v48 = vadd.f32 %v660_v45, %v492_v47  ;;  %v725_v49 = vpop.f32.mrb[1].mxu1 }
 0x1e0   : > { %v495_v52 = vpop.f32.mrb[2].mxu1 }
 0x1e1   : > { %v519_v53 = vadd.f32 %v514_v46, %v493_v48  ;;  %v496_v54 = vadd.f32 %v660_v45, %v495_v52  ;;  %v726_v55 = vpop.f32.mrb[3].mxu1 }
 0x1e3   : > { %vm524_vm7 = vcmp.ge.f32.partialorder %v519_v53, 0.0  ;;  %v531_v56 = vmul.f32 %v530_v51, %v519_v53  ;;  %v520_v57 = vadd.f32 %v515_v50, %v496_v54 }
 0x1e5   : > { %v536_v58 = vsel %vm524_vm7, %v519_v53, %v531_v56  ;;  %vm525_vm9 = vcmp.ge.f32.partialorder %v520_v57, 0.0  ;;  %v532_v59 = vmul.f32 %v530_v51, %v520_v57 }
 0x1e6   : > { %v676_v61 = vpack.c.bf16 %v536_v58, %v536_v58  ;;  %v500_v62 = vpop.f32.mrb[4].mxu1 }
 0x1e7   : > { %v537_v63 = vsel %vm525_vm9, %v520_v57, %v532_v59  ;;  %v501_v0 = vadd.f32 %v660_v45, %v500_v62  ;;  %v729_v1 = vpop.f32.mrb[5].mxu1 }
 0x1e8   : > { %563 = vst.msk [vmem:[%s946_s11] sm:$0xf] %vm562_vm8, %v676_v61  ;;  %v677_v3 = vpack.c.bf16 %v537_v63, %v537_v63  ;;  %v503_v4 = vpop.f32.mrb[6].mxu1 }
 0x1e9   : > { %v521_v5 = vadd.f32 %v516_v60, %v501_v0  ;;  %v504_v6 = vadd.f32 %v660_v45, %v503_v4  ;;  %v730_v7 = vpop.f32.mrb[7].mxu1 }
 0x1ea   : > { %564 = vst.msk [vmem:[%s946_s11 + $0x4] sm:$0xf] %vm562_vm8, %v677_v3 }
 0x1eb   : > { %vm526_vm10 = vcmp.ge.f32.partialorder %v521_v5, 0.0  ;;  %v533_v10 = vmul.f32 %v530_v51, %v521_v5  ;;  %v522_v11 = vadd.f32 %v517_v2, %v504_v6 }
 0x1ed   : > { %v538_v12 = vsel %vm526_vm10, %v521_v5, %v533_v10  ;;  %vm527_vm11 = vcmp.ge.f32.partialorder %v522_v11, 0.0  ;;  %v534_v13 = vmul.f32 %v530_v51, %v522_v11 }
 0x1ee   : > { %v678_v8 = vpack.c.bf16 %v538_v12, %v538_v12  ;;  %v508_v15 = vpop.f32.mrb[8].mxu1 }
 0x1ef   : > { %v539_v16 = vsel %vm527_vm11, %v522_v11, %v534_v13  ;;  %v509_v17 = vadd.f32 %v660_v45, %v508_v15  ;;  %v733_v18 = vpop.f32.mrb[9].mxu1 }
 0x1f0   : > { %565 = vst.msk [vmem:[%s946_s11 + $0x8] sm:$0xf] %vm562_vm8, %v678_v8  ;;  %v679_v19 = vpack.c.bf16 %v539_v16, %v539_v16  ;;  %v511_v20 = vpop.f32.mrb[10].mxu1 }
 0x1f1   : > { %v523_v21 = vadd.f32 %v518_v14, %v509_v17  ;;  %v734_v22 = vpop.f32.mrb[11].mxu1 }
 0x1f2   : > { %566 = vst.msk [vmem:[%s946_s11 + $0xc] sm:$0xf] %vm562_vm8, %v679_v19 }
 0x1f3   : > { %vm528_vm13 = vcmp.ge.f32.partialorder %v523_v21, 0.0  ;;  %v535_v23 = vmul.f32 %v530_v51, %v523_v21 }
 0x1f5   : > { %v540_v24 = vsel %vm528_vm13, %v523_v21, %v535_v23 }
 0x1f6   : > { %v680_v25 = vpack.c.bf16 %v540_v24, %v540_v24 }
 0x1f8   : > { %v571_v26 = vsel %vm569_vm14, %v680_v25, %v570_v9 }
 0x1f9   : > { %572 = vst [vmem:[%s946_s11 + $0x10] sm:$0xf] %v571_v26 }
 0x1fa PF: > { %s17_s21 = sadd.s32 1, %s795_s21  }
 0x1fb   : > { %p14_p1 = scmp.ge.s32.totalorder %s17_s21, 4  }
 0x1fd   :  { %16 = sbr.rel (!%p14_p1) target bundleno = 1 (0x1), region = 79 }
 0x204   :  { %594 = vsyncpa [#allocation3], 1 }
 0x205   :  { %596 = vsyncpa [#allocation3 + $0x1], 1 }

// kernel: _lambda_.17
= control target key start
LH: loop header
LB: loop body
LE: loop exit
PB: predicated region body
PF: predicated region fallthrough
CT: control target
= control target key end

     0   :  { %12 = vsyncpa [#allocation3], 0  ;;  %s887_s24 = smov 0   ;;  %s992_s0 = inlined_call_operand.vmem [shape: bf16[2,13,64], index: 0, kind: input, shape index: {}]   ;;  %s993_s1 = inlined_call_operand.vmem [shape: bf16[64,128], index: 1, kind: input, shape index: {}]   ;;  %s994_s2 = inlined_call_operand.vmem [shape: f32[1,128], index: 2, kind: input, shape index: {}, may-alias: {2,4}]   ;;  %s995_s3 = inlined_call_operand.vmem [shape: bf16[128,128], index: 3, kind: input, shape index: {}]   ;;  %s996_s4 = inlined_call_operand.vmem [shape: f32[1,128], index: 4, kind: input, shape index: {}, may-alias: {2,4}]   ;;  %s997_s5 = inlined_call_operand.vmem [shape: bf16[64,128], index: 5, kind: input, shape index: {}]   ;;  %s998_s6 = inlined_call_operand.vmem [shape: f32[2], index: 6, kind: input, shape index: {}]   ;;  %s999_s7 = inlined_call_operand.vmem [shape: bf16[2,13,128], index: 7, kind: output, shape index: {}]  }
   0x1 LB: > { %s893_s25 = sadd.s32 4294967295, %s842_s24   ;;  %p673_p0 = scmp.ge.s32.totalorder %s842_s24, 1  ;;  %s842_s24 = sphi %s887_s24, %s18_s24  }
   0x2   : > { %p201_p1 = scmp.lt.s32.totalorder %s842_s24, 3  ;;  %s229_s28 = sshll.u32 %s998_s6, 4  ;;  %s230_s28 = int_to_ptr.vmem [resolvable:$true] %s229_s28 }
   0x3   : > { %p787_p3 = scmp.eq.s32.totalorder %s893_s25, 0  ;;  %s817_s30 = scalar_lea.vmem %s230_s28, 16 }
   0x4   : > { %p900_p2 = pnand %p673_p0, %p201_p1  ;;  %p818_p6 = scmp.ne.s32.totalorder %s230_s28, %s817_s30 }
   0x5   : > { %p825_p10 = scmp.lt.s32.totalorder %s230_s28, %s230_s28  ;;  %p826_p11 = scmp.lt.s32.totalorder %s817_s30, %s817_s30 }
   0x6   : > { %p783_p4 = pneg %p900_p2 }
   0x7   : > { %p827_p12 = por %p826_p11, %p825_p10 }
   0x8   : > { %p784_p5 = pnand %p787_p3, %p783_p4 }
   0xa   : > { %p819_p7 = pneg %p784_p5 }
   0xc   : > { %p820_p8 = pnand %p819_p7, %p818_p6 }
   0xe   : > { %p821_p9 = pneg %p820_p8 }
  0x10   : > { %p828_p13 = pnand %p827_p12, %p821_p9 }
  0x12   : > { %831 = shalt.err (!%p828_p13)
}
  0x13   : > { %s844_s8 = smov [#allocation2]   ;;  %250 = sbr.rel (%p900_p2) target bundleno = 492 (0x1ec), region = 48 }
  0x14   : > { %786 = dma.vmem_to_smem (!%p784_p5), %s230_s28, 16, %s844_s8, [#allocation3]  }
  0x1a   : > { %837 = dma.done.wait (%p787_p3), [#allocation3], 16  }
  0x1b   : > { %839 = vsyncadd (%p787_p3), [#allocation3], 4294967280 }
  0x1c   : > { %256 = sfence }
  0x1d   : > { %v800_v0 = vld [vmem:[%s993_s1] sm:$0xff]   ;;  %v845_v1 = vmov 0.0   ;;  %v801_v2 = vld [vmem:[%s993_s1 + $0x8] sm:$0xff]   ;;  %vm846_vm0 = vmmov 0   ;;  %p283_p0 = scmp.lt.s32.totalorder %s893_s25, 1  ;;  %v802_v4 = vld [vmem:[%s993_s1 + $0x10] sm:$0xff]  }
  0x1e   : > { %731 = vmatprep.subr.bf16.mxu0 %v845_v1  ;;  %743 = vmatprep.subr.bf16.mxu1 %v845_v1  ;;  %v805_v3 = vld [vmem:[%s995_s3] sm:$0xff]   ;;  %v806_v5 = vld [vmem:[%s995_s3 + $0x8] sm:$0xff]   ;;  %v803_v6 = vld [vmem:[%s993_s1 + $0x18] sm:$0xff]   ;;  %vm340_vm1 = vcmask 523264   ;;  %s387_s27 = sld [smem:[#allocation2]]  ;;  %s703_s30 = sld [smem:[#allocation2 + $0x1]] }
  0x1f   : > { %732 = vmatpush3.bf16.msra.mxu0 %v800_v0  ;;  %739 = vmatprep.mubr.msk.bf16.mxu0 %vm846_vm0, %v845_v1  ;;  %s1002_s25 = smov (!%p283_p0, %s893_s25), 1  ;;  %v807_v7 = vld [vmem:[%s995_s3 + $0x10] sm:$0xff]   ;;  %v808_v9 = vld [vmem:[%s995_s3 + $0x18] sm:$0xff]   ;;  %v809_v10 = vld [vmem:[%s997_s5] sm:$0xff]   ;;  %vm598_vm5 = vcmask 1042432  }
  0x20   : > { %733 = vmatprep.subr.bf16.mxu0 %v845_v1  ;;  %759 = vmatprep.mubr.msk.bf16.mxu1 %vm846_vm0, %v845_v1  ;;  %s708_s17 = sshll.u32 %s1002_s25, 3  ;;  %v810_v11 = vld [vmem:[%s995_s3 + $0x20] sm:$0xff]   ;;  %v811_v12 = vld [vmem:[%s997_s5 + $0x8] sm:$0xff]   ;;  %v813_v14 = vld [vmem:[%s997_s5 + $0x10] sm:$0xff]   ;;  %vm599_vm6 = vsmask.f32 2304 }
  0x21   : > { %744 = vmatpush3.bf16.msra.mxu1 %v805_v3  ;;  %s287_s22 = scalar_lea.vmem %s992_s0, %s708_s17  ;;  %v812_v13 = vld [vmem:[%s995_s3 + $0x28] sm:$0xff]   ;;  %v814_v15 = vld [vmem:[%s995_s3 + $0x30] sm:$0xff]   ;;  %v815_v16 = vld [vmem:[%s997_s5 + $0x18] sm:$0xff]   ;;  %s292_s12 = scalar_lea.vmem %s999_s7, %s708_s17 }
  0x22   : > { %745 = vmatprep.subr.bf16.mxu1 %v845_v1  ;;  %v804_v8 = vld [vmem:[%s287_s22] sm:$0x7f]   ;;  %v816_v17 = vld [vmem:[%s995_s3 + $0x38] sm:$0xff]   ;;  %vm600_vm8 = vmand %vm598_vm5, %vm599_vm6 }
  0x23   : > { %734 = vmatpush3.bf16.msra.mxu0 %v801_v2  ;;  %v682_v18 = vld [vmem:[%s994_s2] ss:$0 sm:$0xff]  ;;  %v601_v49 = vld [vmem:[%s292_s12 + $0x4] sm:$0x7] }
  0x24   : > { %735 = vmatprep.subr.bf16.mxu0 %v845_v1  ;;  %v388_v20 = vstv %s387_s27  ;;  %v689_v35 = vld [vmem:[%s996_s4] ss:$0 sm:$0xff]  ;;  %v584_v39 = vstv %s703_s30 }
  0x25   : > { %746 = vmatpush3.bf16.msra.mxu1 %v806_v5 }
  0x26   : > { %747 = vmatprep.subr.bf16.mxu1 %v845_v1 }
  0x27   : > { %736 = vmatpush3.bf16.msra.mxu0 %v802_v4 }
  0x28   : > { %737 = vmatprep.subr.bf16.mxu0 %v845_v1 }
  0x29   : > { %748 = vmatpush3.bf16.msra.mxu1 %v807_v7 }
  0x2a   : > { %749 = vmatprep.subr.bf16.mxu1 %v845_v1 }
  0x2b   : > { %738 = vmatpush3.bf16.msra.mxu0 %v803_v6 }
  0x2c   : > { %763 = vmatprep.subr.bf16.mxu0 %v845_v1 }
  0x2d   : > { %750 = vmatpush3.bf16.msra.mxu1 %v808_v9 }
  0x2e   : > { %740 = vmatmul.mubr.msk.bf16.vlgmr.msra.gmra.mrb[0].mxu0 %vm340_vm1, %v804_v8  ;;  %751 = vmatprep.subr.bf16.mxu1 %v845_v1 }
  0x2f   : > { %764 = vmatpush3.bf16.msra.mxu0 %v809_v10  ;;  %771 = vmatprep.mubr.msk.bf16.mxu0 %vm846_vm0, %v845_v1 }
  0x30   : > { %765 = vmatprep.subr.bf16.mxu0 %v845_v1 }
  0x31   : > { %752 = vmatpush3.bf16.msra.mxu1 %v810_v11 }
  0x32   : > { %753 = vmatprep.subr.bf16.mxu1 %v845_v1 }
  0x33   : > { %766 = vmatpush3.bf16.msra.mxu0 %v811_v12 }
  0x34   : > { %767 = vmatprep.subr.bf16.mxu0 %v845_v1 }
  0x35   : > { %754 = vmatpush3.bf16.msra.mxu1 %v812_v13 }
  0x36   : > { %755 = vmatprep.subr.bf16.mxu1 %v845_v1 }
  0x37   : > { %768 = vmatpush3.bf16.msra.mxu0 %v813_v14 }
  0x38   : > { %769 = vmatprep.subr.bf16.mxu0 %v845_v1 }
  0x39   : > { %756 = vmatpush3.bf16.msra.mxu1 %v814_v15 }
  0x3a   : > { %757 = vmatprep.subr.bf16.mxu1 %v845_v1 }
  0x3b   : > { %770 = vmatpush3.bf16.msra.mxu0 %v815_v16 }
  0x3d   : > { %758 = vmatpush3.bf16.msra.mxu1 %v816_v17 }
  0x3e   : > { %772 = vmatmul.mubr.msk.bf16.vlgmr.msra.gmra.mrb[4].mxu0 %vm340_vm1, %v804_v8 }
 0x101   : > { %v378_v19 = vpop.f32.mrb[0].mxu0 }
 0x102   : > { %v379_v21 = vadd.f32 %v682_v18, %v378_v19  ;;  %v741_v22 = vpop.f32.mrb[1].mxu0 }
 0x103   : > { %v381_v23 = vpop.f32.mrb[2].mxu0 }
 0x104   : > { %v389_v24 = vmul.f32 %v388_v20, %v379_v21  ;;  %v382_v25 = vadd.f32 %v682_v18, %v381_v23  ;;  %v742_v26 = vpop.f32.mrb[3].mxu0  ;;  %vm385_vm2 = vcmp.ge.f32.partialorder %v379_v21, 0.0 }
 0x106   : > { %vm386_vm3 = vcmp.ge.f32.partialorder %v382_v25, 0.0  ;;  %v390_v27 = vmul.f32 %v388_v20, %v382_v25  ;;  %v391_v28 = vsel %vm385_vm2, %v379_v21, %v389_v24 }
 0x108   : > { %v392_v29 = vsel %vm386_vm3, %v382_v25, %v390_v27 }
 0x109   : > { %v393_v30 = vpack.c.bf16 %v392_v29, %v391_v28 }
 0x10b   : > { %760 = vmatmul.mubr.bf16.vlgmr.msra.gmra.mrb[0].mxu1 %v393_v30 }
 0x111   : > { %v572_v31 = vpop.f32.mrb[4].mxu0 }
 0x112   : > { %v773_v32 = vpop.f32.mrb[5].mxu0 }
 0x113   : > { %v575_v33 = vpop.f32.mrb[6].mxu0 }
 0x114   : > { %v774_v34 = vpop.f32.mrb[7].mxu0 }
 0x1de   : > { %v499_v36 = vpop.f32.mrb[0].mxu1 }
 0x1df   : > { %v500_v37 = vadd.f32 %v689_v35, %v499_v36  ;;  %v761_v38 = vpop.f32.mrb[1].mxu1 }
 0x1e0   : > { %v502_v40 = vpop.f32.mrb[2].mxu1 }
 0x1e1   : > { %v579_v41 = vadd.f32 %v572_v31, %v500_v37  ;;  %v503_v42 = vadd.f32 %v689_v35, %v502_v40  ;;  %v762_v43 = vpop.f32.mrb[3].mxu1 }
 0x1e3   : > { %vm581_vm4 = vcmp.ge.f32.partialorder %v579_v41, 0.0  ;;  %v585_v44 = vmul.f32 %v584_v39, %v579_v41  ;;  %v580_v45 = vadd.f32 %v575_v33, %v503_v42 }
 0x1e5   : > { %v587_v46 = vsel %vm581_vm4, %v579_v41, %v585_v44  ;;  %vm582_vm7 = vcmp.ge.f32.partialorder %v580_v45, 0.0  ;;  %v586_v47 = vmul.f32 %v584_v39, %v580_v45 }
 0x1e6   : > { %v710_v48 = vpack.c.bf16 %v587_v46, %v587_v46 }
 0x1e7   : > { %v588_v50 = vsel %vm582_vm7, %v580_v45, %v586_v47 }
 0x1e8   : > { %597 = vst [vmem:[%s292_s12] sm:$0xf] %v710_v48  ;;  %v711_v51 = vpack.c.bf16 %v588_v50, %v588_v50 }
 0x1ea   : > { %v602_v52 = vsel %vm600_vm8, %v711_v51, %v601_v49 }
 0x1eb   : > { %603 = vst [vmem:[%s292_s12 + $0x4] sm:$0x7] %v602_v52 }
 0x1ec PF: > { %s18_s24 = sadd.s32 1, %s842_s24  }
 0x1ed   : > { %p15_p1 = scmp.ge.s32.totalorder %s18_s24, 4  }
 0x1ef   :  { %17 = sbr.rel (!%p15_p1) target bundleno = 1 (0x1), region = 83 }
 0x1f6   :  { %625 = vsyncpa [#allocation3], 1 }
 0x1f7   :  { %627 = vsyncpa [#allocation3 + $0x1], 1 }

// kernel: _lambda_.19
= control target key start
LH: loop header
LB: loop body
LE: loop exit
PB: predicated region body
PF: predicated region fallthrough
CT: control target
= control target key end

     0   :  { %v249_v1 = vmov 0.0   ;;  %vm250_vm0 = vmmov 0   ;;  %v51_v4 = vlaneseq  ;;  %v251_v6 = vmov 1966171168   ;;  %s314_s0 = inlined_call_operand.vmem [shape: bf16[2,128], index: 0, kind: input, shape index: {}]   ;;  %s315_s1 = inlined_call_operand.vmem [shape: bf16[128,64], index: 1, kind: input, shape index: {}]   ;;  %s316_s2 = inlined_call_operand.vmem [shape: f32[1,64], index: 2, kind: input, shape index: {}]   ;;  %s317_s3 = inlined_call_operand.vmem [shape: f32[2,64], index: 3, kind: output, shape index: {}]  }
   0x1   :  { %v241_v0 = vld [vmem:[%s315_s1] sm:$0xff]   ;;  %218 = vmatprep.subr.bf16.mxu0 %v249_v1  ;;  %v242_v2 = vld [vmem:[%s315_s1 + $0x8] sm:$0xff]   ;;  %234 = vmatprep.mubr.msk.bf16.mxu0 %vm250_vm0, %v249_v1  ;;  %v243_v3 = vld [vmem:[%s315_s1 + $0x10] sm:$0xff]   ;;  %v49_v7 = vunpack.c.l.s4 %v251_v6  ;;  %vm159_vm1 = vcmask 523264  }
   0x2   :  { %219 = vmatpush3.bf16.msra.mxu0 %v241_v0  ;;  %v244_v5 = vld [vmem:[%s315_s1 + $0x18] sm:$0xff]   ;;  %v245_v8 = vld [vmem:[%s315_s1 + $0x20] sm:$0xff]   ;;  %v52_v11 = vshrl.u32 %v51_v4, 7  ;;  %v246_v18 = vld [vmem:[%s315_s1 + $0x28] sm:$0xff]  }
   0x3   :  { %220 = vmatprep.subr.bf16.mxu0 %v249_v1  ;;  %v15_v9 = vld [vmem:[%s314_s0] sm:$0x1]  ;;  %v50_v10 = vunpack.c.0.s8 %v49_v7  ;;  %v16_v12 = vld [vmem:[%s314_s0 + $0x1] sm:$0x1]  ;;  %v17_v13 = vld [vmem:[%s314_s0 + $0x2] sm:$0x1] }
   0x4   :  { %v18_v14 = vld [vmem:[%s314_s0 + $0x3] sm:$0x1]  ;;  %v46_v15 = vcombine.low %v15_v9, %v16_v12  ;;  %v247_v21 = vld [vmem:[%s315_s1 + $0x30] sm:$0xff]   ;;  %v248_v23 = vld [vmem:[%s315_s1 + $0x38] sm:$0xff]  }
   0x5   :  { %v47_v16 = vcombine.low %v17_v13, %v18_v14  ;;  %v53_v17 = vsub.s32 %v50_v10, %v52_v11  ;;  %v200_v25 = vld [vmem:[%s316_s2] ss:$0 sm:$0xff] }
   0x6   :  { %221 = vmatpush3.bf16.msra.mxu0 %v242_v2 }
   0x7   :  { %222 = vmatprep.subr.bf16.mxu0 %v249_v1  ;;  %v54_v19 = vrot.slane %v46_v15, %v53_v17  ;;  %v61_v20 = vrot.slane %v47_v16, %v53_v17 }
   0x9   :  { %v62_v22 = vcombine.low %v54_v19, %v61_v20 }
   0xa   :  { %223 = vmatpush3.bf16.msra.mxu0 %v243_v3 }
   0xb   :  { %224 = vmatprep.subr.bf16.mxu0 %v249_v1  ;;  %v69_v24 = vrot.slane %v62_v22, %v53_v17 }
   0xe   :  { %225 = vmatpush3.bf16.msra.mxu0 %v244_v5 }
   0xf   :  { %226 = vmatprep.subr.bf16.mxu0 %v249_v1 }
  0x12   :  { %227 = vmatpush3.bf16.msra.mxu0 %v245_v8 }
  0x13   :  { %228 = vmatprep.subr.bf16.mxu0 %v249_v1 }
  0x16   :  { %229 = vmatpush3.bf16.msra.mxu0 %v246_v18 }
  0x17   :  { %230 = vmatprep.subr.bf16.mxu0 %v249_v1 }
  0x1a   :  { %231 = vmatpush3.bf16.msra.mxu0 %v247_v21 }
  0x1b   :  { %232 = vmatprep.subr.bf16.mxu0 %v249_v1 }
  0x1e   :  { %233 = vmatpush3.bf16.msra.mxu0 %v248_v23 }
  0x21   :  { %235 = vmatmul.mubr.bf16.vlgmr.msra.gmra.mrb[0].mxu0 %v69_v24 }
  0xf4   :  { %v153_v26 = vpop.f32.mrb[0].mxu0 }
  0xf5   :  { %v154_v27 = vadd.f32 %v200_v25, %v153_v26  ;;  %v236_v28 = vpop.f32.mrb[1].mxu0 }
  0xf6   :  { %v156_v29 = vpop.f32.mrb[2].mxu0 }
  0xf7   :  { %160 = vst.msk [vmem:[#allocation2] sm:$0xff] %vm159_vm1, %v154_v27  ;;  %v237_v30 = vpop.f32.mrb[3].mxu0 }
  0xfe   :  { %v178_v31 = vld [vmem:[#allocation2] sm:$0x3] }
  0xff   :  { %179 = vst [vmem:[%s317_s3] sm:$0x3] %v178_v31 }

// kernel: _lambda_.18
= control target key start
LH: loop header
LB: loop body
LE: loop exit
PB: predicated region body
PF: predicated region fallthrough
CT: control target
= control target key end

     0   :  { %11 = vsyncpa [#allocation3], 0  ;;  %s755_s21 = smov 0   ;;  %s855_s0 = inlined_call_operand.vmem [shape: bf16[2,4,128], index: 0, kind: input, shape index: {}]   ;;  %s856_s1 = inlined_call_operand.vmem [shape: bf16[128,128], index: 1, kind: input, shape index: {}]   ;;  %s857_s2 = inlined_call_operand.vmem [shape: f32[1,128], index: 2, kind: input, shape index: {}, may-alias: {2,4}]   ;;  %s858_s3 = inlined_call_operand.vmem [shape: bf16[128,128], index: 3, kind: input, shape index: {}]   ;;  %s859_s4 = inlined_call_operand.vmem [shape: f32[1,128], index: 4, kind: input, shape index: {}, may-alias: {2,4}]   ;;  %s860_s5 = inlined_call_operand.vmem [shape: f32[2], index: 5, kind: input, shape index: {}]   ;;  %s861_s6 = inlined_call_operand.vmem [shape: bf16[2,4,128], index: 6, kind: output, shape index: {}]  }
   0x1 LB: > { %s761_s22 = sadd.s32 4294967295, %s715_s21   ;;  %p567_p0 = scmp.ge.s32.totalorder %s715_s21, 1  ;;  %s715_s21 = sphi %s755_s21, %s17_s21  }
   0x2   : > { %p179_p1 = scmp.lt.s32.totalorder %s715_s21, 3  ;;  %s204_s25 = sshll.u32 %s860_s5, 4  ;;  %s205_s25 = int_to_ptr.vmem [resolvable:$true] %s204_s25 }
   0x3   : > { %p661_p3 = scmp.eq.s32.totalorder %s761_s22, 0  ;;  %s690_s27 = scalar_lea.vmem %s205_s25, 16 }
   0x4   : > { %p768_p2 = pnand %p567_p0, %p179_p1  ;;  %p691_p6 = scmp.ne.s32.totalorder %s205_s25, %s690_s27 }
   0x5   : > { %p698_p10 = scmp.lt.s32.totalorder %s205_s25, %s205_s25  ;;  %p699_p11 = scmp.lt.s32.totalorder %s690_s27, %s690_s27 }
   0x6   : > { %p657_p4 = pneg %p768_p2 }
   0x7   : > { %p700_p12 = por %p699_p11, %p698_p10 }
   0x8   : > { %p658_p5 = pnand %p661_p3, %p657_p4 }
   0xa   : > { %p692_p7 = pneg %p658_p5 }
   0xc   : > { %p693_p8 = pnand %p692_p7, %p691_p6 }
   0xe   : > { %p694_p9 = pneg %p693_p8 }
  0x10   : > { %p701_p13 = pnand %p700_p12, %p694_p9 }
  0x12   : > { %704 = shalt.err (!%p701_p13)
}
  0x13   : > { %s717_s28 = smov [#allocation2]   ;;  %224 = sbr.rel (%p768_p2) target bundleno = 503 (0x1f7), region = 44 }
  0x14   : > { %660 = dma.vmem_to_smem (!%p658_p5), %s205_s25, 16, %s717_s28, [#allocation3]  }
  0x1a   : > { %710 = dma.done.wait (%p661_p3), [#allocation3], 16  }
  0x1b   : > { %712 = vsyncadd (%p661_p3), [#allocation3], 4294967280 }
  0x1c   : > { %230 = sfence }
  0x1d   : > { %v674_v0 = vld [vmem:[%s856_s1] sm:$0xff]   ;;  %v718_v1 = vmov 0.0   ;;  %v675_v2 = vld [vmem:[%s856_s1 + $0x8] sm:$0xff]   ;;  %vm719_vm0 = vmmov 0   ;;  %v676_v3 = vld [vmem:[%s856_s1 + $0x10] sm:$0xff]   ;;  %p253_p0 = scmp.lt.s32.totalorder %s761_s22, 1 }
  0x1e   : > { %613 = vmatprep.subr.bf16.mxu0 %v718_v1  ;;  %633 = vmatprep.subr.bf16.mxu1 %v718_v1  ;;  %v682_v4 = vld [vmem:[%s858_s3] sm:$0xff]   ;;  %v677_v5 = vld [vmem:[%s856_s1 + $0x18] sm:$0xff]   ;;  %v683_v6 = vld [vmem:[%s858_s3 + $0x8] sm:$0xff]   ;;  %s375_s19 = sld [smem:[#allocation2]]  ;;  %s592_s24 = sld [smem:[#allocation2 + $0x1]] }
  0x1f   : > { %614 = vmatpush3.bf16.msra.mxu0 %v674_v0  ;;  %629 = vmatprep.mubr.msk.bf16.mxu0 %vm719_vm0, %v718_v1  ;;  %v678_v7 = vld [vmem:[%s856_s1 + $0x20] sm:$0xff]   ;;  %v684_v8 = vld [vmem:[%s858_s3 + $0x10] sm:$0xff]   ;;  %v679_v9 = vld [vmem:[%s856_s1 + $0x28] sm:$0xff]   ;;  %s864_s22 = smov (!%p253_p0, %s761_s22), 1 }
  0x20   : > { %615 = vmatprep.subr.bf16.mxu0 %v718_v1  ;;  %649 = vmatprep.mubr.msk.bf16.mxu1 %vm719_vm0, %v718_v1  ;;  %v685_v10 = vld [vmem:[%s858_s3 + $0x18] sm:$0xff]   ;;  %v680_v11 = vld [vmem:[%s856_s1 + $0x30] sm:$0xff]   ;;  %v686_v12 = vld [vmem:[%s858_s3 + $0x20] sm:$0xff]   ;;  %s572_s7 = sshll.u32 %s864_s22, 1 }
  0x21   : > { %634 = vmatpush3.bf16.msra.mxu1 %v682_v4  ;;  %v681_v13 = vld [vmem:[%s856_s1 + $0x38] sm:$0xff]   ;;  %s256_s12 = scalar_lea.vmem %s855_s0, %s572_s7  ;;  %v687_v14 = vld [vmem:[%s858_s3 + $0x28] sm:$0xff]   ;;  %v688_v16 = vld [vmem:[%s858_s3 + $0x30] sm:$0xff]   ;;  %s260_s29 = scalar_lea.vmem %s861_s6, %s572_s7 }
  0x22   : > { %635 = vmatprep.subr.bf16.mxu1 %v718_v1  ;;  %v262_v15 = vld [vmem:[%s256_s12] sm:$0x3]  ;;  %v689_v17 = vld [vmem:[%s858_s3 + $0x38] sm:$0xff]  }
  0x23   : > { %616 = vmatpush3.bf16.msra.mxu0 %v675_v2  ;;  %v574_v18 = vld [vmem:[%s857_s2] ss:$0 sm:$0xff]  ;;  %v491_v29 = vunpack.c.l.bf16 %v262_v15 }
  0x24   : > { %617 = vmatprep.subr.bf16.mxu0 %v718_v1  ;;  %v376_v20 = vstv %s375_s19  ;;  %v583_v28 = vld [vmem:[%s859_s4] ss:$0 sm:$0xff]  ;;  %v495_v33 = vstv %s592_s24 }
  0x25   : > { %636 = vmatpush3.bf16.msra.mxu1 %v683_v6 }
  0x26   : > { %637 = vmatprep.subr.bf16.mxu1 %v718_v1 }
  0x27   : > { %618 = vmatpush3.bf16.msra.mxu0 %v676_v3 }
  0x28   : > { %619 = vmatprep.subr.bf16.mxu0 %v718_v1 }
  0x29   : > { %638 = vmatpush3.bf16.msra.mxu1 %v684_v8 }
  0x2a   : > { %639 = vmatprep.subr.bf16.mxu1 %v718_v1 }
  0x2b   : > { %620 = vmatpush3.bf16.msra.mxu0 %v677_v5 }
  0x2c   : > { %621 = vmatprep.subr.bf16.mxu0 %v718_v1 }
  0x2d   : > { %640 = vmatpush3.bf16.msra.mxu1 %v685_v10 }
  0x2e   : > { %641 = vmatprep.subr.bf16.mxu1 %v718_v1 }
  0x2f   : > { %622 = vmatpush3.bf16.msra.mxu0 %v678_v7 }
  0x30   : > { %623 = vmatprep.subr.bf16.mxu0 %v718_v1 }
  0x31   : > { %642 = vmatpush3.bf16.msra.mxu1 %v686_v12 }
  0x32   : > { %643 = vmatprep.subr.bf16.mxu1 %v718_v1 }
  0x33   : > { %624 = vmatpush3.bf16.msra.mxu0 %v679_v9 }
  0x34   : > { %625 = vmatprep.subr.bf16.mxu0 %v718_v1 }
  0x35   : > { %644 = vmatpush3.bf16.msra.mxu1 %v687_v14 }
  0x36   : > { %645 = vmatprep.subr.bf16.mxu1 %v718_v1 }
  0x37   : > { %626 = vmatpush3.bf16.msra.mxu0 %v680_v11 }
  0x38   : > { %627 = vmatprep.subr.bf16.mxu0 %v718_v1 }
  0x39   : > { %646 = vmatpush3.bf16.msra.mxu1 %v688_v16 }
  0x3a   : > { %647 = vmatprep.subr.bf16.mxu1 %v718_v1 }
  0x3b   : > { %628 = vmatpush3.bf16.msra.mxu0 %v681_v13 }
  0x3d   : > { %648 = vmatpush3.bf16.msra.mxu1 %v689_v17 }
  0x3e   : > { %630 = vmatmul.mubr.bf16.vlgmr.msra.gmra.mrb[0].mxu0 %v262_v15 }
 0x111   : > { %v368_v19 = vpop.f32.mrb[0].mxu0 }
 0x112   : > { %v369_v21 = vadd.f32 %v574_v18, %v368_v19  ;;  %v631_v22 = vpop.f32.mrb[1].mxu0 }
 0x113   : > { %v371_v23 = vpop.f32.mrb[2].mxu0 }
 0x114   : > { %vm374_vm1 = vcmp.ge.f32.partialorder %v369_v21, 0.0  ;;  %v377_v24 = vmul.f32 %v376_v20, %v369_v21  ;;  %v632_v25 = vpop.f32.mrb[3].mxu0 }
 0x116   : > { %v378_v26 = vsel %vm374_vm1, %v369_v21, %v377_v24 }
 0x117   : > { %v379_v27 = vpack.c.bf16 %v378_v26, %v378_v26 }
 0x119   : > { %650 = vmatmul.mubr.bf16.vlgmr.msra.gmra.mrb[0].mxu1 %v379_v27 }
 0x1ec   : > { %v485_v30 = vpop.f32.mrb[0].mxu1 }
 0x1ed   : > { %v486_v31 = vadd.f32 %v583_v28, %v485_v30  ;;  %v651_v32 = vpop.f32.mrb[1].mxu1 }
 0x1ee   : > { %v488_v34 = vpop.f32.mrb[2].mxu1 }
 0x1ef   : > { %v492_v35 = vadd.f32 %v491_v29, %v486_v31  ;;  %v652_v36 = vpop.f32.mrb[3].mxu1 }
 0x1f1   : > { %vm493_vm2 = vcmp.ge.f32.partialorder %v492_v35, 0.0  ;;  %v496_v37 = vmul.f32 %v495_v33, %v492_v35 }
 0x1f3   : > { %v497_v38 = vsel %vm493_vm2, %v492_v35, %v496_v37 }
 0x1f4   : > { %v498_v39 = vpack.c.bf16 %v497_v38, %v497_v38 }
 0x1f6   : > { %499 = vst [vmem:[%s260_s29] sm:$0x3] %v498_v39 }
 0x1f7 PF: > { %s17_s21 = sadd.s32 1, %s715_s21  }
 0x1f8   : > { %p14_p1 = scmp.ge.s32.totalorder %s17_s21, 4  }
 0x1fa   :  { %16 = sbr.rel (!%p14_p1) target bundleno = 1 (0x1), region = 79 }
 0x201   :  { %519 = vsyncpa [#allocation3], 1 }
 0x202   :  { %521 = vsyncpa [#allocation3 + $0x1], 1 }

// kernel: _lambda_.23
= control target key start
LH: loop header
LB: loop body
LE: loop exit
PB: predicated region body
PF: predicated region fallthrough
CT: control target
= control target key end

     0   :  { %8 = vsyncpa [#allocation3], 0  ;;  %v206_v1 = vmov 0.0   ;;  %v44_v3 = vlaneseq  ;;  %vm207_vm0 = vmmov 0   ;;  %v208_v9 = vmov 1966171168   ;;  %s271_s0 = inlined_call_operand.vmem [shape: bf16[2,64], index: 0, kind: input, shape index: {}]   ;;  %s272_s1 = inlined_call_operand.vmem [shape: bf16[64,11], index: 1, kind: input, shape index: {}]   ;;  %s273_s2 = inlined_call_operand.vmem [shape: f32[1,11], index: 2, kind: input, shape index: {}]   ;;  %s274_s3 = inlined_call_operand.hbm [shape: f32[2,11], index: 3, kind: output, shape index: {}]  }
   0x1   :  { %v178_v0 = vld [vmem:[%s272_s1] sm:$0xff]   ;;  %160 = vmatprep.subr.bf16.mxu0 %v206_v1  ;;  %v179_v2 = vld [vmem:[%s272_s1 + $0x8] sm:$0xff]   ;;  %168 = vmatprep.mubr.msk.bf16.mxu0 %vm207_vm0, %v206_v1  ;;  %v180_v8 = vld [vmem:[%s272_s1 + $0x10] sm:$0xff]   ;;  %v42_v10 = vunpack.c.l.s4 %v208_v9  ;;  %vm87_vm1 = vcmask 523264   ;;  %vm131_vm2 = vcmask 89088  }
   0x2   :  { %161 = vmatpush3.bf16.msra.mxu0 %v178_v0  ;;  %v16_v4 = vld [vmem:[%s271_s0] sm:$0x1]  ;;  %v17_v5 = vld [vmem:[%s271_s0 + $0x1] sm:$0x1]  ;;  %v18_v6 = vld [vmem:[%s271_s0 + $0x2] sm:$0x1] }
   0x3   :  { %162 = vmatprep.subr.bf16.mxu0 %v206_v1  ;;  %v19_v7 = vld [vmem:[%s271_s0 + $0x3] sm:$0x1]  ;;  %v45_v11 = vshrl.u32 %v44_v3, 7  ;;  %v39_v12 = vcombine.low %v16_v4, %v17_v5  ;;  %v43_v14 = vunpack.c.0.s8 %v42_v10  ;;  %v181_v15 = vld [vmem:[%s272_s1 + $0x18] sm:$0xff]   ;;  %v149_v21 = vld [vmem:[%s273_s2] ss:$0 sm:$0xff] }
   0x4   :  { %v40_v13 = vcombine.low %v18_v6, %v19_v7 }
   0x5   :  { %v46_v16 = vsub.s32 %v43_v14, %v45_v11 }
   0x6   :  { %163 = vmatpush3.bf16.msra.mxu0 %v179_v2 }
   0x7   :  { %164 = vmatprep.subr.bf16.mxu0 %v206_v1  ;;  %v47_v17 = vrot.slane %v39_v12, %v46_v16  ;;  %v54_v18 = vrot.slane %v40_v13, %v46_v16 }
   0x9   :  { %v55_v19 = vcombine.low %v47_v17, %v54_v18 }
   0xa   :  { %165 = vmatpush3.bf16.msra.mxu0 %v180_v8 }
   0xb   :  { %166 = vmatprep.subr.bf16.mxu0 %v206_v1  ;;  %v62_v20 = vrot.slane %v55_v19, %v46_v16 }
   0xe   :  { %167 = vmatpush3.bf16.msra.mxu0 %v181_v15 }
  0x11   :  { %169 = vmatmul.mubr.msk.bf16.vlgmr.msra.gmra.mrb[0].mxu0 %vm87_vm1, %v62_v20 }
  0xe4   :  { %v125_v22 = vpop.f32.mrb[0].mxu0 }
  0xe5   :  { %v126_v23 = vadd.f32 %v149_v21, %v125_v22  ;;  %v170_v24 = vpop.f32.mrb[1].mxu0 }
  0xe6   :  { %v128_v25 = vpop.f32.mrb[2].mxu0 }
  0xe7   :  { %132 = vst.msk [vmem:[#allocation2] sm:$0xff] %vm131_vm2, %v126_v23  ;;  %v171_v26 = vpop.f32.mrb[3].mxu0 }
  0xe8   :  { %137 = vsyncadd [#allocation3], 96  ;;  %s209_s1 = smov [#allocation2]  }
  0xe9   :  { %s138_s29 = sshll.u32 %s209_s1, 4  ;;  %s139_s29 = int_to_ptr.vmem [resolvable:$true] %s138_s29 }
  0xea   :  { %s182_s30 = scalar_lea.vmem %s139_s29, 32  ;;  %s186_s4 = scalar_lea.vmem %s139_s29, 128 }
  0xeb   :  { %p183_p0 = scmp.ne.s32.totalorder %s139_s29, %s182_s30  ;;  %p187_p1 = scmp.lt.s32.totalorder %s139_s29, %s139_s29 }
  0xec   :  { %p188_p2 = scmp.lt.s32.totalorder %s186_s4, %s182_s30 }
  0xee   :  { %p189_p3 = por %p188_p2, %p187_p1 }
  0xf0   :  { %p190_p4 = pnand %p189_p3, %p183_p0 }
  0xf2   :  { %193 = shalt.err (!%p190_p4)
}
  0xf3   :  { %s194_s6 = scalar_lea.hbm %s274_s3, 32 }
  0xf4   :  { %p195_p5 = scmp.ne.s32.totalorder %s274_s3, %s194_s6  ;;  %p198_p6 = scmp.lt.u32.totalorder %s194_s6, %s274_s3 }
  0xf6   :  { %p200_p7 = pnand %p198_p6, %p195_p5 }
  0xf8   :  { %203 = shalt.err (!%p200_p7)
}
  0xf9   :  { %s210_s11 = smov 32   ;;  %s211_s12 = smov 2  }
  0xfa   :  { %144 = dma.vmem_to_hbm [thread:$0]  %s139_s29, 32, %s274_s3, [#allocation3], %s210_s11, %s210_s11, %s211_s12  }
  0xfb   :  { %204 = dma.done.wait [#allocation3], 128  }
  0xfc   :  { %205 = vsyncadd [#allocation3], 4294967168 }
  0xfd   :  { %148 = vsyncpa [#allocation3], 1 }

// kernel: _lambda_.12
= control target key start
LH: loop header
LB: loop body
LE: loop exit
PB: predicated region body
PF: predicated region fallthrough
CT: control target
= control target key end

     0   :  { %s596_s12 = smov 0   ;;  %s694_s0 = inlined_call_operand.vmem [shape: bf16[158,32], index: 0, kind: input, shape index: {}]   ;;  %s695_s1 = inlined_call_operand.vmem [shape: bf16[32,192], index: 1, kind: input, shape index: {}]   ;;  %s696_s2 = inlined_call_operand.vmem [shape: f32[1,192], index: 2, kind: input, shape index: {}]   ;;  %s697_s3 = inlined_call_operand.vmem [shape: bf16[158,192], index: 3, kind: output, shape index: {}]  }
   0x1 LB: > { %s498_s13 = sadd.s32 4294967295, %s573_s12   ;;  %p502_p0 = scmp.ge.s32.totalorder %s573_s12, 1  ;;  %s573_s12 = sphi %s596_s12, %s13_s12  }
   0x2   : > { %p138_p1 = scmp.lt.s32.totalorder %s573_s12, 3 }
   0x4   : > { %p139_p2 = pnand %p502_p0, %p138_p1 }
   0x5   : > { %v556_v0 = vld [vmem:[%s695_s1 + $0x4] ss:$8 sps:$4 sm:$0xff] (!%p139_p2)   ;;  %s163_s16 = smul.u32 (!%p139_p2), 10, %s498_s13  ;;  %v558_v1 = vld [vmem:[%s695_s1] ss:$8 sps:$4 sm:$0xff] (!%p139_p2)   ;;  %v575_v2 = vmov (!%p139_p2), 0   ;;  %v193_v10 = vlaneseq (!%p139_p2) }
   0x6   : > { %142 = sbr.rel (%p139_p2) target bundleno = 255 (0xff), region = 32  ;;  %296 = vmatprep.mubr.bf16.mxu0 (!%p139_p2), %v575_v2  ;;  %326 = vmatprep.mubr.bf16.mxu1 (!%p139_p2), %v575_v2  ;;  %v559_v3 = vld [vmem:[%s695_s1 + $0x14] ss:$8 sps:$4 sm:$0xff] (!%p139_p2)   ;;  %v561_v4 = vld [vmem:[%s695_s1 + $0x10] ss:$8 sps:$4 sm:$0xff] (!%p139_p2)   ;;  %vm248_vm0 = vcmask (!%p139_p2), 261120  }
   0x7   : > { %264 = vmatprep.subr.bf16.mxu0 (!%p139_p2), %v556_v0  ;;  %543 = vmatprep.subr.bf16.mxu1 (!%p139_p2), %v556_v0  ;;  %p164_p3 = scmp.lt.s32.totalorder (!%p139_p2), %s163_s16, 19  ;;  %v194_v11 = vshrl.u32 (!%p139_p2), %v193_v10, 7  ;;  %v191_v13 = vld [vmem:[%s696_s2] sm:$0x3] (!%p139_p2)  ;;  %vm427_vm1 = vcmask (!%p139_p2), 1043456   ;;  %vm428_vm2 = vcmask (!%p139_p2), 523268  }
   0x8   : > { %265 = vmatpush1.bf16.msra.mxu0 (!%p139_p2), %v558_v1  ;;  %545 = vmatpush1.bf16.msra.mxu1 (!%p139_p2), %v558_v1  ;;  %vm644_vm3 = vmor (!%p139_p2), %vm428_vm2, %vm427_vm1 }
   0x9   : > { %266 = vmatprep.subr.bf16.mxu0 (!%p139_p2), %v559_v3  ;;  %544 = vmatprep.subr.bf16.mxu1 (!%p139_p2), %v559_v3  ;;  %v195_v12 = vsub.s32 (!%p139_p2), 0, %v194_v11  ;;  %v199_v14 = vsub.s32 (!%p139_p2), 1, %v194_v11 }
   0xb   : > { %v625_v15 = vrot.slane (!%p139_p2), %v191_v13, %v195_v12  ;;  %v627_v16 = vrot.slane (!%p139_p2), %v191_v13, %v199_v14 }
   0xc   : > { %267 = vmatpush1.bf16.msra.mxu0 (!%p139_p2), %v561_v4  ;;  %546 = vmatpush1.bf16.msra.mxu1 (!%p139_p2), %v561_v4 }
   0xd   : > { %s701_s16 = smov (!%p164_p3, %s163_s16), 19 }
   0xe   : > { %s503_s23 = sshll.u32 %s701_s16, 2  ;;  %s532_s29 = sshll.u32 %s701_s16, 3 }
   0xf   : > { %s167_s26 = scalar_lea.vmem %s694_s0, %s503_s23  ;;  %s640_s5 = scalar_lea.vmem %s697_s3, %s532_s29 }
  0x10   : > { %v562_v5 = vld [vmem:[%s167_s26] sm:$0xff]   ;;  %v563_v6 = vld [vmem:[%s167_s26 + $0x18] sm:$0xff]   ;;  %v564_v7 = vld [vmem:[%s167_s26 + $0x8] sm:$0xff]  }
  0x11   : > { %515 = vmatmul.mubr.msk.bf16.vlgmr.msra.gmra.mrb[0].mxu0 %vm248_vm0, %v562_v5  ;;  %518 = vmatmul.mubr.msk.bf16.vlgmr.msra.gmra.mrb[0].mxu1 %vm248_vm0, %v563_v6  ;;  %v565_v8 = vld [vmem:[%s167_s26 + $0x20] sm:$0xff]   ;;  %v566_v9 = vld [vmem:[%s167_s26 + $0x10] sm:$0xff]  }
  0x12   : > { %306 = vmatprep.mubr.bf16.mxu0 %v575_v2  ;;  %336 = vmatprep.mubr.bf16.mxu1 %v575_v2 }
  0x19   : > { %516 = vmatmul.mubr.msk.bf16.gmra.mrb[4].mxu0 %vm248_vm0, %v564_v7  ;;  %519 = vmatmul.mubr.msk.bf16.gmra.mrb[4].mxu1 %vm248_vm0, %v565_v8 }
  0x1a   : > { %316 = vmatprep.mubr.bf16.mxu0 %v575_v2 }
  0x21   : > { %517 = vmatmul.mubr.msk.bf16.gmra.mrb[8].mxu0 %vm248_vm0, %v566_v9 }
  0xe4   : > { %v298_v17 = vpop.f32.mrb[0].mxu0  ;;  %v328_v20 = vpop.f32.mrb[0].mxu1 }
  0xe5   : > { %v299_v18 = vadd.f32 %v298_v17, %v625_v15  ;;  %v300_v19 = vpop.f32.mrb[1].mxu0  ;;  %v329_v23 = vadd.f32 %v328_v20, %v625_v15  ;;  %v330_v24 = vpop.f32.mrb[1].mxu1 }
  0xe6   : > { %v301_v21 = vadd.f32 %v300_v19, %v627_v16  ;;  %v302_v22 = vpop.f32.mrb[2].mxu0  ;;  %v331_v28 = vadd.f32 %v330_v24, %v627_v16  ;;  %v332_v29 = vpop.f32.mrb[2].mxu1 }
  0xe7   : > { %v347_v25 = vmax.f32 %v299_v18, 0.0  ;;  %v303_v26 = vadd.f32 %v302_v22, %v625_v15  ;;  %v304_v27 = vpop.f32.mrb[3].mxu0  ;;  %v359_v32 = vmax.f32 %v329_v23, 0.0  ;;  %v333_v33 = vadd.f32 %v332_v29, %v625_v15  ;;  %v334_v34 = vpop.f32.mrb[3].mxu1 }
  0xe8   : > { %v348_v30 = vmax.f32 %v301_v21, 0.0  ;;  %v305_v31 = vadd.f32 %v304_v27, %v627_v16  ;;  %v360_v37 = vmax.f32 %v331_v28, 0.0  ;;  %v335_v38 = vadd.f32 %v334_v34, %v627_v16 }
  0xe9   : > { %v349_v36 = vmax.f32 %v303_v26, 0.0  ;;  %v361_v41 = vmax.f32 %v333_v33, 0.0 }
  0xea   : > { %v533_v39 = vpack.c.bf16 %v348_v30, %v347_v25  ;;  %v350_v40 = vmax.f32 %v305_v31, 0.0  ;;  %v539_v42 = vpack.c.bf16 %v360_v37, %v359_v32  ;;  %v362_v43 = vmax.f32 %v335_v38, 0.0 }
  0xec   : > { %430 = vst.msk [vmem:[%s640_s5] sm:$0xff] %vm644_vm3, %v533_v39  ;;  %v534_v44 = vpack.c.bf16 %v350_v40, %v349_v36  ;;  %v308_v45 = vpop.f32.mrb[4].mxu0  ;;  %436 = vst.msk [vmem:[%s640_s5 + $0x30] sm:$0xff] %vm644_vm3, %v539_v42  ;;  %v540_v47 = vpack.c.bf16 %v362_v43, %v361_v41  ;;  %v338_v49 = vpop.f32.mrb[4].mxu1 }
  0xed   : > { %v309_v46 = vadd.f32 %v308_v45, %v625_v15  ;;  %v310_v48 = vpop.f32.mrb[5].mxu0  ;;  %v339_v52 = vadd.f32 %v338_v49, %v625_v15  ;;  %v340_v53 = vpop.f32.mrb[5].mxu1 }
  0xee   : > { %431 = vst.msk [vmem:[%s640_s5 + $0x8] sm:$0xff] %vm644_vm3, %v534_v44  ;;  %v311_v50 = vadd.f32 %v310_v48, %v627_v16  ;;  %v312_v51 = vpop.f32.mrb[6].mxu0  ;;  %437 = vst.msk [vmem:[%s640_s5 + $0x38] sm:$0xff] %vm644_vm3, %v540_v47  ;;  %v341_v57 = vadd.f32 %v340_v53, %v627_v16  ;;  %v342_v58 = vpop.f32.mrb[6].mxu1 }
  0xef   : > { %v351_v54 = vmax.f32 %v309_v46, 0.0  ;;  %v313_v55 = vadd.f32 %v312_v51, %v625_v15  ;;  %v314_v56 = vpop.f32.mrb[7].mxu0  ;;  %v363_v61 = vmax.f32 %v339_v52, 0.0  ;;  %v343_v62 = vadd.f32 %v342_v58, %v625_v15  ;;  %v344_v63 = vpop.f32.mrb[7].mxu1 }
  0xf0   : > { %v352_v59 = vmax.f32 %v311_v50, 0.0  ;;  %v315_v60 = vadd.f32 %v314_v56, %v627_v16  ;;  %v364_v1 = vmax.f32 %v341_v57, 0.0  ;;  %v345_v2 = vadd.f32 %v344_v63, %v627_v16 }
  0xf1   : > { %v353_v0 = vmax.f32 %v313_v55, 0.0  ;;  %v365_v5 = vmax.f32 %v343_v62, 0.0 }
  0xf2   : > { %v535_v3 = vpack.c.bf16 %v352_v59, %v351_v54  ;;  %v354_v4 = vmax.f32 %v315_v60, 0.0  ;;  %v541_v6 = vpack.c.bf16 %v364_v1, %v363_v61  ;;  %v366_v7 = vmax.f32 %v345_v2, 0.0 }
  0xf4   : > { %432 = vst.msk [vmem:[%s640_s5 + $0x10] sm:$0xff] %vm644_vm3, %v535_v3  ;;  %v536_v8 = vpack.c.bf16 %v354_v4, %v353_v0  ;;  %v318_v9 = vpop.f32.mrb[8].mxu0  ;;  %438 = vst.msk [vmem:[%s640_s5 + $0x40] sm:$0xff] %vm644_vm3, %v541_v6  ;;  %v542_v11 = vpack.c.bf16 %v366_v7, %v365_v5 }
  0xf5   : > { %v319_v10 = vadd.f32 %v318_v9, %v625_v15  ;;  %v320_v12 = vpop.f32.mrb[9].mxu0 }
  0xf6   : > { %433 = vst.msk [vmem:[%s640_s5 + $0x18] sm:$0xff] %vm644_vm3, %v536_v8  ;;  %v321_v13 = vadd.f32 %v320_v12, %v627_v16  ;;  %v322_v14 = vpop.f32.mrb[10].mxu0  ;;  %439 = vst.msk [vmem:[%s640_s5 + $0x48] sm:$0xff] %vm644_vm3, %v542_v11 }
  0xf7   : > { %v355_v17 = vmax.f32 %v319_v10, 0.0  ;;  %v323_v18 = vadd.f32 %v322_v14, %v625_v15  ;;  %v324_v19 = vpop.f32.mrb[11].mxu0 }
  0xf8   : > { %v356_v20 = vmax.f32 %v321_v13, 0.0  ;;  %v325_v21 = vadd.f32 %v324_v19, %v627_v16 }
  0xf9   : > { %v357_v22 = vmax.f32 %v323_v18, 0.0 }
  0xfa   : > { %v537_v23 = vpack.c.bf16 %v356_v20, %v355_v17  ;;  %v358_v24 = vmax.f32 %v325_v21, 0.0 }
  0xfc   : > { %434 = vst.msk [vmem:[%s640_s5 + $0x20] sm:$0xff] %vm644_vm3, %v537_v23  ;;  %v538_v25 = vpack.c.bf16 %v358_v24, %v357_v22 }
  0xfe   : > { %435 = vst.msk [vmem:[%s640_s5 + $0x28] sm:$0xff] %vm644_vm3, %v538_v25 }
  0xff PF: > { %s13_s12 = sadd.s32 1, %s573_s12  }
 0x100   : > { %p10_p4 = scmp.ge.s32.totalorder %s13_s12, 4  }
 0x102   :  { %12 = sbr.rel (!%p10_p4) target bundleno = 1 (0x1), region = 62 }

// kernel: _lambda_.13
= control target key start
LH: loop header
LB: loop body
LE: loop exit
PB: predicated region body
PF: predicated region fallthrough
CT: control target
= control target key end

     0   :  { %s969_s18 = smov 0   ;;  %s1386_s0 = inlined_call_operand.vmem [shape: bf16[158,192], index: 0, kind: input, shape index: {}]   ;;  %s1387_s1 = inlined_call_operand.vmem [shape: f32[1,192], index: 1, kind: input, shape index: {}]   ;;  %s1388_s2 = inlined_call_operand.vmem [shape: f32[1,192], index: 2, kind: input, shape index: {}]   ;;  %s1389_s3 = inlined_call_operand.vmem [shape: bf16[192,64], index: 3, kind: input, shape index: {}]   ;;  %s1390_s4 = inlined_call_operand.vmem [shape: f32[1,64], index: 4, kind: input, shape index: {}]   ;;  %s1391_s5 = inlined_call_operand.vmem [shape: bf16[158,64], index: 5, kind: output, shape index: {}]  }
   0x1 LB: > { %s816_s19 = sadd.s32 4294967295, %s936_s18   ;;  %p820_p0 = scmp.ge.s32.totalorder %s936_s18, 1  ;;  %s936_s18 = sphi %s969_s18, %s15_s18  }
   0x2   : > { %p189_p1 = scmp.lt.s32.totalorder %s936_s18, 3 }
   0x4   : > { %p190_p2 = pnand %p820_p0, %p189_p1 }
   0x5   : > { %s218_s20 = smul.u32 (!%p190_p2), 10, %s816_s19  ;;  %vm262_vm0 = vcmask (!%p190_p2), 523264   ;;  %v898_v50 = vld [vmem:[%s1389_s3] sm:$0xff] (!%p190_p2)   ;;  %v938_v51 = vmov (!%p190_p2), 0   ;;  %v899_v52 = vld [vmem:[%s1389_s3 + $0x8] sm:$0xff] (!%p190_p2)   ;;  %v900_v53 = vld [vmem:[%s1389_s3 + $0x10] sm:$0xff] (!%p190_p2)  }
   0x6   : > { %193 = sbr.rel (%p190_p2) target bundleno = 579 (0x243), region = 40  ;;  %636 = vmatprep.subr.bf16.mxu0 (!%p190_p2), %v938_v51  ;;  %865 = vmatprep.subr.bf16.mxu1 (!%p190_p2), %v938_v51  ;;  %v901_v54 = vld [vmem:[%s1389_s3 + $0x18] sm:$0xff] (!%p190_p2)   ;;  %v902_v55 = vld [vmem:[%s1389_s3 + $0x20] sm:$0xff] (!%p190_p2)   ;;  %vm749_vm1 = vcmask (!%p190_p2), 519168  }
   0x7   : > { %p219_p3 = scmp.lt.s32.totalorder (!%p190_p2), %s218_s20, 19  ;;  %637 = vmatpush1.bf16.msra.mxu0 (!%p190_p2), %v898_v50  ;;  %877 = vmatpush1.bf16.msra.mxu1 (!%p190_p2), %v898_v50 }
   0x8   : > { %638 = vmatprep.subr.bf16.mxu0 (!%p190_p2), %v938_v51  ;;  %866 = vmatprep.subr.bf16.mxu1 (!%p190_p2), %v938_v51 }
   0xb   : > { %639 = vmatpush1.bf16.msra.mxu0 (!%p190_p2), %v899_v52  ;;  %878 = vmatpush1.bf16.msra.mxu1 (!%p190_p2), %v899_v52 }
   0xc   : > { %640 = vmatprep.subr.bf16.mxu0 (!%p190_p2), %v938_v51  ;;  %867 = vmatprep.subr.bf16.mxu1 (!%p190_p2), %v938_v51 }
   0xd   : > { %s1393_s20 = smov (!%p219_p3, %s218_s20), 19 }
   0xe   : > { %s854_s21 = sshll.u32 %s1393_s20, 3  ;;  %s823_s7 = sshll.u32 %s1393_s20, 2 }
   0xf   : > { %s983_s24 = scalar_lea.vmem %s1386_s0, %s854_s21  ;;  %641 = vmatpush1.bf16.msra.mxu0 %v900_v53  ;;  %879 = vmatpush1.bf16.msra.mxu1 %v900_v53  ;;  %s1361_s10 = scalar_lea.vmem %s1391_s5, %s823_s7 }
  0x10   : > { %v986_v0 = vld [vmem:[%s983_s24] sm:$0xff]  ;;  %v989_v1 = vld [vmem:[%s983_s24 + $0x10] sm:$0xff]  ;;  %v992_v2 = vld [vmem:[%s983_s24 + $0x8] sm:$0xff]  ;;  %642 = vmatprep.subr.bf16.mxu0 %v938_v51  ;;  %868 = vmatprep.subr.bf16.mxu1 %v938_v51 }
  0x11   : > { %v242_v3 = vunpack.c.l.bf16 %v986_v0  ;;  %v243_v4 = vunpack.c.h.bf16 %v986_v0  ;;  %v246_v5 = vunpack.c.l.bf16 %v989_v1  ;;  %v247_v6 = vunpack.c.h.bf16 %v989_v1  ;;  %v999_v7 = vld [vmem:[%s983_s24 + $0x18] sm:$0xff]  ;;  %v1002_v8 = vld [vmem:[%s983_s24 + $0x30] sm:$0xff]  ;;  %v1019_v17 = vld [vmem:[%s983_s24 + $0x20] sm:$0xff] }
  0x12   : > { %v244_v9 = vunpack.c.l.bf16 %v992_v2  ;;  %v245_v10 = vunpack.c.h.bf16 %v992_v2  ;;  %v248_v11 = vunpack.c.l.bf16 %v999_v7  ;;  %v249_v12 = vunpack.c.h.bf16 %v999_v7  ;;  %v1009_v13 = vld [vmem:[%s983_s24 + $0x38] sm:$0xff]  ;;  %v1022_v18 = vld [vmem:[%s983_s24 + $0x28] sm:$0xff]  ;;  %v1050_v32 = vld [vmem:[%s983_s24 + $0x40] sm:$0xff] }
  0x13   : > { %v263_v14 = vsel %vm262_vm0, %v243_v4, 0.0  ;;  %v271_v15 = vsel %vm262_vm0, %v247_v6, 0.0  ;;  %v255_v16 = vunpack.c.h.bf16 %v1002_v8  ;;  %v254_v23 = vunpack.c.l.bf16 %v1002_v8  ;;  %v1053_v33 = vld [vmem:[%s983_s24 + $0x48] sm:$0xff]  ;;  %643 = vmatpush1.bf16.msra.mxu0 %v901_v54  ;;  %880 = vmatpush1.bf16.msra.mxu1 %v901_v54 }
  0x14   : > { %v264_v19 = vadd.f32 %v263_v14, %v242_v3  ;;  %v272_v20 = vadd.f32 %v271_v15, %v246_v5  ;;  %v267_v21 = vsel %vm262_vm0, %v245_v10, 0.0  ;;  %v275_v22 = vsel %vm262_vm0, %v249_v12, 0.0  ;;  %644 = vmatprep.subr.bf16.mxu0 %v938_v51  ;;  %869 = vmatprep.subr.bf16.mxu1 %v938_v51 }
  0x15   : > { %v268_v24 = vadd.f32 %v267_v21, %v244_v9  ;;  %v276_v25 = vadd.f32 %v275_v22, %v248_v11  ;;  %v256_v26 = vunpack.c.l.bf16 %v1009_v13  ;;  %v257_v27 = vunpack.c.h.bf16 %v1009_v13 }
  0x16   : > { %265 = vadd.xlane.f32.xlu0 %v264_v19  ;;  %273 = vadd.xlane.f32.xlu1 %v272_v20  ;;  %v287_v28 = vsel %vm262_vm0, %v255_v16, 0.0  ;;  %v251_v29 = vunpack.c.h.bf16 %v1019_v17  ;;  %v253_v30 = vunpack.c.h.bf16 %v1022_v18  ;;  %v250_v36 = vunpack.c.l.bf16 %v1019_v17 }
  0x17   : > { %v291_v31 = vsel %vm262_vm0, %v257_v27, 0.0  ;;  %v288_v34 = vadd.f32 %v287_v28, %v254_v23  ;;  %v252_v37 = vunpack.c.l.bf16 %v1022_v18  ;;  %v259_v40 = vunpack.c.h.bf16 %v1050_v32  ;;  %645 = vmatpush1.bf16.msra.mxu0 %v902_v55  ;;  %881 = vmatpush1.bf16.msra.mxu1 %v902_v55 }
  0x18   : > { %v292_v35 = vadd.f32 %v291_v31, %v256_v26  ;;  %v279_v38 = vsel %vm262_vm0, %v251_v29, 0.0  ;;  %v283_v39 = vsel %vm262_vm0, %v253_v30, 0.0  ;;  %v261_v41 = vunpack.c.h.bf16 %v1053_v33  ;;  %646 = vmatprep.subr.bf16.mxu0 %v938_v51  ;;  %870 = vmatprep.subr.bf16.mxu1 %v938_v51 }
  0x19   : > { %v280_v42 = vadd.f32 %v279_v38, %v250_v36  ;;  %v284_v43 = vadd.f32 %v283_v39, %v252_v37  ;;  %v258_v44 = vunpack.c.l.bf16 %v1050_v32  ;;  %v260_v45 = vunpack.c.l.bf16 %v1053_v33 }
  0x1a   : > { %269 = vadd.xlane.f32.xlu0 %v268_v24  ;;  %277 = vadd.xlane.f32.xlu1 %v276_v25  ;;  %v295_v46 = vsel %vm262_vm0, %v259_v40, 0.0  ;;  %v299_v47 = vsel %vm262_vm0, %v261_v41, 0.0 }
  0x1b   : > { %v296_v48 = vadd.f32 %v295_v46, %v258_v44  ;;  %v300_v49 = vadd.f32 %v299_v47, %v260_v45 }
  0x1e   : > { %289 = vadd.xlane.f32.xlu0 %v288_v34  ;;  %293 = vadd.xlane.f32.xlu1 %v292_v35 }
  0x22   : > { %281 = vadd.xlane.f32.xlu0 %v280_v42  ;;  %285 = vadd.xlane.f32.xlu1 %v284_v43 }
  0x26   : > { %297 = vadd.xlane.f32.xlu0 %v296_v48  ;;  %301 = vadd.xlane.f32.xlu1 %v300_v49 }
  0xa3   : > { %v266_v56 = vpop.xlane.xlu0 %265  ;;  %v274_v57 = vpop.xlane.xlu1 %273 }
  0xa4   : > { %v304_v58 = vmul.f32 0.0052083335, %v266_v56  ;;  %v306_v59 = vmul.f32 0.0052083335, %v274_v57 }
  0xa6   : > { %v1114_v60 = vsub.f32 %v242_v3, %v304_v58  ;;  %v1118_v61 = vsub.f32 %v243_v4, %v304_v58  ;;  %v1122_v62 = vsub.f32 %v246_v5, %v306_v59  ;;  %v1126_v63 = vsub.f32 %v247_v6, %v306_v59 }
  0xa7   : > { %v270_v14 = vpop.xlane.xlu0 %269  ;;  %v278_v15 = vpop.xlane.xlu1 %277 }
  0xa8   : > { %v305_v19 = vmul.f32 0.0052083335, %v270_v14  ;;  %v307_v20 = vmul.f32 0.0052083335, %v278_v15  ;;  %v334_v3 = vmul.f32 %v1114_v60, %v1114_v60  ;;  %v335_v0 = vmul.f32 %v1118_v61, %v1118_v61 }
  0xa9   : > { %v338_v4 = vmul.f32 %v1122_v62, %v1122_v62  ;;  %v339_v5 = vmul.f32 %v1126_v63, %v1126_v63 }
  0xaa   : > { %v1138_v1 = vsub.f32 %v244_v9, %v305_v19  ;;  %v1142_v6 = vsub.f32 %v245_v10, %v305_v19  ;;  %v1146_v21 = vsub.f32 %v248_v11, %v307_v20  ;;  %v1150_v22 = vsub.f32 %v249_v12, %v307_v20 }
  0xab   : > { %v290_v24 = vpop.xlane.xlu0 %289  ;;  %v354_v25 = vsel %vm262_vm0, %v335_v0, 0.0  ;;  %v294_v28 = vpop.xlane.xlu1 %293  ;;  %v362_v31 = vsel %vm262_vm0, %v339_v5, 0.0 }
  0xac   : > { %v310_v9 = vmul.f32 0.0052083335, %v290_v24  ;;  %v355_v34 = vadd.f32 %v354_v25, %v334_v3  ;;  %v311_v35 = vmul.f32 0.0052083335, %v294_v28  ;;  %v363_v2 = vadd.f32 %v362_v31, %v338_v4 }
  0xad   : > { %v336_v10 = vmul.f32 %v1138_v1, %v1138_v1  ;;  %v337_v11 = vmul.f32 %v1142_v6, %v1142_v6  ;;  %v340_v7 = vmul.f32 %v1146_v21, %v1146_v21  ;;  %v341_v12 = vmul.f32 %v1150_v22, %v1150_v22 }
  0xae   : > { %v1164_v38 = vsub.f32 %v254_v23, %v310_v9  ;;  %v1168_v39 = vsub.f32 %v255_v16, %v310_v9  ;;  %356 = vadd.xlane.f32.xlu0 %v355_v34  ;;  %v1172_v42 = vsub.f32 %v256_v26, %v311_v35  ;;  %v1176_v43 = vsub.f32 %v257_v27, %v311_v35  ;;  %v903_v9 = vld [vmem:[%s1389_s3 + $0x28] sm:$0xff]   ;;  %v904_v35 = vld [vmem:[%s1389_s3 + $0x30] sm:$0xff]  }
  0xaf   : > { %v282_v46 = vpop.xlane.xlu0 %281  ;;  %v358_v47 = vsel %vm262_vm0, %v337_v11, 0.0  ;;  %v286_v48 = vpop.xlane.xlu1 %285  ;;  %v366_v23 = vsel %vm262_vm0, %v341_v12, 0.0  ;;  %647 = vmatpush1.bf16.msra.mxu0 %v903_v9  ;;  %882 = vmatpush1.bf16.msra.mxu1 %v903_v9  ;;  %v907_v11 = vld [vmem:[%s1389_s3 + $0x48] sm:$0xff]   ;;  %v909_v12 = vld [vmem:[%s1389_s3 + $0x58] sm:$0xff]  }
  0xb0   : > { %v308_v49 = vmul.f32 0.0052083335, %v282_v46  ;;  %v359_v50 = vadd.f32 %v358_v47, %v336_v10  ;;  %v309_v8 = vmul.f32 0.0052083335, %v286_v48  ;;  %v367_v16 = vadd.f32 %v366_v23, %v340_v7  ;;  %648 = vmatprep.subr.bf16.mxu0 %v938_v51  ;;  %871 = vmatprep.subr.bf16.mxu1 %v938_v51  ;;  %v906_v10 = vld [vmem:[%s1389_s3 + $0x40] sm:$0xff]   ;;  %v908_v7 = vld [vmem:[%s1389_s3 + $0x50] sm:$0xff]  }
  0xb1   : > { %v346_v52 = vmul.f32 %v1164_v38, %v1164_v38  ;;  %v347_v26 = vmul.f32 %v1168_v39, %v1168_v39  ;;  %v348_v13 = vmul.f32 %v1172_v42, %v1172_v42  ;;  %v349_v27 = vmul.f32 %v1176_v43, %v1176_v43 }
  0xb2   : > { %v1190_v53 = vsub.f32 %v250_v36, %v308_v49  ;;  %v1194_v54 = vsub.f32 %v251_v29, %v308_v49  ;;  %364 = vadd.xlane.f32.xlu0 %v363_v2  ;;  %360 = vadd.xlane.f32.xlu1 %v359_v50  ;;  %v1198_v55 = vsub.f32 %v252_v37, %v309_v8  ;;  %v905_v2 = vld [vmem:[%s1389_s3 + $0x38] sm:$0xff]   ;;  %v446_v23 = vlaneseq }
  0xb3   : > { %v1202_v56 = vsub.f32 %v253_v30, %v309_v8  ;;  %v298_v57 = vpop.xlane.xlu0 %297  ;;  %v378_v58 = vsel %vm262_vm0, %v347_v26, 0.0  ;;  %v302_v59 = vpop.xlane.xlu1 %301  ;;  %v382_v36 = vsel %vm262_vm0, %v349_v27, 0.0  ;;  %649 = vmatpush1.bf16.msra.mxu0 %v904_v35  ;;  %883 = vmatpush1.bf16.msra.mxu1 %v904_v35 }
  0xb4   : > { %v312_v14 = vmul.f32 0.0052083335, %v298_v57  ;;  %v379_v17 = vadd.f32 %v378_v58, %v346_v52  ;;  %v313_v29 = vmul.f32 0.0052083335, %v302_v59  ;;  %v383_v15 = vadd.f32 %v382_v36, %v348_v13  ;;  %650 = vmatprep.subr.bf16.mxu0 %v938_v51  ;;  %872 = vmatprep.subr.bf16.mxu1 %v938_v51 }
  0xb5   : > { %v342_v19 = vmul.f32 %v1190_v53, %v1190_v53  ;;  %v343_v37 = vmul.f32 %v1194_v54, %v1194_v54  ;;  %v344_v18 = vmul.f32 %v1198_v55, %v1198_v55  ;;  %v345_v30 = vmul.f32 %v1202_v56, %v1202_v56 }
  0xb6   : > { %v1216_v20 = vsub.f32 %v258_v44, %v312_v14  ;;  %v1220_v3 = vsub.f32 %v259_v40, %v312_v14  ;;  %368 = vadd.xlane.f32.xlu1 %v367_v16  ;;  %380 = vadd.xlane.f32.xlu0 %v379_v17  ;;  %v1224_v0 = vsub.f32 %v260_v45, %v313_v29  ;;  %v447_v13 = vshrl.u32 %v446_v23, 7 }
  0xb7   : > { %v1228_v4 = vsub.f32 %v261_v41, %v313_v29  ;;  %v370_v5 = vsel %vm262_vm0, %v343_v37, 0.0  ;;  %v374_v24 = vsel %vm262_vm0, %v345_v30, 0.0  ;;  %651 = vmatpush1.bf16.msra.mxu0 %v905_v2  ;;  %884 = vmatpush1.bf16.msra.mxu1 %v905_v2 }
  0xb8   : > { %v371_v44 = vadd.f32 %v370_v5, %v342_v19  ;;  %v350_v32 = vmul.f32 %v1216_v20, %v1216_v20  ;;  %v351_v40 = vmul.f32 %v1220_v3, %v1220_v3  ;;  %v375_v45 = vadd.f32 %v374_v24, %v344_v18  ;;  %652 = vmatprep.subr.bf16.mxu0 %v938_v51  ;;  %v444_v19 = vld [vmem:[%s1387_s1] sm:$0x3] }
  0xb9   : > { %v353_v25 = vmul.f32 %v1228_v4, %v1228_v4  ;;  %v352_v41 = vmul.f32 %v1224_v0, %v1224_v0  ;;  %873 = vmatprep.subr.bf16.mxu1 %v938_v51  ;;  %v448_v14 = vsub.s32 0, %v447_v13  ;;  %v452_v17 = vsub.s32 1, %v447_v13 }
  0xba   : > { %384 = vadd.xlane.f32.xlu1 %v383_v15  ;;  %372 = vadd.xlane.f32.xlu0 %v371_v44  ;;  %v386_v33 = vsel %vm262_vm0, %v351_v40, 0.0  ;;  %v476_v40 = vld [vmem:[%s1388_s2] sm:$0x3] }
  0xbb   : > { %v387_v28 = vadd.f32 %v386_v33, %v350_v32  ;;  %v390_v31 = vsel %vm262_vm0, %v353_v25, 0.0  ;;  %653 = vmatpush1.bf16.msra.mxu0 %v906_v10  ;;  %885 = vmatpush1.bf16.msra.mxu1 %v906_v10  ;;  %v1278_v44 = vrot.slane %v444_v19, %v448_v14  ;;  %v1280_v32 = vrot.slane %v444_v19, %v452_v17 }
  0xbc   : > { %v391_v34 = vadd.f32 %v390_v31, %v352_v41  ;;  %654 = vmatprep.subr.bf16.mxu0 %v938_v51  ;;  %874 = vmatprep.subr.bf16.mxu1 %v938_v51  ;;  %v1287_v9 = vrot.slane %v476_v40, %v448_v14 }
  0xbe   : > { %376 = vadd.xlane.f32.xlu1 %v375_v45  ;;  %388 = vadd.xlane.f32.xlu0 %v387_v28 }
  0xbf   : > { %655 = vmatpush1.bf16.msra.mxu0 %v907_v11  ;;  %886 = vmatpush1.bf16.msra.mxu1 %v907_v11 }
  0xc0   : > { %656 = vmatprep.subr.bf16.mxu0 %v938_v51  ;;  %875 = vmatprep.subr.bf16.mxu1 %v938_v51 }
  0xc2   : > { %392 = vadd.xlane.f32.xlu1 %v391_v34  ;;  %v1289_v34 = vrot.slane %v476_v40, %v452_v17 }
  0xc3   : > { %657 = vmatpush1.bf16.msra.mxu0 %v908_v7  ;;  %887 = vmatpush1.bf16.msra.mxu1 %v908_v7 }
  0xc4   : > { %658 = vmatprep.subr.bf16.mxu0 %v938_v51  ;;  %876 = vmatprep.subr.bf16.mxu1 %v938_v51 }
  0xc7   : > { %659 = vmatpush1.bf16.msra.mxu0 %v909_v12  ;;  %888 = vmatpush1.bf16.msra.mxu1 %v909_v12 }
 0x13b   : > { %v357_v46 = vpop.xlane.xlu0 %356 }
 0x13c   : > { %v394_v47 = vmul.f32 0.0052083335, %v357_v46 }
 0x13e   : > { %v404_v48 = vadd.f32 1e-05, %v394_v47 }
 0x13f   : > { %v361_v49 = vpop.xlane.xlu1 %360  ;;  %v365_v50 = vpop.xlane.xlu0 %364 }
 0x140   : > { %910 = vrsqrt.f32 %v404_v48  ;;  %v395_v8 = vmul.f32 0.0052083335, %v361_v49  ;;  %v396_v16 = vmul.f32 0.0052083335, %v365_v50 }
 0x142   : > { %v405_v52 = vadd.f32 1e-05, %v395_v8  ;;  %v406_v26 = vadd.f32 1e-05, %v396_v16 }
 0x143   : > { %v369_v27 = vpop.xlane.xlu1 %368  ;;  %v381_v57 = vpop.xlane.xlu0 %380 }
 0x144   : > { %912 = vrsqrt.f32 %v405_v52  ;;  %v397_v58 = vmul.f32 0.0052083335, %v369_v27  ;;  %v400_v59 = vmul.f32 0.0052083335, %v381_v57 }
 0x145   : > { %914 = vrsqrt.f32 %v406_v26 }
 0x146   : > { %v407_v51 = vadd.f32 1e-05, %v397_v58  ;;  %v410_v36 = vadd.f32 1e-05, %v400_v59 }
 0x147   : > { %v385_v29 = vpop.xlane.xlu1 %384  ;;  %v373_v15 = vpop.xlane.xlu0 %372 }
 0x148   : > { %916 = vrsqrt.f32 %v407_v51  ;;  %v401_v37 = vmul.f32 0.0052083335, %v385_v29  ;;  %v398_v18 = vmul.f32 0.0052083335, %v373_v15 }
 0x149   : > { %918 = vrsqrt.f32 %v410_v36 }
 0x14a   : > { %v911_v30 = vpop.eup %910  ;;  %v411_v5 = vadd.f32 1e-05, %v401_v37  ;;  %v408_v24 = vadd.f32 1e-05, %v398_v18 }
 0x14b   : > { %v377_v25 = vpop.xlane.xlu1 %376  ;;  %v389_v45 = vpop.xlane.xlu0 %388  ;;  %v425_v33 = vmul.f32 %v911_v30, %v1118_v61  ;;  %v424_v41 = vmul.f32 %v911_v30, %v1114_v60 }
 0x14c   : > { %920 = vrsqrt.f32 %v411_v5  ;;  %v399_v28 = vmul.f32 0.0052083335, %v377_v25  ;;  %v402_v31 = vmul.f32 0.0052083335, %v389_v45 }
 0x14d   : > { %922 = vrsqrt.f32 %v408_v24  ;;  %v457_v11 = vmul.f32 %v1280_v32, %v425_v33  ;;  %v456_v7 = vmul.f32 %v1278_v44, %v424_v41 }
 0x14e   : > { %v913_v35 = vpop.eup %912  ;;  %v409_v2 = vadd.f32 1e-05, %v399_v28  ;;  %v412_v10 = vadd.f32 1e-05, %v402_v31 }
 0x14f   : > { %v915_v12 = vpop.eup %914  ;;  %v393_v46 = vpop.xlane.xlu1 %392  ;;  %v427_v61 = vmul.f32 %v913_v35, %v1142_v6  ;;  %v426_v60 = vmul.f32 %v913_v35, %v1138_v1  ;;  %v489_v16 = vadd.f32 %v1289_v34, %v457_v11  ;;  %v488_v52 = vadd.f32 %v1287_v9, %v456_v7 }
 0x150   : > { %v429_v47 = vmul.f32 %v915_v12, %v1126_v63  ;;  %924 = vrsqrt.f32 %v409_v2  ;;  %v403_v48 = vmul.f32 0.0052083335, %v393_v46  ;;  %v428_v58 = vmul.f32 %v915_v12, %v1122_v62 }
 0x151   : > { %926 = vrsqrt.f32 %v412_v10  ;;  %v459_v23 = vmul.f32 %v1280_v32, %v427_v61  ;;  %v458_v49 = vmul.f32 %v1278_v44, %v426_v60 }
 0x152   : > { %v917_v50 = vpop.eup %916  ;;  %v413_v8 = vadd.f32 1e-05, %v403_v48  ;;  %v461_v26 = vmul.f32 %v1280_v32, %v429_v47  ;;  %v460_v18 = vmul.f32 %v1278_v44, %v428_v58 }
 0x153   : > { %v919_v6 = vpop.eup %918  ;;  %v431_v1 = vmul.f32 %v917_v50, %v1150_v22  ;;  %v491_v63 = vadd.f32 %v1289_v34, %v459_v23  ;;  %v490_v13 = vadd.f32 %v1287_v9, %v458_v49  ;;  %v430_v27 = vmul.f32 %v917_v50, %v1146_v21 }
 0x154   : > { %928 = vrsqrt.f32 %v413_v8  ;;  %v437_v57 = vmul.f32 %v919_v6, %v1168_v39  ;;  %v436_v29 = vmul.f32 %v919_v6, %v1164_v38  ;;  %v493_v21 = vadd.f32 %v1289_v34, %v461_v26 }
 0x155   : > { %v509_v59 = vpack.c.bf16 %v491_v63, %v489_v16  ;;  %v508_v51 = vpack.c.bf16 %v490_v13, %v488_v52  ;;  %v463_v36 = vmul.f32 %v1280_v32, %v431_v1  ;;  %v462_v22 = vmul.f32 %v1278_v44, %v430_v27 }
 0x156   : > { %v921_v14 = vpop.eup %920  ;;  %v469_v17 = vmul.f32 %v1280_v32, %v437_v57  ;;  %v468_v30 = vmul.f32 %v1278_v44, %v436_v29  ;;  %v492_v2 = vadd.f32 %v1287_v9, %v460_v18 }
 0x157   : > { %v923_v15 = vpop.eup %922  ;;  %837 = vmatprep.mubr.msk.bf16.mxu0 %vm262_vm0, %v509_v59  ;;  %v495_v39 = vadd.f32 %v1289_v34, %v463_v36  ;;  %v439_v62 = vmul.f32 %v921_v14, %v1176_v43  ;;  %v438_v19 = vmul.f32 %v921_v14, %v1172_v42  ;;  %v494_v45 = vadd.f32 %v1287_v9, %v462_v22 }
 0x158   : > { %v433_v37 = vmul.f32 %v923_v15, %v1194_v54  ;;  %669 = vmatmul.mubr.bf16.vlgmr.msra.gmra.mrb[0].mxu0 %v508_v51  ;;  %v501_v25 = vadd.f32 %v1289_v34, %v469_v17  ;;  %v500_v43 = vadd.f32 %v1287_v9, %v468_v30  ;;  %v432_v10 = vmul.f32 %v923_v15, %v1190_v53 }
 0x159   : > { %v511_v5 = vpack.c.bf16 %v495_v39, %v493_v21  ;;  %v471_v38 = vmul.f32 %v1280_v32, %v439_v62  ;;  %v470_v24 = vmul.f32 %v1278_v44, %v438_v19  ;;  %v510_v61 = vpack.c.bf16 %v494_v45, %v492_v2 }
 0x15a   : > { %v925_v40 = vpop.eup %924  ;;  %v465_v42 = vmul.f32 %v1280_v32, %v433_v37  ;;  %v464_v23 = vmul.f32 %v1278_v44, %v432_v10 }
 0x15b   : > { %v927_v54 = vpop.eup %926  ;;  %v435_v33 = vmul.f32 %v925_v40, %v1202_v56  ;;  %838 = vmatprep.mubr.msk.bf16.mxu0 %vm262_vm0, %v511_v5  ;;  %v503_v41 = vadd.f32 %v1289_v34, %v471_v38  ;;  %v502_v28 = vadd.f32 %v1287_v9, %v470_v24  ;;  %v434_v31 = vmul.f32 %v925_v40, %v1198_v55 }
 0x15c   : > { %v441_v35 = vmul.f32 %v927_v54, %v1220_v3  ;;  %v440_v11 = vmul.f32 %v927_v54, %v1216_v20  ;;  %v497_v60 = vadd.f32 %v1289_v34, %v465_v42  ;;  %v496_v6 = vadd.f32 %v1287_v9, %v464_v23 }
 0x15d   : > { %v515_v7 = vpack.c.bf16 %v503_v41, %v501_v25  ;;  %v514_v12 = vpack.c.bf16 %v502_v28, %v500_v43  ;;  %v467_v56 = vmul.f32 %v1280_v32, %v435_v33  ;;  %v466_v55 = vmul.f32 %v1278_v44, %v434_v31 }
 0x15e   : > { %v929_v46 = vpop.eup %928  ;;  %v473_v47 = vmul.f32 %v1280_v32, %v441_v35  ;;  %v472_v48 = vmul.f32 %v1278_v44, %v440_v11 }
 0x15f   : > { %v443_v3 = vmul.f32 %v929_v46, %v1228_v4  ;;  %840 = vmatprep.mubr.msk.bf16.mxu1 %vm262_vm0, %v515_v7  ;;  %v499_v53 = vadd.f32 %v1289_v34, %v467_v56  ;;  %v442_v20 = vmul.f32 %v929_v46, %v1224_v0  ;;  %v498_v4 = vadd.f32 %v1287_v9, %v466_v55 }
 0x160   : > { %677 = vmatmul.mubr.bf16.gmra.mrb[4].mxu0 %v510_v61  ;;  %693 = vmatmul.mubr.bf16.vlgmr.msra.gmra.mrb[0].mxu1 %v514_v12  ;;  %v505_v16 = vadd.f32 %v1289_v34, %v473_v47  ;;  %v504_v52 = vadd.f32 %v1287_v9, %v472_v48 }
 0x161   : > { %v513_v49 = vpack.c.bf16 %v499_v53, %v497_v60  ;;  %v475_v50 = vmul.f32 %v1280_v32, %v443_v3  ;;  %v474_v8 = vmul.f32 %v1278_v44, %v442_v20  ;;  %v512_v32 = vpack.c.bf16 %v498_v4, %v496_v6  ;;  %v824_v44 = vld [vmem:[%s1390_s4] ss:$0 sm:$0xff] }
 0x163   : > { %839 = vmatprep.mubr.msk.bf16.mxu0 %vm262_vm0, %v513_v49  ;;  %v507_v0 = vadd.f32 %v1289_v34, %v475_v50  ;;  %v506_v26 = vadd.f32 %v1287_v9, %v474_v8 }
 0x165   : > { %v517_v1 = vpack.c.bf16 %v507_v0, %v505_v16  ;;  %v516_v63 = vpack.c.bf16 %v506_v26, %v504_v52 }
 0x167   : > { %841 = vmatprep.mubr.msk.bf16.mxu1 %vm262_vm0, %v517_v1 }
 0x168   : > { %685 = vmatmul.mubr.bf16.gmra.mrb[8].mxu0 %v512_v32  ;;  %701 = vmatmul.mubr.bf16.gmra.mrb[4].mxu1 %v516_v63 }
 0x22b   : > { %v670_v13 = vpop.f32.mrb[0].mxu0 }
 0x22c   : > { %v671_v34 = vadd.f32 %v824_v44, %v670_v13  ;;  %v672_v27 = vpop.f32.mrb[1].mxu0 }
 0x22d   : > { %v673_v9 = vpop.f32.mrb[2].mxu0 }
 0x22e   : > { %v855_v57 = vpack.c.bf16 %v671_v34, %v671_v34  ;;  %v674_v58 = vadd.f32 %v824_v44, %v673_v9  ;;  %v675_v59 = vpop.f32.mrb[3].mxu0 }
 0x230   : > { %750 = vst.msk [vmem:[%s1361_s10] sm:$0xf] %vm749_vm1, %v855_v57  ;;  %v856_v51 = vpack.c.bf16 %v674_v58, %v674_v58 }
 0x232   : > { %751 = vst.msk [vmem:[%s1361_s10 + $0x4] sm:$0xf] %vm749_vm1, %v856_v51 }
 0x233   : > { %v678_v36 = vpop.f32.mrb[4].mxu0  ;;  %v694_v14 = vpop.f32.mrb[0].mxu1 }
 0x234   : > { %v679_v17 = vadd.f32 %v824_v44, %v678_v36  ;;  %v695_v22 = vadd.f32 %v824_v44, %v694_v14  ;;  %v680_v29 = vpop.f32.mrb[5].mxu0  ;;  %v696_v15 = vpop.f32.mrb[1].mxu1 }
 0x235   : > { %v681_v21 = vpop.f32.mrb[6].mxu0  ;;  %v697_v39 = vpop.f32.mrb[2].mxu1 }
 0x236   : > { %v857_v62 = vpack.c.bf16 %v679_v17, %v679_v17  ;;  %v861_v19 = vpack.c.bf16 %v695_v22, %v695_v22  ;;  %v682_v37 = vadd.f32 %v824_v44, %v681_v21  ;;  %v698_v18 = vadd.f32 %v824_v44, %v697_v39  ;;  %v683_v30 = vpop.f32.mrb[7].mxu0  ;;  %v699_v5 = vpop.f32.mrb[3].mxu1 }
 0x238   : > { %752 = vst.msk [vmem:[%s1361_s10 + $0x8] sm:$0xf] %vm749_vm1, %v857_v62  ;;  %756 = vst.msk [vmem:[%s1361_s10 + $0x18] sm:$0xf] %vm749_vm1, %v861_v19  ;;  %v858_v38 = vpack.c.bf16 %v682_v37, %v682_v37  ;;  %v862_v24 = vpack.c.bf16 %v698_v18, %v698_v18 }
 0x23a   : > { %753 = vst.msk [vmem:[%s1361_s10 + $0xc] sm:$0xf] %vm749_vm1, %v858_v38  ;;  %757 = vst.msk [vmem:[%s1361_s10 + $0x1c] sm:$0xf] %vm749_vm1, %v862_v24 }
 0x23b   : > { %v686_v40 = vpop.f32.mrb[8].mxu0  ;;  %v702_v25 = vpop.f32.mrb[4].mxu1 }
 0x23c   : > { %v687_v45 = vadd.f32 %v824_v44, %v686_v40  ;;  %v703_v43 = vadd.f32 %v824_v44, %v702_v25  ;;  %v688_v42 = vpop.f32.mrb[9].mxu0  ;;  %v704_v54 = vpop.f32.mrb[5].mxu1 }
 0x23d   : > { %v689_v33 = vpop.f32.mrb[10].mxu0  ;;  %v705_v41 = vpop.f32.mrb[6].mxu1 }
 0x23e   : > { %v859_v28 = vpack.c.bf16 %v687_v45, %v687_v45  ;;  %v863_v31 = vpack.c.bf16 %v703_v43, %v703_v43  ;;  %v690_v35 = vadd.f32 %v824_v44, %v689_v33  ;;  %v706_v2 = vadd.f32 %v824_v44, %v705_v41  ;;  %v691_v10 = vpop.f32.mrb[11].mxu0  ;;  %v707_v11 = vpop.f32.mrb[7].mxu1 }
 0x240   : > { %754 = vst.msk [vmem:[%s1361_s10 + $0x10] sm:$0xf] %vm749_vm1, %v859_v28  ;;  %758 = vst.msk [vmem:[%s1361_s10 + $0x20] sm:$0xf] %vm749_vm1, %v863_v31  ;;  %v860_v7 = vpack.c.bf16 %v690_v35, %v690_v35  ;;  %v864_v12 = vpack.c.bf16 %v706_v2, %v706_v2 }
 0x242   : > { %755 = vst.msk [vmem:[%s1361_s10 + $0x14] sm:$0xf] %vm749_vm1, %v860_v7  ;;  %759 = vst.msk [vmem:[%s1361_s10 + $0x24] sm:$0xf] %vm749_vm1, %v864_v12 }
 0x243 PF: > { %s15_s18 = sadd.s32 1, %s936_s18  }
 0x244   : > { %p12_p4 = scmp.ge.s32.totalorder %s15_s18, 4  }
 0x246   :  { %14 = sbr.rel (!%p12_p4) target bundleno = 1 (0x1), region = 70 }

// kernel: _lambda_.21
= control target key start
LH: loop header
LB: loop body
LE: loop exit
PB: predicated region body
PF: predicated region fallthrough
CT: control target
= control target key end

     0   :  { %s756_s15 = smov 0   ;;  %s901_s0 = inlined_call_operand.vmem [shape: bf16[158,64], index: 0, kind: input, shape index: {}]   ;;  %s902_s1 = inlined_call_operand.vmem [shape: bf16[158,192], index: 1, kind: input, shape index: {}]   ;;  %s903_s2 = inlined_call_operand.vmem [shape: bf16[64,192], index: 2, kind: input, shape index: {}]   ;;  %s904_s3 = inlined_call_operand.vmem [shape: f32[1,192], index: 3, kind: input, shape index: {}]   ;;  %s905_s4 = inlined_call_operand.vmem [shape: bf16[158,192], index: 4, kind: output, shape index: {}]  }
   0x1 LB: > { %s636_s16 = sadd.s32 4294967295, %s728_s15   ;;  %p640_p0 = scmp.ge.s32.totalorder %s728_s15, 1  ;;  %s728_s15 = sphi %s756_s15, %s14_s15  }
   0x2   : > { %p175_p1 = scmp.lt.s32.totalorder %s728_s15, 3 }
   0x4   : > { %p176_p2 = pnand %p640_p0, %p175_p1 }
   0x5   : > { %v705_v0 = vld [vmem:[%s903_s2 + $0x4] ss:$8 sps:$4 sm:$0xff] (!%p176_p2)   ;;  %s208_s19 = smul.u32 (!%p176_p2), 10, %s636_s16  ;;  %v707_v1 = vld [vmem:[%s903_s2] ss:$8 sps:$4 sm:$0xff] (!%p176_p2)   ;;  %v730_v2 = vmov (!%p176_p2), 0   ;;  %v249_v14 = vlaneseq (!%p176_p2) }
   0x6   : > { %179 = sbr.rel (%p176_p2) target bundleno = 263 (0x107), region = 36  ;;  %372 = vmatprep.mubr.bf16.mxu0 (!%p176_p2), %v730_v2  ;;  %402 = vmatprep.mubr.bf16.mxu1 (!%p176_p2), %v730_v2  ;;  %v708_v3 = vld [vmem:[%s903_s2 + $0x14] ss:$8 sps:$4 sm:$0xff] (!%p176_p2)   ;;  %v710_v4 = vld [vmem:[%s903_s2 + $0x10] ss:$8 sps:$4 sm:$0xff] (!%p176_p2)   ;;  %vm324_vm0 = vcmask (!%p176_p2), 523264  }
   0x7   : > { %340 = vmatprep.subr.bf16.mxu0 (!%p176_p2), %v705_v0  ;;  %688 = vmatprep.subr.bf16.mxu1 (!%p176_p2), %v705_v0  ;;  %p209_p3 = scmp.lt.s32.totalorder (!%p176_p2), %s208_s19, 19  ;;  %v711_v5 = vld [vmem:[%s903_s2 + $0x24] ss:$8 sps:$4 sm:$0xff] (!%p176_p2)   ;;  %v713_v6 = vld [vmem:[%s903_s2 + $0x20] ss:$8 sps:$4 sm:$0xff] (!%p176_p2)   ;;  %v250_v15 = vshrl.u32 (!%p176_p2), %v249_v14, 7 }
   0x8   : > { %341 = vmatpush1.bf16.msra.mxu0 (!%p176_p2), %v707_v1  ;;  %692 = vmatpush1.bf16.msra.mxu1 (!%p176_p2), %v707_v1  ;;  %v714_v7 = vld [vmem:[%s903_s2 + $0x34] ss:$8 sps:$4 sm:$0xff] (!%p176_p2)   ;;  %v716_v8 = vld [vmem:[%s903_s2 + $0x30] ss:$8 sps:$4 sm:$0xff] (!%p176_p2)   ;;  %v247_v17 = vld [vmem:[%s904_s3] sm:$0x3] (!%p176_p2) }
   0x9   : > { %342 = vmatprep.subr.bf16.mxu0 (!%p176_p2), %v708_v3  ;;  %689 = vmatprep.subr.bf16.mxu1 (!%p176_p2), %v708_v3  ;;  %v251_v16 = vsub.s32 (!%p176_p2), 0, %v250_v15  ;;  %v255_v18 = vsub.s32 (!%p176_p2), 1, %v250_v15  ;;  %vm553_vm1 = vcmask (!%p176_p2), 1043456   ;;  %vm554_vm2 = vcmask (!%p176_p2), 523268  }
   0xa   : > { %vm842_vm3 = vmor (!%p176_p2), %vm554_vm2, %vm553_vm1 }
   0xb   : > { %v807_v21 = vrot.slane (!%p176_p2), %v247_v17, %v251_v16  ;;  %v814_v26 = vrot.slane (!%p176_p2), %v247_v17, %v255_v18 }
   0xc   : > { %343 = vmatpush1.bf16.msra.mxu0 (!%p176_p2), %v710_v4  ;;  %693 = vmatpush1.bf16.msra.mxu1 (!%p176_p2), %v710_v4 }
   0xd   : > { %s909_s19 = smov (!%p209_p3, %s208_s19), 19  ;;  %344 = vmatprep.subr.bf16.mxu0 %v711_v5  ;;  %690 = vmatprep.subr.bf16.mxu1 %v711_v5 }
   0xe   : > { %s641_s28 = sshll.u32 %s909_s19, 2  ;;  %s676_s12 = sshll.u32 %s909_s19, 3 }
   0xf   : > { %s212_s7 = scalar_lea.vmem %s901_s0, %s641_s28  ;;  %s800_s16 = scalar_lea.vmem %s902_s1, %s676_s12 }
  0x10   : > { %345 = vmatpush1.bf16.msra.mxu0 %v713_v6  ;;  %694 = vmatpush1.bf16.msra.mxu1 %v713_v6  ;;  %v717_v9 = vld [vmem:[%s212_s7] sm:$0xff]   ;;  %v718_v10 = vld [vmem:[%s212_s7 + $0x18] sm:$0xff]   ;;  %v719_v11 = vld [vmem:[%s212_s7 + $0x8] sm:$0xff]   ;;  %s838_s22 = scalar_lea.vmem %s905_s4, %s676_s12 }
  0x11   : > { %346 = vmatprep.subr.bf16.mxu0 %v714_v7  ;;  %691 = vmatprep.subr.bf16.mxu1 %v714_v7  ;;  %v720_v12 = vld [vmem:[%s212_s7 + $0x20] sm:$0xff]   ;;  %v721_v13 = vld [vmem:[%s212_s7 + $0x10] sm:$0xff]   ;;  %v444_v20 = vld [vmem:[%s800_s16 + $0x8] sm:$0xff] }
  0x12   : > { %v443_v19 = vld [vmem:[%s800_s16] sm:$0xff]  ;;  %v449_v22 = vld [vmem:[%s800_s16 + $0x30] sm:$0xff]  ;;  %v450_v23 = vld [vmem:[%s800_s16 + $0x38] sm:$0xff]  ;;  %v455_v28 = vunpack.c.l.bf16 %v444_v20  ;;  %v456_v29 = vunpack.c.h.bf16 %v444_v20 }
  0x13   : > { %v812_v24 = vld [vmem:[%s800_s16 + $0x10] sm:$0xff]  ;;  %v453_v25 = vunpack.c.l.bf16 %v443_v19  ;;  %v454_v27 = vunpack.c.h.bf16 %v443_v19  ;;  %v817_v30 = vld [vmem:[%s800_s16 + $0x18] sm:$0xff]  ;;  %v465_v33 = vunpack.c.l.bf16 %v449_v22  ;;  %v466_v34 = vunpack.c.h.bf16 %v449_v22  ;;  %v451_v59 = vld [vmem:[%s800_s16 + $0x40] sm:$0xff] }
  0x14   : > { %347 = vmatpush1.bf16.msra.mxu0 %v716_v8  ;;  %695 = vmatpush1.bf16.msra.mxu1 %v716_v8  ;;  %v467_v35 = vunpack.c.l.bf16 %v450_v23  ;;  %v457_v36 = vunpack.c.l.bf16 %v812_v24  ;;  %v468_v41 = vunpack.c.h.bf16 %v450_v23  ;;  %v458_v42 = vunpack.c.h.bf16 %v812_v24  ;;  %v452_v4 = vld [vmem:[%s800_s16 + $0x48] sm:$0xff] }
  0x15   : > { %v459_v47 = vunpack.c.l.bf16 %v817_v30  ;;  %v460_v48 = vunpack.c.h.bf16 %v817_v30  ;;  %v469_v8 = vunpack.c.l.bf16 %v451_v59  ;;  %v471_v20 = vunpack.c.l.bf16 %v452_v4  ;;  %v448_v24 = vld [vmem:[%s800_s16 + $0x28] sm:$0xff] }
  0x16   : > { %v472_v22 = vunpack.c.h.bf16 %v452_v4 }
  0x17   : > { %659 = vmatmul.mubr.msk.bf16.vlgmr.msra.gmra.mrb[0].mxu0 %vm324_vm0, %v717_v9  ;;  %662 = vmatmul.mubr.msk.bf16.vlgmr.msra.gmra.mrb[0].mxu1 %vm324_vm0, %v718_v10  ;;  %v470_v9 = vunpack.c.h.bf16 %v451_v59 }
  0x18   : > { %382 = vmatprep.mubr.bf16.mxu0 %v730_v2  ;;  %412 = vmatprep.mubr.bf16.mxu1 %v730_v2 }
  0x1f   : > { %660 = vmatmul.mubr.msk.bf16.gmra.mrb[4].mxu0 %vm324_vm0, %v719_v11  ;;  %663 = vmatmul.mubr.msk.bf16.gmra.mrb[4].mxu1 %vm324_vm0, %v720_v12 }
  0x20   : > { %392 = vmatprep.mubr.bf16.mxu0 %v730_v2 }
  0x27   : > { %661 = vmatmul.mubr.msk.bf16.gmra.mrb[8].mxu0 %vm324_vm0, %v721_v13 }
  0xea   : > { %v374_v31 = vpop.f32.mrb[0].mxu0  ;;  %v404_v32 = vpop.f32.mrb[0].mxu1 }
  0xeb   : > { %v375_v37 = vadd.f32 %v374_v31, %v807_v21  ;;  %v376_v38 = vpop.f32.mrb[1].mxu0  ;;  %v405_v39 = vadd.f32 %v404_v32, %v807_v21  ;;  %v406_v40 = vpop.f32.mrb[1].mxu1 }
  0xec   : > { %v377_v43 = vadd.f32 %v376_v38, %v814_v26  ;;  %v378_v44 = vpop.f32.mrb[2].mxu0  ;;  %v407_v45 = vadd.f32 %v406_v40, %v814_v26  ;;  %v408_v46 = vpop.f32.mrb[2].mxu1 }
  0xed   : > { %v423_v49 = vmax.f32 %v375_v37, 0.0  ;;  %v379_v50 = vadd.f32 %v378_v44, %v807_v21  ;;  %v380_v51 = vpop.f32.mrb[3].mxu0  ;;  %v435_v52 = vmax.f32 %v405_v39, 0.0  ;;  %v409_v53 = vadd.f32 %v408_v46, %v807_v21  ;;  %v410_v54 = vpop.f32.mrb[3].mxu1 }
  0xee   : > { %v424_v55 = vmax.f32 %v377_v43, 0.0  ;;  %v381_v56 = vadd.f32 %v380_v51, %v814_v26  ;;  %v436_v57 = vmax.f32 %v407_v45, 0.0  ;;  %v411_v58 = vadd.f32 %v410_v54, %v814_v26 }
  0xef   : > { %v473_v60 = vmul.f32 %v453_v25, %v423_v49  ;;  %v425_v61 = vmax.f32 %v379_v50, 0.0  ;;  %v485_v62 = vmul.f32 %v465_v33, %v435_v52  ;;  %v437_v63 = vmax.f32 %v409_v53, 0.0  ;;  %v447_v53 = vld [vmem:[%s800_s16 + $0x20] sm:$0xff] }
  0xf0   : > { %v474_v0 = vmul.f32 %v454_v27, %v424_v55  ;;  %v426_v1 = vmax.f32 %v381_v56, 0.0  ;;  %v486_v2 = vmul.f32 %v466_v34, %v436_v57  ;;  %v438_v3 = vmax.f32 %v411_v58, 0.0 }
  0xf1   : > { %v475_v6 = vmul.f32 %v455_v28, %v425_v61  ;;  %v487_v7 = vmul.f32 %v467_v35, %v437_v63  ;;  %v461_v61 = vunpack.c.l.bf16 %v447_v53 }
  0xf2   : > { %v678_v10 = vpack.c.bf16 %v474_v0, %v473_v60  ;;  %v476_v11 = vmul.f32 %v456_v29, %v426_v1  ;;  %v684_v12 = vpack.c.bf16 %v486_v2, %v485_v62  ;;  %v384_v13 = vpop.f32.mrb[4].mxu0  ;;  %v488_v14 = vmul.f32 %v468_v41, %v438_v3  ;;  %v414_v15 = vpop.f32.mrb[4].mxu1 }
  0xf3   : > { %v385_v16 = vadd.f32 %v384_v13, %v807_v21  ;;  %v386_v17 = vpop.f32.mrb[5].mxu0  ;;  %v415_v18 = vadd.f32 %v414_v15, %v807_v21  ;;  %v416_v19 = vpop.f32.mrb[5].mxu1  ;;  %v463_v3 = vunpack.c.l.bf16 %v448_v24 }
  0xf4   : > { %556 = vst.msk [vmem:[%s838_s22] sm:$0xff] %vm842_vm3, %v678_v10  ;;  %v679_v23 = vpack.c.bf16 %v476_v11, %v475_v6  ;;  %562 = vst.msk [vmem:[%s838_s22 + $0x30] sm:$0xff] %vm842_vm3, %v684_v12  ;;  %v685_v25 = vpack.c.bf16 %v488_v14, %v487_v7  ;;  %v387_v27 = vadd.f32 %v386_v17, %v814_v26  ;;  %v388_v28 = vpop.f32.mrb[6].mxu0  ;;  %v418_v31 = vpop.f32.mrb[6].mxu1 }
  0xf5   : > { %v417_v29 = vadd.f32 %v416_v19, %v814_v26  ;;  %v427_v32 = vmax.f32 %v385_v16, 0.0  ;;  %v389_v33 = vadd.f32 %v388_v28, %v807_v21  ;;  %v390_v34 = vpop.f32.mrb[7].mxu0  ;;  %v439_v35 = vmax.f32 %v415_v18, 0.0  ;;  %v420_v38 = vpop.f32.mrb[7].mxu1 }
  0xf6   : > { %v419_v37 = vadd.f32 %v418_v31, %v807_v21  ;;  %557 = vst.msk [vmem:[%s838_s22 + $0x8] sm:$0xff] %vm842_vm3, %v679_v23  ;;  %563 = vst.msk [vmem:[%s838_s22 + $0x38] sm:$0xff] %vm842_vm3, %v685_v25  ;;  %v428_v39 = vmax.f32 %v387_v27, 0.0  ;;  %v391_v40 = vadd.f32 %v390_v34, %v814_v26  ;;  %v421_v43 = vadd.f32 %v420_v38, %v814_v26 }
  0xf7   : > { %v440_v41 = vmax.f32 %v417_v29, 0.0  ;;  %v477_v44 = vmul.f32 %v457_v36, %v427_v32  ;;  %v429_v45 = vmax.f32 %v389_v33, 0.0  ;;  %v489_v46 = vmul.f32 %v469_v8, %v439_v35 }
  0xf8   : > { %v441_v49 = vmax.f32 %v419_v37, 0.0  ;;  %v478_v50 = vmul.f32 %v458_v42, %v428_v39  ;;  %v430_v51 = vmax.f32 %v391_v40, 0.0  ;;  %v442_v54 = vmax.f32 %v421_v43, 0.0 }
  0xf9   : > { %v490_v52 = vmul.f32 %v470_v9, %v440_v41  ;;  %v479_v55 = vmul.f32 %v459_v47, %v429_v45  ;;  %v464_v8 = vunpack.c.h.bf16 %v448_v24 }
  0xfa   : > { %v491_v56 = vmul.f32 %v471_v20, %v441_v49  ;;  %v680_v57 = vpack.c.bf16 %v478_v50, %v477_v44  ;;  %v480_v36 = vmul.f32 %v460_v48, %v430_v51  ;;  %v394_v59 = vpop.f32.mrb[8].mxu0  ;;  %v492_v60 = vmul.f32 %v472_v22, %v442_v54 }
  0xfb   : > { %v686_v58 = vpack.c.bf16 %v490_v52, %v489_v46  ;;  %v395_v42 = vadd.f32 %v394_v59, %v807_v21  ;;  %v396_v62 = vpop.f32.mrb[9].mxu0  ;;  %v462_v48 = vunpack.c.h.bf16 %v447_v53 }
  0xfc   : > { %558 = vst.msk [vmem:[%s838_s22 + $0x10] sm:$0xff] %vm842_vm3, %v680_v57  ;;  %v681_v63 = vpack.c.bf16 %v480_v36, %v479_v55  ;;  %v687_v47 = vpack.c.bf16 %v492_v60, %v491_v56  ;;  %v397_v30 = vadd.f32 %v396_v62, %v814_v26  ;;  %v398_v0 = vpop.f32.mrb[10].mxu0 }
  0xfd   : > { %564 = vst.msk [vmem:[%s838_s22 + $0x40] sm:$0xff] %vm842_vm3, %v686_v58  ;;  %v431_v1 = vmax.f32 %v395_v42, 0.0  ;;  %v399_v2 = vadd.f32 %v398_v0, %v807_v21  ;;  %v400_v4 = vpop.f32.mrb[11].mxu0 }
  0xfe   : > { %559 = vst.msk [vmem:[%s838_s22 + $0x18] sm:$0xff] %vm842_vm3, %v681_v63  ;;  %565 = vst.msk [vmem:[%s838_s22 + $0x48] sm:$0xff] %vm842_vm3, %v687_v47  ;;  %v432_v6 = vmax.f32 %v397_v30, 0.0  ;;  %v401_v7 = vadd.f32 %v400_v4, %v814_v26 }
  0xff   : > { %v481_v9 = vmul.f32 %v461_v61, %v431_v1  ;;  %v433_v10 = vmax.f32 %v399_v2, 0.0 }
 0x100   : > { %v482_v11 = vmul.f32 %v462_v48, %v432_v6  ;;  %v434_v12 = vmax.f32 %v401_v7, 0.0 }
 0x101   : > { %v483_v13 = vmul.f32 %v463_v3, %v433_v10 }
 0x102   : > { %v682_v14 = vpack.c.bf16 %v482_v11, %v481_v9  ;;  %v484_v21 = vmul.f32 %v464_v8, %v434_v12 }
 0x104   : > { %560 = vst.msk [vmem:[%s838_s22 + $0x20] sm:$0xff] %vm842_vm3, %v682_v14  ;;  %v683_v15 = vpack.c.bf16 %v484_v21, %v483_v13 }
 0x106   : > { %561 = vst.msk [vmem:[%s838_s22 + $0x28] sm:$0xff] %vm842_vm3, %v683_v15 }
 0x107 PF: > { %s14_s15 = sadd.s32 1, %s728_s15  }
 0x108   : > { %p11_p4 = scmp.ge.s32.totalorder %s14_s15, 4  }
 0x10a   :  { %13 = sbr.rel (!%p11_p4) target bundleno = 1 (0x1), region = 69 }

// kernel: _lambda_.22
= control target key start
LH: loop header
LB: loop body
LE: loop exit
PB: predicated region body
PF: predicated region fallthrough
CT: control target
= control target key end

     0   :  { %s620_s12 = smov 0   ;;  %s746_s0 = inlined_call_operand.vmem [shape: bf16[158,192], index: 0, kind: input, shape index: {}]   ;;  %s747_s1 = inlined_call_operand.vmem [shape: bf16[192,56], index: 1, kind: input, shape index: {}]   ;;  %s748_s2 = inlined_call_operand.vmem [shape: f32[1,56], index: 2, kind: input, shape index: {}]   ;;  %s749_s3 = inlined_call_operand.vmem [shape: f32[158,56], index: 3, kind: output, shape index: {}]  }
   0x1 LB: > { %s492_s13 = sadd.s32 4294967295, %s597_s12   ;;  %p496_p0 = scmp.ge.s32.totalorder %s597_s12, 1  ;;  %s597_s12 = sphi %s620_s12, %s13_s12  }
   0x2   : > { %p139_p1 = scmp.lt.s32.totalorder %s597_s12, 3 }
   0x4   : > { %p140_p2 = pnand %p496_p0, %p139_p1 }
   0x5   : > { %v564_v0 = vld [vmem:[%s747_s1] sm:$0xff] (!%p140_p2)   ;;  %v599_v1 = vmov (!%p140_p2), 0   ;;  %s164_s16 = smul.u32 (!%p140_p2), 10, %s492_s13  ;;  %v565_v2 = vld [vmem:[%s747_s1 + $0x8] sm:$0xff] (!%p140_p2)   ;;  %v566_v3 = vld [vmem:[%s747_s1 + $0x10] sm:$0xff] (!%p140_p2)   ;;  %vm336_vm0 = vcmask (!%p140_p2), 523264  }
   0x6   : > { %143 = sbr.rel (%p140_p2) target bundleno = 287 (0x11f), region = 32  ;;  %352 = vmatprep.subr.bf16.mxu0 (!%p140_p2), %v599_v1  ;;  %531 = vmatprep.subr.bf16.mxu1 (!%p140_p2), %v599_v1  ;;  %v567_v4 = vld [vmem:[%s747_s1 + $0x18] sm:$0xff] (!%p140_p2)   ;;  %v568_v6 = vld [vmem:[%s747_s1 + $0x20] sm:$0xff] (!%p140_p2)   ;;  %v569_v8 = vld [vmem:[%s747_s1 + $0x28] sm:$0xff] (!%p140_p2)   ;;  %vm425_vm1 = vcmask (!%p140_p2), 457728  }
   0x7   : > { %353 = vmatpush1.bf16.msra.mxu0 (!%p140_p2), %v564_v0  ;;  %543 = vmatpush1.bf16.msra.mxu1 (!%p140_p2), %v564_v0  ;;  %p165_p3 = scmp.lt.s32.totalorder (!%p140_p2), %s164_s16, 19  ;;  %v570_v9 = vld [vmem:[%s747_s1 + $0x30] sm:$0xff] (!%p140_p2)   ;;  %v571_v10 = vld [vmem:[%s747_s1 + $0x38] sm:$0xff] (!%p140_p2)   ;;  %v572_v11 = vld [vmem:[%s747_s1 + $0x40] sm:$0xff] (!%p140_p2)  }
   0x8   : > { %354 = vmatprep.subr.bf16.mxu0 (!%p140_p2), %v599_v1  ;;  %532 = vmatprep.subr.bf16.mxu1 (!%p140_p2), %v599_v1  ;;  %v573_v12 = vld [vmem:[%s747_s1 + $0x48] sm:$0xff] (!%p140_p2)   ;;  %v574_v13 = vld [vmem:[%s747_s1 + $0x50] sm:$0xff] (!%p140_p2)   ;;  %v575_v14 = vld [vmem:[%s747_s1 + $0x58] sm:$0xff] (!%p140_p2)  }
   0x9   : > { %v500_v23 = vld [vmem:[%s748_s2] ss:$0 sm:$0xff] (!%p140_p2) }
   0xb   : > { %355 = vmatpush1.bf16.msra.mxu0 (!%p140_p2), %v565_v2  ;;  %544 = vmatpush1.bf16.msra.mxu1 (!%p140_p2), %v565_v2 }
   0xc   : > { %356 = vmatprep.subr.bf16.mxu0 (!%p140_p2), %v599_v1  ;;  %533 = vmatprep.subr.bf16.mxu1 (!%p140_p2), %v599_v1 }
   0xd   : > { %s751_s16 = smov (!%p165_p3, %s164_s16), 19 }
   0xe   : > { %s530_s21 = sshll.u32 %s751_s16, 3 }
   0xf   : > { %357 = vmatpush1.bf16.msra.mxu0 %v566_v3  ;;  %545 = vmatpush1.bf16.msra.mxu1 %v566_v3  ;;  %s654_s26 = scalar_lea.vmem %s746_s0, %s530_s21  ;;  %s721_s23 = scalar_lea.vmem %s749_s3, %s530_s21 }
  0x10   : > { %358 = vmatprep.subr.bf16.mxu0 %v599_v1  ;;  %534 = vmatprep.subr.bf16.mxu1 %v599_v1  ;;  %v578_v5 = vld [vmem:[%s654_s26 + $0x4] ss:$8 sps:$4 sm:$0xff]   ;;  %v581_v7 = vld [vmem:[%s654_s26 + $0x34] ss:$8 sps:$4 sm:$0xff]   ;;  %v576_v15 = vld [vmem:[%s654_s26] ss:$8 sps:$4 sm:$0xff]  }
  0x11   : > { %523 = vmatprep.mubr.msk.bf16.mxu0 %vm336_vm0, %v578_v5  ;;  %526 = vmatprep.mubr.msk.bf16.mxu1 %vm336_vm0, %v581_v7  ;;  %v579_v16 = vld [vmem:[%s654_s26 + $0x30] ss:$8 sps:$4 sm:$0xff]   ;;  %v582_v17 = vld [vmem:[%s654_s26 + $0x14] ss:$8 sps:$4 sm:$0xff]   ;;  %v585_v18 = vld [vmem:[%s654_s26 + $0x44] ss:$8 sps:$4 sm:$0xff]  }
  0x12   : > { %v584_v19 = vld [vmem:[%s654_s26 + $0x10] ss:$8 sps:$4 sm:$0xff]   ;;  %v587_v20 = vld [vmem:[%s654_s26 + $0x40] ss:$8 sps:$4 sm:$0xff]   ;;  %v588_v21 = vld [vmem:[%s654_s26 + $0x24] ss:$8 sps:$4 sm:$0xff]  }
  0x13   : > { %359 = vmatpush1.bf16.msra.mxu0 %v567_v4  ;;  %546 = vmatpush1.bf16.msra.mxu1 %v567_v4  ;;  %v590_v22 = vld [vmem:[%s654_s26 + $0x20] ss:$8 sps:$4 sm:$0xff]  }
  0x14   : > { %360 = vmatprep.subr.bf16.mxu0 %v599_v1  ;;  %535 = vmatprep.subr.bf16.mxu1 %v599_v1 }
  0x17   : > { %361 = vmatpush1.bf16.msra.mxu0 %v568_v6  ;;  %547 = vmatpush1.bf16.msra.mxu1 %v568_v6 }
  0x18   : > { %362 = vmatprep.subr.bf16.mxu0 %v599_v1  ;;  %536 = vmatprep.subr.bf16.mxu1 %v599_v1 }
  0x1b   : > { %363 = vmatpush1.bf16.msra.mxu0 %v569_v8  ;;  %548 = vmatpush1.bf16.msra.mxu1 %v569_v8 }
  0x1c   : > { %364 = vmatprep.subr.bf16.mxu0 %v599_v1  ;;  %537 = vmatprep.subr.bf16.mxu1 %v599_v1 }
  0x1f   : > { %365 = vmatpush1.bf16.msra.mxu0 %v570_v9  ;;  %549 = vmatpush1.bf16.msra.mxu1 %v570_v9 }
  0x20   : > { %366 = vmatprep.subr.bf16.mxu0 %v599_v1  ;;  %538 = vmatprep.subr.bf16.mxu1 %v599_v1 }
  0x23   : > { %367 = vmatpush1.bf16.msra.mxu0 %v571_v10  ;;  %550 = vmatpush1.bf16.msra.mxu1 %v571_v10 }
  0x24   : > { %368 = vmatprep.subr.bf16.mxu0 %v599_v1  ;;  %539 = vmatprep.subr.bf16.mxu1 %v599_v1 }
  0x27   : > { %369 = vmatpush1.bf16.msra.mxu0 %v572_v11  ;;  %551 = vmatpush1.bf16.msra.mxu1 %v572_v11 }
  0x28   : > { %370 = vmatprep.subr.bf16.mxu0 %v599_v1  ;;  %540 = vmatprep.subr.bf16.mxu1 %v599_v1 }
  0x2b   : > { %371 = vmatpush1.bf16.msra.mxu0 %v573_v12  ;;  %552 = vmatpush1.bf16.msra.mxu1 %v573_v12 }
  0x2c   : > { %372 = vmatprep.subr.bf16.mxu0 %v599_v1  ;;  %541 = vmatprep.subr.bf16.mxu1 %v599_v1 }
  0x2f   : > { %373 = vmatpush1.bf16.msra.mxu0 %v574_v13  ;;  %553 = vmatpush1.bf16.msra.mxu1 %v574_v13 }
  0x30   : > { %374 = vmatprep.subr.bf16.mxu0 %v599_v1  ;;  %542 = vmatprep.subr.bf16.mxu1 %v599_v1 }
  0x33   : > { %375 = vmatpush1.bf16.msra.mxu0 %v575_v14  ;;  %554 = vmatpush1.bf16.msra.mxu1 %v575_v14 }
  0x36   : > { %385 = vmatmul.mubr.bf16.vlgmr.msra.gmra.mrb[0].mxu0 %v576_v15  ;;  %409 = vmatmul.mubr.bf16.vlgmr.msra.gmra.mrb[0].mxu1 %v579_v16 }
  0x37   : > { %524 = vmatprep.mubr.msk.bf16.mxu0 %vm336_vm0, %v582_v17  ;;  %527 = vmatprep.mubr.msk.bf16.mxu1 %vm336_vm0, %v585_v18 }
  0x3e   : > { %393 = vmatmul.mubr.bf16.gmra.mrb[4].mxu0 %v584_v19  ;;  %417 = vmatmul.mubr.bf16.gmra.mrb[4].mxu1 %v587_v20 }
  0x3f   : > { %525 = vmatprep.mubr.msk.bf16.mxu0 %vm336_vm0, %v588_v21 }
  0x46   : > { %401 = vmatmul.mubr.bf16.gmra.mrb[8].mxu0 %v590_v22 }
 0x109   : > { %v386_v24 = vpop.f32.mrb[0].mxu0  ;;  %v410_v25 = vpop.f32.mrb[0].mxu1 }
 0x10a   : > { %v387_v26 = vadd.f32 %v500_v23, %v386_v24  ;;  %v388_v27 = vpop.f32.mrb[1].mxu0  ;;  %v411_v28 = vadd.f32 %v500_v23, %v410_v25  ;;  %v412_v29 = vpop.f32.mrb[1].mxu1 }
 0x10b   : > { %v389_v30 = vpop.f32.mrb[2].mxu0  ;;  %v413_v31 = vpop.f32.mrb[2].mxu1 }
 0x10c   : > { %426 = vst.msk [vmem:[%s721_s23] sm:$0xff] %vm425_vm1, %v387_v26  ;;  %v390_v32 = vadd.f32 %v500_v23, %v389_v30  ;;  %v391_v33 = vpop.f32.mrb[3].mxu0  ;;  %432 = vst.msk [vmem:[%s721_s23 + $0x30] sm:$0xff] %vm425_vm1, %v411_v28  ;;  %v414_v34 = vadd.f32 %v500_v23, %v413_v31  ;;  %v415_v35 = vpop.f32.mrb[3].mxu1 }
 0x10e   : > { %427 = vst.msk [vmem:[%s721_s23 + $0x8] sm:$0xff] %vm425_vm1, %v390_v32  ;;  %433 = vst.msk [vmem:[%s721_s23 + $0x38] sm:$0xff] %vm425_vm1, %v414_v34 }
 0x111   : > { %v394_v36 = vpop.f32.mrb[4].mxu0  ;;  %v418_v37 = vpop.f32.mrb[4].mxu1 }
 0x112   : > { %v395_v38 = vadd.f32 %v500_v23, %v394_v36  ;;  %v396_v39 = vpop.f32.mrb[5].mxu0  ;;  %v419_v40 = vadd.f32 %v500_v23, %v418_v37  ;;  %v420_v41 = vpop.f32.mrb[5].mxu1 }
 0x113   : > { %v397_v42 = vpop.f32.mrb[6].mxu0  ;;  %v421_v43 = vpop.f32.mrb[6].mxu1 }
 0x114   : > { %428 = vst.msk [vmem:[%s721_s23 + $0x10] sm:$0xff] %vm425_vm1, %v395_v38  ;;  %v398_v44 = vadd.f32 %v500_v23, %v397_v42  ;;  %v399_v45 = vpop.f32.mrb[7].mxu0  ;;  %434 = vst.msk [vmem:[%s721_s23 + $0x40] sm:$0xff] %vm425_vm1, %v419_v40  ;;  %v422_v46 = vadd.f32 %v500_v23, %v421_v43  ;;  %v423_v47 = vpop.f32.mrb[7].mxu1 }
 0x116   : > { %429 = vst.msk [vmem:[%s721_s23 + $0x18] sm:$0xff] %vm425_vm1, %v398_v44  ;;  %435 = vst.msk [vmem:[%s721_s23 + $0x48] sm:$0xff] %vm425_vm1, %v422_v46 }
 0x119   : > { %v402_v48 = vpop.f32.mrb[8].mxu0 }
 0x11a   : > { %v403_v49 = vadd.f32 %v500_v23, %v402_v48  ;;  %v404_v50 = vpop.f32.mrb[9].mxu0 }
 0x11b   : > { %v405_v51 = vpop.f32.mrb[10].mxu0 }
 0x11c   : > { %430 = vst.msk [vmem:[%s721_s23 + $0x20] sm:$0xff] %vm425_vm1, %v403_v49  ;;  %v406_v52 = vadd.f32 %v500_v23, %v405_v51  ;;  %v407_v53 = vpop.f32.mrb[11].mxu0 }
 0x11e   : > { %431 = vst.msk [vmem:[%s721_s23 + $0x28] sm:$0xff] %vm425_vm1, %v406_v52 }
 0x11f PF: > { %s13_s12 = sadd.s32 1, %s597_s12  }
 0x120   : > { %p10_p4 = scmp.ge.s32.totalorder %s13_s12, 4  }
 0x122   :  { %12 = sbr.rel (!%p10_p4) target bundleno = 1 (0x1), region = 62 }

// kernel: squeeze.19
= control target key start
LH: loop header
LB: loop body
LE: loop exit
PB: predicated region body
PF: predicated region fallthrough
CT: control target
= control target key end

     0   :  { %s27_s6 = smov 3  ;;  %s30_s7 = smov 12  ;;  %vm32_vm0 = vcmask 1043458   ;;  %vm5_vm1 = vcmask 1041409   ;;  %vm9_vm2 = vcmask 1042434   ;;  %vm11_vm3 = vcmask 31744   ;;  %s1037_s0 = inlined_call_operand.vmem [shape: f32[2,79,1,4], index: 0, kind: input, shape index: {}]   ;;  %s1038_s1 = inlined_call_operand.vmem [shape: f32[2,316], index: 1, kind: output, shape index: {}]  }
   0x1   :  { %v581_v0 = vld [vmem:[%s1037_s0 + $0x1f] ss:$80 sm:%s27_s6]   ;;  %s55_s12 = smov 3  ;;  %s58_s15 = smov 12  ;;  %v2_v4 = vld [vmem:[%s1037_s0] sm:$0x1]  }
   0x2   :  { %v582_v1 = vld [vmem:[%s1037_s0 - $0x61] ss:$80 sm:%s30_s7]   ;;  %v585_v3 = vld [vmem:[%s1037_s0 + $0x1d] ss:$80 sm:%s55_s12]   ;;  %s690_s18 = smov 124   ;;  %s41_s21 = smov 3 }
   0x3   :  { %v33_v2 = vsel %vm32_vm0, %v582_v1, %v581_v0  ;;  %v586_v5 = vld [vmem:[%s1037_s0 - $0x63] ss:$80 sm:%s58_s15]   ;;  %s44_s22 = smov 12  ;;  %v576_v6 = vld [vmem:[%s1037_s0 + $0x1f] sm:$0x2]   ;;  %s69_s29 = smov 3 }
   0x4   :  { %34 = vrot.lane.b32.xlu0 %v33_v2, %s690_s18  ;;  %v61_v7 = vsel %vm32_vm0, %v586_v5, %v585_v3  ;;  %v583_v8 = vld [vmem:[%s1037_s0 + $0x1e] ss:$80 sm:%s41_s21]   ;;  %v6_v10 = vsel %vm5_vm1, %v576_v6, %v2_v4  ;;  %s691_s30 = smov 116   ;;  %s72_s4 = smov 12  ;;  %v577_v13 = vld [vmem:[%s1037_s0 + $0x3e] sm:$0x4]  }
   0x5   :  { %v584_v9 = vld [vmem:[%s1037_s0 - $0x62] ss:$80 sm:%s44_s22]   ;;  %62 = vrot.lane.b32.xlu1 %v61_v7, %s691_s30  ;;  %s83_s9 = smov 3  ;;  %s86_s10 = smov 12  ;;  %v10_v17 = vsel %vm9_vm2, %v577_v13, %v6_v10  ;;  %v578_v18 = vld [vmem:[%s1037_s0 + $0x50] sm:$0x1]  }
   0x6   :  { %v47_v11 = vsel %vm32_vm0, %v584_v9, %v583_v8  ;;  %v587_v12 = vld [vmem:[%s1037_s0 + $0x1c] ss:$80 sm:%s69_s29]   ;;  %s692_s11 = smov 120   ;;  %v589_v16 = vld [vmem:[%s1037_s0 + $0x1b] ss:$80 sm:%s83_s9]   ;;  %s97_s14 = smov 3 }
   0x7   :  { %v588_v14 = vld [vmem:[%s1037_s0 - $0x64] ss:$80 sm:%s72_s4]   ;;  %v590_v19 = vld [vmem:[%s1037_s0 - $0x65] ss:$80 sm:%s86_s10]   ;;  %s100_s21 = smov 12  ;;  %s693_s22 = smov 112  }
   0x8   :  { %48 = vrot.lane.b32.xlu0 %v47_v11, %s692_s11  ;;  %v75_v15 = vsel %vm32_vm0, %v588_v14, %v587_v12  ;;  %v591_v20 = vld [vmem:[%s1037_s0 + $0x1a] ss:$80 sm:%s97_s14]   ;;  %12 = vst.msk [vmem:[#allocation0] ss:$8 sm:$0x7] %vm11_vm3, %v10_v17   ;;  %v89_v21 = vsel %vm32_vm0, %v590_v19, %v589_v16  ;;  %s111_s25 = smov 3 }
   0x9   :  { %76 = vrot.lane.b32.xlu1 %v75_v15, %s693_s22  ;;  %v592_v22 = vld [vmem:[%s1037_s0 - $0x66] ss:$80 sm:%s100_s21]   ;;  %s114_s26 = smov 12  ;;  %v579_v23 = vld [vmem:[%s1037_s0 + $0x6f] sm:$0x2]   ;;  %s125_s4 = smov 3 }
   0xa   :  { %v103_v24 = vsel %vm32_vm0, %v592_v22, %v591_v20  ;;  %v593_v25 = vld [vmem:[%s1037_s0 + $0x19] ss:$80 sm:%s111_s25]   ;;  %v18_v27 = vsel %vm5_vm1, %v579_v23, %v578_v18  ;;  %s694_s5 = smov 108   ;;  %v595_v28 = vld [vmem:[%s1037_s0 + $0x18] ss:$80 sm:%s125_s4]   ;;  %s128_s8 = smov 12 }
   0xb   :  { %v594_v26 = vld [vmem:[%s1037_s0 - $0x67] ss:$80 sm:%s114_s26]   ;;  %v580_v29 = vld [vmem:[%s1037_s0 + $0x8e] sm:$0x4]   ;;  %s139_s13 = smov 3  ;;  %s142_s14 = smov 12 }
   0xc   :  { %90 = vrot.lane.b32.xlu0 %v89_v21, %s694_s5  ;;  %v117_v30 = vsel %vm32_vm0, %v594_v26, %v593_v25  ;;  %v596_v31 = vld [vmem:[%s1037_s0 - $0x68] ss:$80 sm:%s128_s8]   ;;  %v22_v32 = vsel %vm9_vm2, %v580_v29, %v18_v27  ;;  %s695_s15 = smov 104   ;;  %s153_s18 = smov 3  ;;  %vm275_vm4 = vcmask 1045508   ;;  %vm36_vm5 = vcmask 1048544  }
   0xd   :  { %104 = vrot.lane.b32.xlu1 %v103_v24, %s695_s15  ;;  %v597_v33 = vld [vmem:[%s1037_s0 + $0x17] ss:$80 sm:%s139_s13]   ;;  %25 = vst.msk [vmem:[#allocation0 + $0x1] ss:$8 sm:$0x7] %vm11_vm3, %v22_v32   ;;  %v131_v34 = vsel %vm32_vm0, %v596_v31, %v595_v28  ;;  %s156_s23 = smov 12 }
   0xe   :  { %v598_v35 = vld [vmem:[%s1037_s0 - $0x69] ss:$80 sm:%s142_s14]   ;;  %v599_v36 = vld [vmem:[%s1037_s0 + $0x16] ss:$80 sm:%s153_s18]   ;;  %s696_s24 = smov 100   ;;  %s167_s27 = smov 3 }
   0xf   :  { %v600_v37 = vld [vmem:[%s1037_s0 - $0x6a] ss:$80 sm:%s156_s23]   ;;  %s170_s28 = smov 12  ;;  %v145_v38 = vsel %vm32_vm0, %v598_v35, %v597_v33  ;;  %v601_v39 = vld [vmem:[%s1037_s0 + $0x15] ss:$80 sm:%s167_s27]   ;;  %s181_s2 = smov 3 }
  0x10   :  { %118 = vrot.lane.b32.xlu0 %v117_v30, %s696_s24  ;;  %s697_s3 = smov 96   ;;  %v602_v40 = vld [vmem:[%s1037_s0 - $0x6b] ss:$80 sm:%s170_s28]   ;;  %s184_s6 = smov 12  ;;  %v159_v41 = vsel %vm32_vm0, %v600_v37, %v599_v36  ;;  %vm50_vm6 = vcmask 1015744   ;;  %vm64_vm7 = vcmask 982944  }
  0x11   :  { %132 = vrot.lane.b32.xlu1 %v131_v34, %s697_s3  ;;  %v603_v42 = vld [vmem:[%s1037_s0 + $0x14] ss:$80 sm:%s181_s2]   ;;  %s195_s9 = smov 3  ;;  %s198_s10 = smov 12  ;;  %v173_v44 = vsel %vm32_vm0, %v602_v40, %v601_v39  ;;  %vm78_vm8 = vcmask 950144   ;;  %vm92_vm9 = vcmask 917344  }
  0x12   :  { %s698_s11 = smov 92   ;;  %v604_v43 = vld [vmem:[%s1037_s0 - $0x6c] ss:$80 sm:%s184_s6]   ;;  %s209_s14 = smov 3  ;;  %v605_v45 = vld [vmem:[%s1037_s0 + $0x13] ss:$80 sm:%s195_s9]  }
  0x13   :  { %s212_s17 = smov 12  ;;  %s699_s18 = smov 88   ;;  %v606_v46 = vld [vmem:[%s1037_s0 - $0x6d] ss:$80 sm:%s198_s10]   ;;  %v187_v47 = vsel %vm32_vm0, %v604_v43, %v603_v42  ;;  %v607_v48 = vld [vmem:[%s1037_s0 + $0x12] ss:$80 sm:%s209_s14]  }
  0x14   :  { %146 = vrot.lane.b32.xlu0 %v145_v38, %s698_s11  ;;  %s223_s21 = smov 3  ;;  %s226_s24 = smov 12  ;;  %v608_v49 = vld [vmem:[%s1037_s0 - $0x6e] ss:$80 sm:%s212_s17]   ;;  %v201_v50 = vsel %vm32_vm0, %v606_v46, %v605_v45  ;;  %vm106_vm10 = vcmask 884544   ;;  %vm120_vm11 = vcmask 851744  }
  0x15   :  { %160 = vrot.lane.b32.xlu1 %v159_v41, %s699_s18  ;;  %s700_s25 = smov 84   ;;  %s237_s28 = smov 3  ;;  %v609_v51 = vld [vmem:[%s1037_s0 + $0x11] ss:$80 sm:%s223_s21]   ;;  %v215_v53 = vsel %vm32_vm0, %v608_v49, %v607_v48  ;;  %vm134_vm12 = vcmask 818944   ;;  %vm148_vm13 = vcmask 786144  }
  0x16   :  { %s240_s29 = smov 12  ;;  %s251_s3 = smov 3  ;;  %v610_v52 = vld [vmem:[%s1037_s0 - $0x6f] ss:$80 sm:%s226_s24]   ;;  %v611_v54 = vld [vmem:[%s1037_s0 + $0x10] ss:$80 sm:%s237_s28]  }
  0x17   :  { %s701_s4 = smov 80   ;;  %s265_s7 = smov 3  ;;  %v612_v55 = vld [vmem:[%s1037_s0 - $0x70] ss:$80 sm:%s240_s29]   ;;  %v613_v56 = vld [vmem:[%s1037_s0 + $0xf] ss:$80 sm:%s251_s3]   ;;  %v229_v57 = vsel %vm32_vm0, %v610_v52, %v609_v51 }
  0x18   :  { %174 = vrot.lane.b32.xlu0 %v173_v44, %s700_s25  ;;  %s254_s12 = smov 12  ;;  %s268_s13 = smov 12  ;;  %v615_v58 = vld [vmem:[%s1037_s0 + $0xe] ss:$80 sm:%s265_s7]   ;;  %v243_v61 = vsel %vm32_vm0, %v612_v55, %v611_v54  ;;  %vm162_vm14 = vcmask 753344   ;;  %vm176_vm15 = vcmask 720544  }
  0x19   :  { %188 = vrot.lane.b32.xlu1 %v187_v47, %s701_s4  ;;  %s702_s14 = smov 76   ;;  %s286_s17 = smov 3  ;;  %v616_v59 = vld [vmem:[%s1037_s0 - $0x72] ss:$80 sm:%s268_s13]   ;;  %vm204_vm1 = vcmask 654944   ;;  %vm218_vm2 = vcmask 622144  }
  0x1a   :  { %s273_s22 = smov 48  ;;  %s289_s23 = smov 12  ;;  %v614_v60 = vld [vmem:[%s1037_s0 - $0x71] ss:$80 sm:%s254_s12]   ;;  %v618_v62 = vld [vmem:[%s1037_s0 + $0xd] ss:$80 sm:%s286_s17]   ;;  %v271_v0 = vsel %vm32_vm0, %v616_v59, %v615_v58 }
  0x1b   :  { %s703_s24 = smov 72   ;;  %s307_s27 = smov 3  ;;  %v619_v63 = vld [vmem:[%s1037_s0 - $0x73] ss:$80 sm:%s289_s23]   ;;  %v617_v1 = vld [vmem:[%s1037_s0 - $0xf2] ss:$80 sm:%s273_s22]   ;;  %v257_v2 = vsel %vm32_vm0, %v614_v60, %v613_v56 }
  0x1c   :  { %202 = vrot.lane.b32.xlu0 %v201_v50, %s702_s14  ;;  %s294_s3 = smov 48  ;;  %s310_s4 = smov 12  ;;  %v621_v3 = vld [vmem:[%s1037_s0 + $0xc] ss:$80 sm:%s307_s27]   ;;  %v292_v5 = vsel %vm32_vm0, %v619_v63, %v618_v62  ;;  %v276_v7 = vsel %vm275_vm4, %v617_v1, %v271_v0  ;;  %vm232_vm3 = vcmask 589344  }
  0x1d   :  { %216 = vrot.lane.b32.xlu1 %v215_v53, %s703_s24  ;;  %s704_s5 = smov 68   ;;  %s328_s8 = smov 3  ;;  %v622_v4 = vld [vmem:[%s1037_s0 - $0x74] ss:$80 sm:%s310_s4]  }
  0x1e   :  { %s315_s13 = smov 48  ;;  %s331_s14 = smov 12  ;;  %v620_v6 = vld [vmem:[%s1037_s0 - $0xf3] ss:$80 sm:%s294_s3]   ;;  %v624_v8 = vld [vmem:[%s1037_s0 + $0xb] ss:$80 sm:%s328_s8]   ;;  %v313_v10 = vsel %vm32_vm0, %v622_v4, %v621_v3 }
  0x1f   :  { %s705_s15 = smov 64   ;;  %s349_s18 = smov 3  ;;  %v625_v9 = vld [vmem:[%s1037_s0 - $0x75] ss:$80 sm:%s331_s14]   ;;  %v623_v11 = vld [vmem:[%s1037_s0 - $0xf4] ss:$80 sm:%s315_s13]   ;;  %v297_v12 = vsel %vm275_vm4, %v620_v6, %v292_v5 }
  0x20   :  { %230 = vrot.lane.b32.xlu0 %v229_v57, %s704_s5  ;;  %s336_s23 = smov 48  ;;  %s352_s24 = smov 12  ;;  %v627_v13 = vld [vmem:[%s1037_s0 + $0xa] ss:$80 sm:%s349_s18]   ;;  %v334_v15 = vsel %vm32_vm0, %v625_v9, %v624_v8  ;;  %v318_v17 = vsel %vm275_vm4, %v623_v11, %v313_v10 }
  0x21   :  { %244 = vrot.lane.b32.xlu1 %v243_v61, %s705_s15  ;;  %s706_s25 = smov 60   ;;  %s370_s28 = smov 3  ;;  %v628_v14 = vld [vmem:[%s1037_s0 - $0x76] ss:$80 sm:%s352_s24]  }
  0x22   :  { %s357_s4 = smov 48  ;;  %s373_s5 = smov 12  ;;  %v626_v16 = vld [vmem:[%s1037_s0 - $0xf5] ss:$80 sm:%s336_s23]   ;;  %v630_v18 = vld [vmem:[%s1037_s0 + $0x9] ss:$80 sm:%s370_s28]   ;;  %v355_v20 = vsel %vm32_vm0, %v628_v14, %v627_v13 }
  0x23   :  { %s707_s6 = smov 56   ;;  %s391_s9 = smov 3  ;;  %v631_v19 = vld [vmem:[%s1037_s0 - $0x77] ss:$80 sm:%s373_s5]   ;;  %v629_v21 = vld [vmem:[%s1037_s0 - $0xf6] ss:$80 sm:%s357_s4]   ;;  %v339_v22 = vsel %vm275_vm4, %v626_v16, %v334_v15 }
  0x24   :  { %258 = vrot.lane.b32.xlu0 %v257_v2, %s706_s25  ;;  %s378_s14 = smov 48  ;;  %s394_s15 = smov 12  ;;  %v633_v23 = vld [vmem:[%s1037_s0 + $0x8] ss:$80 sm:%s391_s9]   ;;  %v376_v25 = vsel %vm32_vm0, %v631_v19, %v630_v18  ;;  %v360_v27 = vsel %vm275_vm4, %v629_v21, %v355_v20 }
  0x25   :  { %277 = vrot.lane.b32.xlu1 %v276_v7, %s707_s6  ;;  %s708_s16 = smov 52   ;;  %s412_s19 = smov 3  ;;  %v634_v24 = vld [vmem:[%s1037_s0 - $0x78] ss:$80 sm:%s394_s15]  }
  0x26   :  { %s399_s24 = smov 48  ;;  %s415_s25 = smov 12  ;;  %v632_v26 = vld [vmem:[%s1037_s0 - $0xf7] ss:$80 sm:%s378_s14]   ;;  %v636_v28 = vld [vmem:[%s1037_s0 + $0x7] ss:$80 sm:%s412_s19]   ;;  %v397_v30 = vsel %vm32_vm0, %v634_v24, %v633_v23 }
  0x27   :  { %s709_s26 = smov 48   ;;  %s433_s29 = smov 3  ;;  %v637_v29 = vld [vmem:[%s1037_s0 - $0x79] ss:$80 sm:%s415_s25]   ;;  %v635_v31 = vld [vmem:[%s1037_s0 - $0xf8] ss:$80 sm:%s399_s24]   ;;  %v381_v32 = vsel %vm275_vm4, %v632_v26, %v376_v25 }
  0x28   :  { %298 = vrot.lane.b32.xlu0 %v297_v12, %s708_s16  ;;  %s420_s5 = smov 48  ;;  %s436_s6 = smov 12  ;;  %v639_v33 = vld [vmem:[%s1037_s0 + $0x6] ss:$80 sm:%s433_s29]   ;;  %v418_v35 = vsel %vm32_vm0, %v637_v29, %v636_v28  ;;  %v402_v37 = vsel %vm275_vm4, %v635_v31, %v397_v30 }
  0x29   :  { %319 = vrot.lane.b32.xlu1 %v318_v17, %s709_s26  ;;  %s710_s7 = smov 44   ;;  %s454_s10 = smov 3  ;;  %v640_v34 = vld [vmem:[%s1037_s0 - $0x7a] ss:$80 sm:%s436_s6]  }
  0x2a   :  { %s441_s15 = smov 48  ;;  %s457_s16 = smov 12  ;;  %v638_v36 = vld [vmem:[%s1037_s0 - $0xf9] ss:$80 sm:%s420_s5]   ;;  %v642_v38 = vld [vmem:[%s1037_s0 + $0x5] ss:$80 sm:%s454_s10]   ;;  %v439_v40 = vsel %vm32_vm0, %v640_v34, %v639_v33 }
  0x2b   :  { %s711_s17 = smov 40   ;;  %s475_s20 = smov 3  ;;  %v643_v39 = vld [vmem:[%s1037_s0 - $0x7b] ss:$80 sm:%s457_s16]   ;;  %v641_v41 = vld [vmem:[%s1037_s0 - $0xfa] ss:$80 sm:%s441_s15]   ;;  %v423_v42 = vsel %vm275_vm4, %v638_v36, %v418_v35 }
  0x2c   :  { %340 = vrot.lane.b32.xlu0 %v339_v22, %s710_s7  ;;  %s462_s25 = smov 48  ;;  %s478_s26 = smov 12  ;;  %v645_v43 = vld [vmem:[%s1037_s0 + $0x4] ss:$80 sm:%s475_s20]   ;;  %v460_v45 = vsel %vm32_vm0, %v643_v39, %v642_v38  ;;  %v444_v47 = vsel %vm275_vm4, %v641_v41, %v439_v40 }
  0x2d   :  { %361 = vrot.lane.b32.xlu1 %v360_v27, %s711_s17  ;;  %s712_s27 = smov 36   ;;  %s496_s30 = smov 3  ;;  %v646_v44 = vld [vmem:[%s1037_s0 - $0x7c] ss:$80 sm:%s478_s26]  }
  0x2e   :  { %s483_s6 = smov 48  ;;  %s499_s7 = smov 12  ;;  %v644_v46 = vld [vmem:[%s1037_s0 - $0xfb] ss:$80 sm:%s462_s25]   ;;  %v648_v48 = vld [vmem:[%s1037_s0 + $0x3] ss:$80 sm:%s496_s30]   ;;  %v481_v50 = vsel %vm32_vm0, %v646_v44, %v645_v43 }
  0x2f   :  { %s713_s8 = smov 32   ;;  %s517_s11 = smov 3  ;;  %v649_v49 = vld [vmem:[%s1037_s0 - $0x7d] ss:$80 sm:%s499_s7]   ;;  %v647_v51 = vld [vmem:[%s1037_s0 - $0xfc] ss:$80 sm:%s483_s6]   ;;  %v465_v52 = vsel %vm275_vm4, %v644_v46, %v460_v45 }
  0x30   :  { %382 = vrot.lane.b32.xlu0 %v381_v32, %s712_s27  ;;  %s504_s16 = smov 48  ;;  %s520_s17 = smov 12  ;;  %v651_v53 = vld [vmem:[%s1037_s0 + $0x2] ss:$80 sm:%s517_s11]   ;;  %v502_v55 = vsel %vm32_vm0, %v649_v49, %v648_v48  ;;  %v486_v57 = vsel %vm275_vm4, %v647_v51, %v481_v50 }
  0x31   :  { %403 = vrot.lane.b32.xlu1 %v402_v37, %s713_s8  ;;  %s714_s18 = smov 28   ;;  %s538_s21 = smov 3  ;;  %v652_v54 = vld [vmem:[%s1037_s0 - $0x7e] ss:$80 sm:%s520_s17]  }
  0x32   :  { %s525_s26 = smov 48  ;;  %s541_s27 = smov 12  ;;  %v650_v56 = vld [vmem:[%s1037_s0 - $0xfd] ss:$80 sm:%s504_s16]   ;;  %v654_v58 = vld [vmem:[%s1037_s0 + $0x1] ss:$80 sm:%s538_s21]   ;;  %v523_v60 = vsel %vm32_vm0, %v652_v54, %v651_v53 }
  0x33   :  { %s715_s28 = smov 24   ;;  %v655_v59 = vld [vmem:[%s1037_s0 - $0x7f] ss:$80 sm:%s541_s27]   ;;  %s546_s6 = smov 48  ;;  %v653_v61 = vld [vmem:[%s1037_s0 - $0xfe] ss:$80 sm:%s525_s26]   ;;  %v507_v62 = vsel %vm275_vm4, %v650_v56, %v502_v55 }
  0x34   :  { %424 = vrot.lane.b32.xlu0 %v423_v42, %s714_s18  ;;  %s716_s7 = smov 20   ;;  %s717_s10 = smov 16   ;;  %v544_v63 = vsel %vm32_vm0, %v655_v59, %v654_v58  ;;  %v656_v0 = vld [vmem:[%s1037_s0 - $0xff] ss:$80 sm:%s546_s6]   ;;  %v528_v1 = vsel %vm275_vm4, %v653_v61, %v523_v60  ;;  %vm190_vm0 = vcmask 687744  }
  0x35   :  { %445 = vrot.lane.b32.xlu1 %v444_v47, %s715_s28  ;;  %s718_s0 = smov 12   ;;  %v549_v2 = vsel %vm275_vm4, %v656_v0, %v544_v63  ;;  %s719_s13 = smov 8   ;;  %vm246_vm4 = vcmask 556544  }
  0x36   :  { %s720_s14 = smov 4  }
  0x38   :  { %466 = vrot.lane.b32.xlu0 %v465_v52, %s716_s7 }
  0x39   :  { %487 = vrot.lane.b32.xlu1 %v486_v57, %s717_s10 }
  0x3c   :  { %508 = vrot.lane.b32.xlu0 %v507_v62, %s718_s0 }
  0x3d   :  { %529 = vrot.lane.b32.xlu1 %v528_v1, %s719_s13 }
  0x40   :  { %550 = vrot.lane.b32.xlu0 %v549_v2, %s720_s14 }
  0x76   :  { %v35_v3 = vpop.permute.xlu0 %34  }
  0x77   :  { %37 = vst.msk [vmem:[#allocation0] sm:$0x3] %vm36_vm5, %v35_v3   ;;  %39 = vst.msk [vmem:[#allocation0 + $0x6] sm:$0xc] %vm36_vm5, %v35_v3   ;;  %v63_v4 = vpop.permute.xlu1 %62   ;;  %vm260_vm5 = vcmask 523744  }
  0x7a   :  { %v49_v5 = vpop.permute.xlu0 %48  }
  0x7b   :  { %51 = vst.msk [vmem:[#allocation0] sm:$0x3] %vm50_vm6, %v49_v5   ;;  %53 = vst.msk [vmem:[#allocation0 + $0x6] sm:$0xc] %vm50_vm6, %v49_v5   ;;  %v77_v6 = vpop.permute.xlu1 %76   ;;  %vm279_vm6 = vcmask 490944  }
  0x7c   :  { %65 = vst.msk [vmem:[#allocation0] sm:$0x3] %vm64_vm7, %v63_v4   ;;  %67 = vst.msk [vmem:[#allocation0 + $0x6] sm:$0xc] %vm64_vm7, %v63_v4   ;;  %vm300_vm7 = vcmask 458144  }
  0x7d   :  { %79 = vst.msk [vmem:[#allocation0] sm:$0x3] %vm78_vm8, %v77_v6   ;;  %81 = vst.msk [vmem:[#allocation0 + $0x6] sm:$0xc] %vm78_vm8, %v77_v6   ;;  %vm321_vm8 = vcmask 425344  }
  0x7e   :  { %v91_v7 = vpop.permute.xlu0 %90  }
  0x7f   :  { %93 = vst.msk [vmem:[#allocation0] sm:$0x3] %vm92_vm9, %v91_v7   ;;  %95 = vst.msk [vmem:[#allocation0 + $0x6] sm:$0xc] %vm92_vm9, %v91_v7   ;;  %v105_v8 = vpop.permute.xlu1 %104   ;;  %vm342_vm9 = vcmask 392544  }
  0x80   :  { %107 = vst.msk [vmem:[#allocation0] sm:$0x3] %vm106_vm10, %v105_v8   ;;  %109 = vst.msk [vmem:[#allocation0 + $0x6] sm:$0xc] %vm106_vm10, %v105_v8   ;;  %vm363_vm10 = vcmask 359744  }
  0x82   :  { %v119_v9 = vpop.permute.xlu0 %118  }
  0x83   :  { %121 = vst.msk [vmem:[#allocation0] sm:$0x3] %vm120_vm11, %v119_v9   ;;  %123 = vst.msk [vmem:[#allocation0 + $0x6] sm:$0xc] %vm120_vm11, %v119_v9   ;;  %v133_v10 = vpop.permute.xlu1 %132   ;;  %vm384_vm11 = vcmask 326944  }
  0x84   :  { %135 = vst.msk [vmem:[#allocation0] sm:$0x3] %vm134_vm12, %v133_v10   ;;  %137 = vst.msk [vmem:[#allocation0 + $0x6] sm:$0xc] %vm134_vm12, %v133_v10   ;;  %vm405_vm12 = vcmask 294144  }
  0x86   :  { %v147_v11 = vpop.permute.xlu0 %146  }
  0x87   :  { %149 = vst.msk [vmem:[#allocation0] sm:$0x3] %vm148_vm13, %v147_v11   ;;  %151 = vst.msk [vmem:[#allocation0 + $0x6] sm:$0xc] %vm148_vm13, %v147_v11   ;;  %v161_v12 = vpop.permute.xlu1 %160   ;;  %vm426_vm13 = vcmask 261344  }
  0x88   :  { %163 = vst.msk [vmem:[#allocation0] sm:$0x3] %vm162_vm14, %v161_v12   ;;  %165 = vst.msk [vmem:[#allocation0 + $0x6] sm:$0xc] %vm162_vm14, %v161_v12   ;;  %vm447_vm14 = vcmask 228544  }
  0x8a   :  { %v175_v13 = vpop.permute.xlu0 %174  }
  0x8b   :  { %177 = vst.msk [vmem:[#allocation0] sm:$0x3] %vm176_vm15, %v175_v13   ;;  %179 = vst.msk [vmem:[#allocation0 + $0x6] sm:$0xc] %vm176_vm15, %v175_v13   ;;  %v189_v14 = vpop.permute.xlu1 %188   ;;  %vm468_vm15 = vcmask 195744  }
  0x8c   :  { %191 = vst.msk [vmem:[#allocation0] sm:$0x3] %vm190_vm0, %v189_v14   ;;  %193 = vst.msk [vmem:[#allocation0 + $0x6] sm:$0xc] %vm190_vm0, %v189_v14   ;;  %vm489_vm0 = vcmask 162944  }
  0x8e   :  { %v203_v15 = vpop.permute.xlu0 %202  }
  0x8f   :  { %205 = vst.msk [vmem:[#allocation0] sm:$0x3] %vm204_vm1, %v203_v15   ;;  %207 = vst.msk [vmem:[#allocation0 + $0x6] sm:$0xc] %vm204_vm1, %v203_v15   ;;  %v217_v16 = vpop.permute.xlu1 %216   ;;  %vm510_vm1 = vcmask 130144  }
  0x90   :  { %219 = vst.msk [vmem:[#allocation0] sm:$0x3] %vm218_vm2, %v217_v16   ;;  %221 = vst.msk [vmem:[#allocation0 + $0x6] sm:$0xc] %vm218_vm2, %v217_v16   ;;  %vm531_vm2 = vcmask 97344  }
  0x92   :  { %v231_v17 = vpop.permute.xlu0 %230  }
  0x93   :  { %233 = vst.msk [vmem:[#allocation0] sm:$0x3] %vm232_vm3, %v231_v17   ;;  %235 = vst.msk [vmem:[#allocation0 + $0x6] sm:$0xc] %vm232_vm3, %v231_v17   ;;  %v245_v18 = vpop.permute.xlu1 %244   ;;  %vm552_vm3 = vcmask 64544  }
  0x94   :  { %247 = vst.msk [vmem:[#allocation0] sm:$0x3] %vm246_vm4, %v245_v18   ;;  %249 = vst.msk [vmem:[#allocation0 + $0x6] sm:$0xc] %vm246_vm4, %v245_v18  }
  0x96   :  { %v259_v19 = vpop.permute.xlu0 %258  }
  0x97   :  { %261 = vst.msk [vmem:[#allocation0] sm:$0x3] %vm260_vm5, %v259_v19   ;;  %263 = vst.msk [vmem:[#allocation0 + $0x6] sm:$0xc] %vm260_vm5, %v259_v19   ;;  %v278_v20 = vpop.permute.xlu1 %277  }
  0x98   :  { %280 = vst.msk [vmem:[#allocation0] sm:$0x3] %vm279_vm6, %v278_v20   ;;  %282 = vst.msk [vmem:[#allocation0 + $0x6] sm:$0xc] %vm279_vm6, %v278_v20  }
  0x99   :  { %284 = vst.msk [vmem:[#allocation0 + $0xc] sm:$0x30] %vm279_vm6, %v278_v20  }
  0x9a   :  { %v299_v21 = vpop.permute.xlu0 %298  }
  0x9b   :  { %301 = vst.msk [vmem:[#allocation0] sm:$0x3] %vm300_vm7, %v299_v21   ;;  %303 = vst.msk [vmem:[#allocation0 + $0x6] sm:$0xc] %vm300_vm7, %v299_v21   ;;  %v320_v22 = vpop.permute.xlu1 %319  }
  0x9c   :  { %305 = vst.msk [vmem:[#allocation0 + $0xc] sm:$0x30] %vm300_vm7, %v299_v21  }
  0x9d   :  { %322 = vst.msk [vmem:[#allocation0] sm:$0x3] %vm321_vm8, %v320_v22   ;;  %324 = vst.msk [vmem:[#allocation0 + $0x6] sm:$0xc] %vm321_vm8, %v320_v22  }
  0x9e   :  { %326 = vst.msk [vmem:[#allocation0 + $0xc] sm:$0x30] %vm321_vm8, %v320_v22   ;;  %v341_v23 = vpop.permute.xlu0 %340  }
  0x9f   :  { %343 = vst.msk [vmem:[#allocation0] sm:$0x3] %vm342_vm9, %v341_v23   ;;  %345 = vst.msk [vmem:[#allocation0 + $0x6] sm:$0xc] %vm342_vm9, %v341_v23   ;;  %v362_v24 = vpop.permute.xlu1 %361  }
  0xa0   :  { %347 = vst.msk [vmem:[#allocation0 + $0xc] sm:$0x30] %vm342_vm9, %v341_v23  }
  0xa1   :  { %364 = vst.msk [vmem:[#allocation0] sm:$0x3] %vm363_vm10, %v362_v24   ;;  %366 = vst.msk [vmem:[#allocation0 + $0x6] sm:$0xc] %vm363_vm10, %v362_v24  }
  0xa2   :  { %368 = vst.msk [vmem:[#allocation0 + $0xc] sm:$0x30] %vm363_vm10, %v362_v24   ;;  %v383_v25 = vpop.permute.xlu0 %382  }
  0xa3   :  { %385 = vst.msk [vmem:[#allocation0] sm:$0x3] %vm384_vm11, %v383_v25   ;;  %387 = vst.msk [vmem:[#allocation0 + $0x6] sm:$0xc] %vm384_vm11, %v383_v25   ;;  %v404_v26 = vpop.permute.xlu1 %403  }
  0xa4   :  { %389 = vst.msk [vmem:[#allocation0 + $0xc] sm:$0x30] %vm384_vm11, %v383_v25  }
  0xa5   :  { %406 = vst.msk [vmem:[#allocation0] sm:$0x3] %vm405_vm12, %v404_v26   ;;  %408 = vst.msk [vmem:[#allocation0 + $0x6] sm:$0xc] %vm405_vm12, %v404_v26  }
  0xa6   :  { %410 = vst.msk [vmem:[#allocation0 + $0xc] sm:$0x30] %vm405_vm12, %v404_v26   ;;  %v425_v27 = vpop.permute.xlu0 %424  }
  0xa7   :  { %427 = vst.msk [vmem:[#allocation0] sm:$0x3] %vm426_vm13, %v425_v27   ;;  %429 = vst.msk [vmem:[#allocation0 + $0x6] sm:$0xc] %vm426_vm13, %v425_v27   ;;  %v446_v28 = vpop.permute.xlu1 %445  }
  0xa8   :  { %431 = vst.msk [vmem:[#allocation0 + $0xc] sm:$0x30] %vm426_vm13, %v425_v27  }
  0xa9   :  { %448 = vst.msk [vmem:[#allocation0] sm:$0x3] %vm447_vm14, %v446_v28   ;;  %450 = vst.msk [vmem:[#allocation0 + $0x6] sm:$0xc] %vm447_vm14, %v446_v28  }
  0xaa   :  { %452 = vst.msk [vmem:[#allocation0 + $0xc] sm:$0x30] %vm447_vm14, %v446_v28   ;;  %v467_v29 = vpop.permute.xlu0 %466  }
  0xab   :  { %469 = vst.msk [vmem:[#allocation0] sm:$0x3] %vm468_vm15, %v467_v29   ;;  %471 = vst.msk [vmem:[#allocation0 + $0x6] sm:$0xc] %vm468_vm15, %v467_v29   ;;  %v488_v30 = vpop.permute.xlu1 %487  }
  0xac   :  { %473 = vst.msk [vmem:[#allocation0 + $0xc] sm:$0x30] %vm468_vm15, %v467_v29  }
  0xad   :  { %490 = vst.msk [vmem:[#allocation0] sm:$0x3] %vm489_vm0, %v488_v30   ;;  %492 = vst.msk [vmem:[#allocation0 + $0x6] sm:$0xc] %vm489_vm0, %v488_v30  }
  0xae   :  { %494 = vst.msk [vmem:[#allocation0 + $0xc] sm:$0x30] %vm489_vm0, %v488_v30   ;;  %v509_v31 = vpop.permute.xlu0 %508  }
  0xaf   :  { %511 = vst.msk [vmem:[#allocation0] sm:$0x3] %vm510_vm1, %v509_v31   ;;  %513 = vst.msk [vmem:[#allocation0 + $0x6] sm:$0xc] %vm510_vm1, %v509_v31   ;;  %v530_v32 = vpop.permute.xlu1 %529  }
  0xb0   :  { %515 = vst.msk [vmem:[#allocation0 + $0xc] sm:$0x30] %vm510_vm1, %v509_v31  }
  0xb1   :  { %532 = vst.msk [vmem:[#allocation0] sm:$0x3] %vm531_vm2, %v530_v32   ;;  %534 = vst.msk [vmem:[#allocation0 + $0x6] sm:$0xc] %vm531_vm2, %v530_v32  }
  0xb2   :  { %536 = vst.msk [vmem:[#allocation0 + $0xc] sm:$0x30] %vm531_vm2, %v530_v32   ;;  %v551_v33 = vpop.permute.xlu0 %550  }
  0xb3   :  { %553 = vst.msk [vmem:[#allocation0] sm:$0x3] %vm552_vm3, %v551_v33   ;;  %555 = vst.msk [vmem:[#allocation0 + $0x6] sm:$0xc] %vm552_vm3, %v551_v33  }
  0xb4   :  { %557 = vst.msk [vmem:[#allocation0 + $0xc] sm:$0x30] %vm552_vm3, %v551_v33  }
  0xba   :  { %v561_v34 = vld [vmem:[#allocation0] sm:$0x3]  ;;  %v565_v35 = vld [vmem:[#allocation0 + $0x8] sm:$0x3] }
  0xbb   :  { %v570_v36 = vld [vmem:[#allocation0 + $0x10] sm:$0x3]  ;;  %563 = vst [vmem:[%s1038_s1] sm:$0x3] %v561_v34  ;;  %657 = vst [vmem:[%s1038_s1 + $0x2] sm:$0x3] %v565_v35 }
  0xbc   :  { %658 = vst [vmem:[%s1038_s1 + $0x4] sm:$0x3] %v570_v36 }

// kernel: _lambda_.20
= control target key start
LH: loop header
LB: loop body
LE: loop exit
PB: predicated region body
PF: predicated region fallthrough
CT: control target
= control target key end

     0   :  { %s2651_s0 = inlined_call_operand.vmem [shape: s32[8], index: 0, kind: input, shape index: {}]   ;;  %s2652_s1 = inlined_call_operand.vmem [shape: bf16[2,79,64], index: 1, kind: input, shape index: {}]   ;;  %s2653_s2 = inlined_call_operand.vmem [shape: f32[8,2,1,128], index: 2, kind: input, shape index: {}]   ;;  %s2654_s3 = inlined_call_operand.vmem [shape: bf16[8,64,128], index: 3, kind: input, shape index: {}]   ;;  %s2655_s4 = inlined_call_operand.vmem [shape: f32[8,1,128], index: 4, kind: input, shape index: {}, may-alias: {4,8}]   ;;  %s2656_s5 = inlined_call_operand.vmem [shape: f32[8,1,128], index: 5, kind: input, shape index: {}, may-alias: {5,9}]   ;;  %s2657_s6 = inlined_call_operand.vmem [shape: f32[8,3,128], index: 6, kind: input, shape index: {}]   ;;  %s2658_s7 = inlined_call_operand.vmem [shape: f32[8,1,128], index: 7, kind: input, shape index: {}]   ;;  %s2659_s8 = inlined_call_operand.vmem [shape: f32[8,1,128], index: 8, kind: input, shape index: {}, may-alias: {4,8}]   ;;  %s2660_s9 = inlined_call_operand.vmem [shape: f32[8,1,128], index: 9, kind: input, shape index: {}, may-alias: {5,9}]   ;;  %s2661_s10 = inlined_call_operand.vmem [shape: bf16[8,128,64], index: 10, kind: input, shape index: {}]   ;;  %s2662_s11 = inlined_call_operand.vmem [shape: f32[8,1,64], index: 11, kind: input, shape index: {}]   ;;  %s2663_s12 = inlined_call_operand.vmem [shape: f32[8], index: 12, kind: input, shape index: {}, may-alias: {12,13}]   ;;  %s2664_s13 = inlined_call_operand.vmem [shape: f32[8], index: 13, kind: input, shape index: {}, may-alias: {12,13}]   ;;  %s2665_s14 = inlined_call_operand.vmem [shape: bf16[2,79,64], index: 14, kind: output, shape index: {}]  }
   0x1   :  { %2674 = sst [smem:[#allocation19_spill]] %s2652_s1  ;;  %s19_s15 = sshll.u32 %s2651_s0, 4  ;;  %s20_s15 = int_to_ptr.vmem [resolvable:$true] %s19_s15 }
   0x2   :  { %2675 = sst [smem:[#allocation20_spill]] %s2654_s3  ;;  %s1986_s16 = scalar_lea.vmem %s20_s15, 16 }
   0x3   :  { %2676 = sst [smem:[#allocation21_spill]] %s2657_s6  ;;  %p1987_p0 = scmp.ne.s32.totalorder %s20_s15, %s1986_s16 }
   0x4   :  { %2677 = sst [smem:[#allocation22_spill]] %s2663_s12  ;;  %p1991_p1 = scmp.lt.s32.totalorder %s20_s15, %s20_s15 }
   0x5   :  { %2678 = sst [smem:[#allocation23_spill]] %s2664_s13  ;;  %p1992_p2 = scmp.lt.s32.totalorder %s1986_s16, %s1986_s16 }
   0x6   :  { %2679 = sst [smem:[#allocation24_spill]] %s2665_s14 }
   0x7   :  { %p1993_p3 = por %p1992_p2, %p1991_p1 }
   0x9   :  { %p1994_p4 = pnand %p1993_p3, %p1987_p0 }
   0xb   :  { %1997 = shalt.err (!%p1994_p4)  }
   0xc   :  { %s2078_s17 = smov [#allocation5]  }
   0xd   :  { %22 = dma.vmem_to_smem %s20_s15, 16, %s2078_s17, [#allocation4] }
   0xe   :  { %2048 = dma.done.wait [#allocation4], 16 }
   0xf   :  { %2049 = vsyncadd [#allocation4], 4294967280 }
  0x10   :  { %24 = sfence }
  0x11   :  { %25 = vsyncpa [#allocation7], 0 }
  0x12   :  { %26 = vsyncpa [#allocation9], 0  ;;  %s2161_s18 = smov 0   ;;  %s2163_s19 = smov 0  }
  0x13   :  { %s2165_s0 = smov 0   ;;  %s2167_s20 = smov 0  }
  0x14   :  { %s2169_s21 = smov 0  }
  0x15 LB: > { %2680 = sst [smem:[#allocation13_spill]] %s2060_s18  ;;  %s1687_s22 = sadd.s32 4294967295, %s2076_s21   ;;  %s2076_s21 = sphi %s2169_s21, %s32_s21   ;;  %s2072_s20 = sphi %s2167_s20, %s2707_s20   ;;  %s2068_s0 = sphi %s2165_s0, %s2706_s0   ;;  %s2064_s19 = sphi %s2163_s19, %s2705_s19   ;;  %s2060_s18 = sphi %s2161_s18, %s2704_s18  }
  0x16   : > { %2681 = sst [smem:[#allocation14_spill]] %s2068_s0  ;;  %s41_s23 = sadd.s32 1, %s2068_s0 }
  0x17   : > { %2682 = sst [smem:[#allocation15_spill]] %s2072_s20  ;;  %p42_p5 = scmp.ge.s32.totalorder %s41_s23, 8 }
  0x18   : > { %2683 = sst [smem:[#allocation16_spill]] %s2076_s21  ;;  %s44_s24 = sadd.s32 1, %s2072_s20 }
  0x19   : > { %p1689_p6 = scmp.ge.s32.totalorder %s2076_s21, 1  ;;  %p405_p7 = scmp.lt.s32.totalorder %s2076_s21, 17 }
  0x1a   : > { %s2709_s23 = smov (%p42_p5, %s41_s23), 0  ;;  %s2711_s24 = smov (!%p42_p5, %s44_s24), %s2072_s20 }
  0x1b   : > { %2684 = sst [smem:[#allocation17_spill]] %s2709_s23  ;;  %p2194_p8 = pnand %p1689_p6, %p405_p7 }
  0x1c   : > { %p46_p9 = scmp.ge.s32.totalorder %s2711_s24, 2  ;;  %p2198_p10 = scmp.eq.s32.totalorder %s1687_s22, 0 }
  0x1d   : > { %s2685_s25 = scalar_select %p2194_p8, 1, 0 }
  0x1e   : > { %s2686_s26 = scalar_select %p2198_p10, 1, 0 }
  0x1f   : > { %p1914_p11 = pneg %p2194_p8  ;;  %s2687_s12 = sld [smem:[#allocation22_spill]] }
  0x20   : > { %s2713_s24 = smov (%p46_p9, %s2711_s24), 0  ;;  %s2690_s13 = sld [smem:[#allocation23_spill]] }
  0x21   : > { %2688 = sst [smem:[#allocation18_spill]] %s2713_s24  ;;  %p2211_p12 = pnand %p2198_p10, %p1914_p11 }
  0x23   : > { %p2000_p0 = pneg %p2211_p12 }
  0x25   : > { %s418_s29 = sshll.u32 %s2687_s12, 4  ;;  %s419_s29 = int_to_ptr.vmem [resolvable:$true] %s418_s29 }
  0x26   : > { %s429_s17 = sshll.u32 %s2690_s13, 4  ;;  %s1998_s22 = scalar_lea.vmem %s419_s29, 16  ;;  %s430_s17 = int_to_ptr.vmem [resolvable:$true] %s429_s17 }
  0x27   : > { %p1999_p13 = scmp.ne.s32.totalorder %s419_s29, %s1998_s22  ;;  %p2006_p3 = scmp.lt.s32.totalorder %s419_s29, %s419_s29 }
  0x28   : > { %p2007_p4 = scmp.lt.s32.totalorder %s1998_s22, %s1998_s22 }
  0x29   : > { %p2001_p1 = pnand %p2000_p0, %p1999_p13 }
  0x2a   : > { %p2008_p5 = por %p2007_p4, %p2006_p3 }
  0x2b   : > { %p2002_p2 = pneg %p2001_p1 }
  0x2d   : > { %p2009_p6 = pnand %p2008_p5, %p2002_p2 }
  0x2f   : > { %2012 = shalt.err (!%p2009_p6)
}
  0x30   : > { %s2079_s27 = smov [#allocation6]   ;;  %s2013_s28 = scalar_lea.vmem %s430_s17, 16 }
  0x31   : > { %1917 = dma.vmem_to_smem (!%p2211_p12), %s419_s29, 16, %s2079_s27, [#allocation7]  }
  0x32   : > { %p2014_p7 = scmp.ne.s32.totalorder %s430_s17, %s2013_s28  ;;  %p2021_p10 = scmp.lt.s32.totalorder %s430_s17, %s430_s17 }
  0x33   : > { %p2022_p8 = scmp.lt.s32.totalorder %s2013_s28, %s2013_s28 }
  0x34   : > { %p2016_p9 = pnand %p2014_p7, %p2000_p0 }
  0x35   : > { %p2023_p13 = por %p2022_p8, %p2021_p10 }
  0x36   : > { %p2017_p11 = pneg %p2016_p9 }
  0x38   : > { %p2024_p1 = pnand %p2023_p13, %p2017_p11 }
  0x3a   : > { %2027 = shalt.err (!%p2024_p1)
}
  0x3b   : > { %s2080_s15 = smov [#allocation8]   ;;  %p2691_p2 = scmp.ne.s32.totalorder %s2685_s25, 0 }
  0x3c   : > { %1920 = dma.vmem_to_smem (!%p2211_p12), %s430_s17, 16, %s2080_s15, [#allocation9]  }
  0x3d   : > { %519 = sbr.rel (%p2691_p2) target bundleno = 1670 (0x686), region = 72  ;;  %p2692_p3 = scmp.ne.s32.totalorder (!%p2691_p2), %s2686_s26, 0 }
  0x44   : > { %2051 = dma.done.wait (%p2692_p3), [#allocation7], 16  }
  0x45   : > { %2053 = vsyncadd (%p2692_p3), [#allocation7], 4294967280 }
  0x46   : > { %2055 = dma.done.wait (%p2692_p3), [#allocation9], 16  }
  0x47   : > { %2057 = vsyncadd (%p2692_p3), [#allocation9], 4294967280 }
  0x48   : > { %529 = sfence }
  0x49   : > { %p607_p8 = scmp.lt.s32.totalorder %s2064_s19, 1  ;;  %p612_p10 = scmp.lt.s32.totalorder %s2060_s18, 7 }
  0x4a   : > { %s2693_s1 = sld [smem:[#allocation19_spill]]  ;;  %s2694_s3 = sld [smem:[#allocation20_spill]] }
  0x4b   : > { %s2715_s19 = smov (!%p607_p8, %s2064_s19), 1  ;;  %s2695_s6 = sld [smem:[#allocation21_spill]] }
  0x4c   : > { %s2238_s25 = scalar_select %p612_p10, %s2060_s18, 7 }
  0x4d   : > { %s1893_s26 = smul.u32 40, %s2715_s19  ;;  %s2697_s13 = sld [smem:[#allocation13_spill]] }
  0x4e   : > { %s1697_s29 = sshll.u32 %s2238_s25, 1  ;;  %s1755_s30 = sshll.u32 %s2238_s25, 5 }
  0x4f   : > { %s2245_s27 = sadd.s32 %s1697_s29, %s2715_s19  ;;  %s1700_s19 = sshll.u32 %s2238_s25, 2 }
  0x50   : > { %s611_s22 = scalar_lea.vmem %s2693_s1, %s1893_s26  ;;  %s2254_s23 = scalar_lea.vmem %s2694_s3, %s1755_s30 }
  0x51   : > { %s2272_s12 = scalar_lea.vmem %s2695_s6, %s1700_s19  ;;  %s639_s30 = scalar_lea.vmem %s2659_s8, %s2238_s25 }
  0x52   : > { %s642_s21 = scalar_lea.vmem %s2660_s9, %s2238_s25  ;;  %s1756_s14 = sshll.u32 %s2238_s25, 6 }
  0x53   : > { %s2286_s3 = scalar_lea.vmem %s2661_s10, %s1756_s14  ;;  %s650_s28 = scalar_lea.vmem %s2662_s11, %s2238_s25 }
  0x54   : > { %s2696_s1 = sld [smem:[#allocation24_spill]]  ;;  %p1704_p12 = scmp.ne.s32.totalorder %s2697_s13, 0 }
  0x55   : > { %v1768_v0 = vld [vmem:[%s611_s22] sm:$0xff] (!%p1704_p12)   ;;  %vm681_vm0 = vcmask (!%p1704_p12), 523264   ;;  %v1787_v1 = vld [vmem:[%s611_s22 + $0x8] sm:$0xff] (!%p1704_p12)   ;;  %v1788_v2 = vld [vmem:[%s611_s22 + $0x10] sm:$0xff] (!%p1704_p12)   ;;  %vm691_vm1 = vcmask (!%p1704_p12), 522240  }
  0x56   : > { %660 = sbr.rel (%p1704_p12) target bundleno = 94 (0x5e), region = 84  ;;  %v1769_v3 = vunpack.c.l.bf16 (!%p1704_p12), %v1768_v0  ;;  %v1770_v4 = vunpack.c.h.bf16 (!%p1704_p12), %v1768_v0  ;;  %v1773_v5 = vunpack.c.l.bf16 (!%p1704_p12), %v1787_v1  ;;  %v1774_v6 = vunpack.c.h.bf16 (!%p1704_p12), %v1787_v1  ;;  %v1789_v7 = vld [vmem:[%s611_s22 + $0x18] sm:$0xff] (!%p1704_p12)   ;;  %v1790_v8 = vld [vmem:[%s611_s22 + $0x20] sm:$0xff] (!%p1704_p12)  }
  0x57   : > { %v1777_v9 = vunpack.c.l.bf16 (!%p1704_p12), %v1788_v2  ;;  %v1778_v10 = vunpack.c.h.bf16 (!%p1704_p12), %v1788_v2  ;;  %v1781_v11 = vunpack.c.l.bf16 (!%p1704_p12), %v1789_v7  ;;  %v1782_v12 = vunpack.c.h.bf16 (!%p1704_p12), %v1789_v7 }
  0x58   : > { %682 = vst.msk [vmem:[#allocation2] sm:$0xff] (!%p1704_p12), %vm681_vm0, %v1769_v3  ;;  %683 = vst.msk [vmem:[#allocation2 + $0x8] sm:$0xff] (!%p1704_p12), %vm681_vm0, %v1770_v4  ;;  %v1785_v13 = vunpack.c.l.bf16 (!%p1704_p12), %v1790_v8  ;;  %v1786_v14 = vunpack.c.h.bf16 (!%p1704_p12), %v1790_v8 }
  0x59   : > { %684 = vst.msk [vmem:[#allocation2 + $0x10] sm:$0xff] (!%p1704_p12), %vm681_vm0, %v1773_v5  ;;  %685 = vst.msk [vmem:[#allocation2 + $0x18] sm:$0xff] (!%p1704_p12), %vm681_vm0, %v1774_v6 }
  0x5a   : > { %s2295_s6 = scalar_lea.vmem %s2696_s1, %s1893_s26  ;;  %686 = vst.msk [vmem:[#allocation2 + $0x20] sm:$0xff] (!%p1704_p12), %vm681_vm0, %v1777_v9  ;;  %687 = vst.msk [vmem:[#allocation2 + $0x28] sm:$0xff] (!%p1704_p12), %vm681_vm0, %v1778_v10 }
  0x5b   : > { %688 = vst.msk [vmem:[#allocation2 + $0x30] sm:$0xff] (!%p1704_p12), %vm681_vm0, %v1781_v11  ;;  %689 = vst.msk [vmem:[#allocation2 + $0x38] sm:$0xff] (!%p1704_p12), %vm681_vm0, %v1782_v12 }
  0x5c   : > { %690 = vst.msk [vmem:[#allocation2 + $0x40] sm:$0xff] (!%p1704_p12), %vm681_vm0, %v1785_v13 }
  0x5d   : > { %692 = vst.msk [vmem:[#allocation2 + $0x48] sm:$0x7f] %vm691_vm1, %v1786_v14 }
  0x5e PF: > { %v1970_v15 = vld [vmem:[%s2254_s23] sm:$0xff]   ;;  %v2081_v16 = vmov 0.0   ;;  %v1971_v17 = vld [vmem:[%s2254_s23 + $0x8] sm:$0xff]   ;;  %vm2082_vm2 = vmmov 0   ;;  %v1972_v18 = vld [vmem:[%s2254_s23 + $0x10] sm:$0xff]   ;;  %vm747_vm3 = vcmask 523264   ;;  %s2699_s16 = scalar_lea.vmem %s2653_s2, %s2245_s27  ;;  %s2700_s19 = scalar_lea.vmem %s2655_s4, %s2238_s25 }
  0x5f   : > { %1813 = vmatprep.subr.bf16.mxu0 %v2081_v16  ;;  %980 = vst [vmem:[#allocation3] sm:$0xff] %v2081_v16  ;;  %981 = vst [vmem:[#allocation3 + $0x57] sm:$0xff] %v2081_v16  ;;  %1877 = vmatprep.subr.bf16.mxu1 %v2081_v16  ;;  %v1973_v19 = vld [vmem:[%s2254_s23 + $0x18] sm:$0xff]   ;;  %s2698_s1 = sld [smem:[#allocation13_spill]]  ;;  %v1705_v39 = vld [vmem:[%s2699_s16] ss:$0 sm:$0xff] }
  0x60   : > { %1814 = vmatpush3.bf16.msra.mxu0 %v1970_v15  ;;  %1821 = vmatprep.mubr.msk.bf16.mxu0 %vm2082_vm2, %v2081_v16  ;;  %v2322_v20 = vld [vmem:[#allocation2] sm:$0xff]  ;;  %v2324_v21 = vld [vmem:[#allocation2 + $0x8] sm:$0xff]  ;;  %vm876_vm14 = vcmask 1046528  }
  0x61   : > { %1815 = vmatprep.subr.bf16.mxu0 %v2081_v16  ;;  %1861 = vmatprep.mubr.msk.bf16.mxu1 %vm2082_vm2, %v2081_v16  ;;  %v703_v22 = vpack.c.bf16 %v2324_v21, %v2322_v20  ;;  %v2333_v23 = vld [vmem:[#allocation2 + $0x10] sm:$0xff]  ;;  %v2335_v24 = vld [vmem:[#allocation2 + $0x18] sm:$0xff] }
  0x62   : > { %v704_v25 = vpack.c.bf16 %v2335_v24, %v2333_v23  ;;  %v2342_v26 = vld [vmem:[#allocation2 + $0x20] sm:$0xff]  ;;  %v2344_v27 = vld [vmem:[#allocation2 + $0x28] sm:$0xff] }
  0x63   : > { %v705_v28 = vpack.c.bf16 %v2344_v27, %v2342_v26  ;;  %v2351_v29 = vld [vmem:[#allocation2 + $0x30] sm:$0xff]  ;;  %v2353_v30 = vld [vmem:[#allocation2 + $0x38] sm:$0xff] }
  0x64   : > { %1816 = vmatpush3.bf16.msra.mxu0 %v1971_v17  ;;  %v706_v31 = vpack.c.bf16 %v2353_v30, %v2351_v29  ;;  %v2360_v32 = vld [vmem:[#allocation2 + $0x40] sm:$0xff]  ;;  %v2362_v33 = vld [vmem:[#allocation2 + $0x48] sm:$0x7f] }
  0x65   : > { %1817 = vmatprep.subr.bf16.mxu0 %v2081_v16  ;;  %v707_v34 = vpack.c.bf16 %v2362_v33, %v2360_v32  ;;  %s836_s23 = sld [smem:[#allocation6 + %s2698_s1]]  ;;  %p1742_p0 = scmp.ne.s32.totalorder %s2698_s1, 7 }
  0x66   : > { %s2400_s26 = sld [smem:[#allocation5 + %s2698_s1]] }
  0x68   : > { %1818 = vmatpush3.bf16.msra.mxu0 %v1972_v18 }
  0x69   : > { %1819 = vmatprep.subr.bf16.mxu0 %v2081_v16 }
  0x6b   : > { %v847_v45 = vstv %s836_s23  ;;  %s2701_s23 = scalar_lea.vmem %s2656_s5, %s2238_s25 }
  0x6c   : > { %1820 = vmatpush3.bf16.msra.mxu0 %v1973_v19  ;;  %s992_s22 = ssub.s32 8, %s2400_s26 }
  0x6d   : > { %1841 = vmatprep.subr.bf16.mxu0 %v2081_v16  ;;  %s2416_s16 = scalar_lea.vmem [#allocation3], %s992_s22 }
  0x6f   : > { %1822 = vmatmul.mubr.msk.bf16.vlgmr.msra.gmra.mrb[0].mxu0 %vm747_vm3, %v703_v22 }
  0x70   : > { %1825 = vmatprep.mubr.msk.bf16.mxu0 %vm2082_vm2, %v2081_v16 }
  0x77   : > { %1826 = vmatmul.mubr.msk.bf16.gmra.mrb[4].mxu0 %vm747_vm3, %v704_v25 }
  0x78   : > { %1829 = vmatprep.mubr.msk.bf16.mxu0 %vm2082_vm2, %v2081_v16 }
  0x7f   : > { %1830 = vmatmul.mubr.msk.bf16.gmra.mrb[8].mxu0 %vm747_vm3, %v705_v28 }
  0x80   : > { %1833 = vmatprep.mubr.msk.bf16.mxu0 %vm2082_vm2, %v2081_v16 }
  0x87   : > { %1834 = vmatmul.mubr.msk.bf16.gmra.mrb[12].mxu0 %vm747_vm3, %v706_v31 }
  0x88   : > { %1837 = vmatprep.mubr.msk.bf16.mxu0 %vm2082_vm2, %v2081_v16 }
  0x8f   : > { %1838 = vmatmul.mubr.msk.bf16.gmra.mrb[16].mxu0 %vm747_vm3, %v707_v34 }
  0x90   : > { %1857 = vmatprep.mubr.msk.bf16.mxu0 %vm2082_vm2, %v2081_v16 }
 0x142   : > { %v797_v35 = vpop.f32.mrb[0].mxu0 }
 0x143   : > { %v1823_v36 = vpop.f32.mrb[1].mxu0  ;;  %v798_v42 = vadd.f32 %v1705_v39, %v797_v35 }
 0x144   : > { %v800_v37 = vpop.f32.mrb[2].mxu0 }
 0x145   : > { %v1824_v38 = vpop.f32.mrb[3].mxu0  ;;  %v801_v40 = vadd.f32 %v1705_v39, %v800_v37  ;;  %v848_v49 = vmul.f32 %v847_v45, %v798_v42  ;;  %vm837_vm5 = vcmp.ge.f32.partialorder %v798_v42, 0.0 }
 0x147   : > { %v849_v47 = vmul.f32 %v847_v45, %v801_v40  ;;  %vm838_vm4 = vcmp.ge.f32.partialorder %v801_v40, 0.0  ;;  %v2377_v54 = vsel %vm837_vm5, %v798_v42, %v848_v49 }
 0x149   : > { %v2375_v52 = vsel %vm838_vm4, %v801_v40, %v849_v47 }
 0x14a   : > { %v805_v41 = vpop.f32.mrb[4].mxu0  ;;  %v868_v59 = vadd.f32 %v2375_v52, %v2377_v54 }
 0x14b   : > { %v806_v43 = vadd.f32 %v1705_v39, %v805_v41  ;;  %v1827_v44 = vpop.f32.mrb[5].mxu0 }
 0x14c   : > { %v808_v46 = vpop.f32.mrb[6].mxu0 }
 0x14d   : > { %v1828_v48 = vpop.f32.mrb[7].mxu0  ;;  %v850_v50 = vmul.f32 %v847_v45, %v806_v43  ;;  %v809_v51 = vadd.f32 %v1705_v39, %v808_v46  ;;  %vm839_vm6 = vcmp.ge.f32.partialorder %v806_v43, 0.0 }
 0x14f   : > { %v2379_v55 = vsel %vm839_vm6, %v806_v43, %v850_v50  ;;  %v851_v56 = vmul.f32 %v847_v45, %v809_v51  ;;  %vm840_vm7 = vcmp.ge.f32.partialorder %v809_v51, 0.0 }
 0x150   : > { %v869_v0 = vadd.f32 %v868_v59, %v2379_v55 }
 0x151   : > { %v861_v1 = vsel %vm840_vm7, %v809_v51, %v851_v56 }
 0x152   : > { %v813_v53 = vpop.f32.mrb[8].mxu0  ;;  %v870_v4 = vadd.f32 %v869_v0, %v861_v1 }
 0x153   : > { %v814_v57 = vadd.f32 %v1705_v39, %v813_v53  ;;  %v1831_v58 = vpop.f32.mrb[9].mxu0 }
 0x154   : > { %v816_v60 = vpop.f32.mrb[10].mxu0 }
 0x155   : > { %v852_v61 = vmul.f32 %v847_v45, %v814_v57  ;;  %v817_v62 = vadd.f32 %v1705_v39, %v816_v60  ;;  %v1832_v63 = vpop.f32.mrb[11].mxu0  ;;  %vm841_vm8 = vcmp.ge.f32.partialorder %v814_v57, 0.0 }
 0x157   : > { %v862_v2 = vsel %vm841_vm8, %v814_v57, %v852_v61  ;;  %v853_v3 = vmul.f32 %v847_v45, %v817_v62  ;;  %vm842_vm9 = vcmp.ge.f32.partialorder %v817_v62, 0.0 }
 0x158   : > { %v871_v8 = vadd.f32 %v870_v4, %v862_v2 }
 0x159   : > { %v863_v10 = vsel %vm842_vm9, %v817_v62, %v853_v3 }
 0x15a   : > { %v821_v5 = vpop.f32.mrb[12].mxu0  ;;  %v872_v17 = vadd.f32 %v871_v8, %v863_v10 }
 0x15b   : > { %v822_v6 = vadd.f32 %v1705_v39, %v821_v5  ;;  %v1835_v7 = vpop.f32.mrb[13].mxu0 }
 0x15c   : > { %v824_v9 = vpop.f32.mrb[14].mxu0 }
 0x15d   : > { %vm843_vm10 = vcmp.ge.f32.partialorder %v822_v6, 0.0  ;;  %v854_v11 = vmul.f32 %v847_v45, %v822_v6  ;;  %v825_v12 = vadd.f32 %v1705_v39, %v824_v9  ;;  %v1836_v13 = vpop.f32.mrb[15].mxu0 }
 0x15f   : > { %v864_v14 = vsel %vm843_vm10, %v822_v6, %v854_v11  ;;  %v855_v15 = vmul.f32 %v847_v45, %v825_v12  ;;  %vm844_vm11 = vcmp.ge.f32.partialorder %v825_v12, 0.0 }
 0x160   : > { %v873_v19 = vadd.f32 %v872_v17, %v864_v14 }
 0x161   : > { %v865_v28 = vsel %vm844_vm11, %v825_v12, %v855_v15  ;;  %vm1474_vm11 = vcmask (!%p1742_p0), 519168  }
 0x162   : > { %v829_v18 = vpop.f32.mrb[16].mxu0  ;;  %v874_v37 = vadd.f32 %v873_v19, %v865_v28 }
 0x163   : > { %v830_v22 = vadd.f32 %v1705_v39, %v829_v18  ;;  %v1839_v25 = vpop.f32.mrb[17].mxu0 }
 0x164   : > { %v832_v31 = vpop.f32.mrb[18].mxu0 }
 0x165   : > { %vm845_vm12 = vcmp.ge.f32.partialorder %v830_v22, 0.0  ;;  %v856_v34 = vmul.f32 %v847_v45, %v830_v22  ;;  %v833_v35 = vadd.f32 %v1705_v39, %v832_v31  ;;  %v1840_v36 = vpop.f32.mrb[19].mxu0 }
 0x167   : > { %v857_v38 = vmul.f32 %v847_v45, %v833_v35  ;;  %vm846_vm13 = vcmp.ge.f32.partialorder %v833_v35, 0.0  ;;  %v866_v40 = vsel %vm845_vm12, %v830_v22, %v856_v34 }
 0x168   : > { %v875_v41 = vadd.f32 %v874_v37, %v866_v40 }
 0x169   : > { %v867_v42 = vsel %vm846_vm13, %v833_v35, %v857_v38 }
 0x16a   : > { %v877_v43 = vsel %vm876_vm14, %v867_v42, 0.0 }
 0x16b   : > { %v878_v44 = vadd.f32 %v877_v43, %v875_v41 }
 0x16d   : > { %879 = vadd.xlane.f32.xlu0 %v878_v44 }
 0x1fa   : > { %v880_v46 = vpop.xlane.xlu0 %879 }
 0x1fb   : > { %v881_v47 = vrot.slane %v880_v46, 4 }
 0x1fd   : > { %v882_v48 = vadd.f32 %v881_v47, %v880_v46 }
 0x1ff   : > { %v883_v49 = vrot.slane %v882_v48, 2 }
 0x201   : > { %v884_v50 = vadd.f32 %v883_v49, %v882_v48 }
 0x203   : > { %v885_v51 = vrot.slane %v884_v50, 1 }
 0x205   : > { %v886_v53 = vadd.f32 %v885_v51, %v884_v50 }
 0x207   : > { %1894 = vpush %v886_v53 }
 0x238   : > { %s1895_s27 = spop %1894 }
 0x239   : > { %s888_s24 = smul.f32 9.889241e-05, %s1895_s27  ;;  %s2423_s27 = sld [smem:[#allocation8 + %s2698_s1]] }
 0x23b   : > { %v889_v39 = vstv %s888_s24  ;;  %s2434_s24 = scalar_lea.vmem [#allocation3], %s2400_s26 }
 0x23c   : > { %v890_v45 = vsub.f32 %v2377_v54, %v889_v39  ;;  %v891_v56 = vsub.f32 %v2375_v52, %v889_v39  ;;  %v892_v57 = vsub.f32 %v2379_v55, %v889_v39  ;;  %v893_v60 = vsub.f32 %v861_v1, %v889_v39 }
 0x23d   : > { %v894_v61 = vsub.f32 %v862_v2, %v889_v39  ;;  %v895_v0 = vsub.f32 %v863_v10, %v889_v39  ;;  %v896_v5 = vsub.f32 %v864_v14, %v889_v39  ;;  %v897_v8 = vsub.f32 %v865_v28, %v889_v39 }
 0x23e   : > { %v900_v58 = vmul.f32 %v890_v45, %v890_v45  ;;  %v901_v59 = vmul.f32 %v891_v56, %v891_v56  ;;  %v902_v62 = vmul.f32 %v892_v57, %v892_v57  ;;  %v903_v3 = vmul.f32 %v893_v60, %v893_v60 }
 0x23f   : > { %v904_v6 = vmul.f32 %v894_v61, %v894_v61  ;;  %v905_v9 = vmul.f32 %v895_v0, %v895_v0  ;;  %v899_v54 = vsub.f32 %v867_v42, %v889_v39  ;;  %v898_v12 = vsub.f32 %v866_v40, %v889_v39  ;;  %v1715_v40 = vld [vmem:[%s2700_s19] ss:$0 sm:$0xff] }
 0x240   : > { %v910_v63 = vadd.f32 %v901_v59, %v900_v58  ;;  %v906_v52 = vmul.f32 %v896_v5, %v896_v5  ;;  %v907_v55 = vmul.f32 %v897_v8, %v897_v8  ;;  %v1716_v58 = vld [vmem:[%s2701_s23] ss:$0 sm:$0xff] }
 0x241   : > { %v909_v17 = vmul.f32 %v899_v54, %v899_v54  ;;  %v908_v1 = vmul.f32 %v898_v12, %v898_v12 }
 0x242   : > { %v911_v4 = vadd.f32 %v910_v63, %v902_v62 }
 0x243   : > { %v918_v10 = vsel %vm876_vm14, %v909_v17, 0.0 }
 0x244   : > { %v912_v7 = vadd.f32 %v911_v4, %v903_v3 }
 0x246   : > { %v913_v11 = vadd.f32 %v912_v7, %v904_v6 }
 0x248   : > { %v914_v13 = vadd.f32 %v913_v11, %v905_v9 }
 0x24a   : > { %v915_v15 = vadd.f32 %v914_v13, %v906_v52  ;;  %v2414_v52 = vld [vmem:[%s2272_s12 + $0x1] ss:$0 sm:$0xff] }
 0x24c   : > { %v916_v2 = vadd.f32 %v915_v15, %v907_v55 }
 0x24e   : > { %v917_v18 = vadd.f32 %v916_v2, %v908_v1 }
 0x250   : > { %v919_v19 = vadd.f32 %v918_v10, %v917_v18 }
 0x252   : > { %920 = vadd.xlane.f32.xlu0 %v919_v19 }
 0x2df   : > { %v921_v14 = vpop.xlane.xlu0 %920 }
 0x2e0   : > { %v922_v22 = vrot.slane %v921_v14, 4 }
 0x2e2   : > { %v923_v25 = vadd.f32 %v922_v22, %v921_v14  ;;  %v2429_v22 = vld [vmem:[%s2272_s12 + $0x2] ss:$0 sm:$0xff] }
 0x2e4   : > { %v924_v28 = vrot.slane %v923_v25, 2 }
 0x2e6   : > { %v925_v31 = vadd.f32 %v924_v28, %v923_v25 }
 0x2e8   : > { %v926_v34 = vrot.slane %v925_v31, 1 }
 0x2ea   : > { %v927_v35 = vadd.f32 %v926_v34, %v925_v31 }
 0x2ec   : > { %1896 = vpush %v927_v35 }
 0x31d   : > { %s1897_s0 = spop %1896 }
 0x31e   : > { %s929_s20 = smul.f32 9.889241e-05, %s1897_s0 }
 0x320   : > { %s930_s14 = sadd.f32 1e-05, %s929_s20  ;;  %s2702_s20 = scalar_lea.vmem %s2658_s7, %s2238_s25 }
 0x322   : > { %v931_v36 = vstv %s930_s14 }
 0x323   : > { %1982 = vrsqrt.f32 %v931_v36 }
 0x32d   : > { %v1983_v37 = vpop.eup %1982 }
 0x32e   : > { %1898 = vpush %v1983_v37 }
 0x35f   : > { %s1899_s18 = spop %1898 }
 0x360   : > { %v934_v38 = vstv %s1899_s18 }
 0x361   : > { %v935_v41 = vmul.f32 %v934_v38, %v890_v45  ;;  %v936_v42 = vmul.f32 %v934_v38, %v891_v56  ;;  %v937_v43 = vmul.f32 %v934_v38, %v892_v57  ;;  %v938_v44 = vmul.f32 %v934_v38, %v893_v60 }
 0x362   : > { %v939_v46 = vmul.f32 %v934_v38, %v894_v61  ;;  %v940_v47 = vmul.f32 %v934_v38, %v895_v0  ;;  %v941_v48 = vmul.f32 %v934_v38, %v896_v5  ;;  %v942_v49 = vmul.f32 %v934_v38, %v897_v8 }
 0x363   : > { %v943_v50 = vmul.f32 %v934_v38, %v898_v12  ;;  %v944_v51 = vmul.f32 %v934_v38, %v899_v54  ;;  %v952_v53 = vmul.f32 %v1715_v40, %v935_v41  ;;  %v953_v39 = vmul.f32 %v1715_v40, %v936_v42  ;;  %v1717_v12 = vld [vmem:[%s2272_s12] ss:$0 sm:$0xff] }
 0x364   : > { %v954_v59 = vmul.f32 %v1715_v40, %v937_v43  ;;  %v955_v45 = vmul.f32 %v1715_v40, %v938_v44  ;;  %v956_v56 = vmul.f32 %v1715_v40, %v939_v46  ;;  %v957_v57 = vmul.f32 %v1715_v40, %v940_v47 }
 0x365   : > { %v958_v60 = vmul.f32 %v1715_v40, %v941_v48  ;;  %v959_v61 = vmul.f32 %v1715_v40, %v942_v49  ;;  %v960_v62 = vmul.f32 %v1715_v40, %v943_v50  ;;  %v961_v63 = vmul.f32 %v1715_v40, %v944_v51 }
 0x366   : > { %v969_v0 = vadd.f32 %v1716_v58, %v952_v53  ;;  %v970_v3 = vadd.f32 %v1716_v58, %v953_v39  ;;  %v971_v4 = vadd.f32 %v1716_v58, %v954_v59  ;;  %v972_v5 = vadd.f32 %v1716_v58, %v955_v45 }
 0x367   : > { %v973_v6 = vadd.f32 %v1716_v58, %v956_v56  ;;  %v974_v7 = vadd.f32 %v1716_v58, %v957_v57  ;;  %v2402_v8 = vadd.f32 %v1716_v58, %v958_v60  ;;  %v2404_v9 = vadd.f32 %v1716_v58, %v959_v61  ;;  %v2455_v57 = vld [vmem:[%s2702_s20] ss:$0 sm:$0xff] }
 0x368   : > { %v2406_v11 = vadd.f32 %v1716_v58, %v960_v62  ;;  %v978_v54 = vadd.f32 %v1716_v58, %v961_v63  ;;  %982 = vst [vmem:[#allocation3 + $0x8] sm:$0xff] %v969_v0  ;;  %983 = vst [vmem:[#allocation3 + $0x10] sm:$0xff] %v970_v3  ;;  %v1044_v19 = vmul.f32 %v2414_v52, %v969_v0  ;;  %v2458_v60 = vstv %s2423_s27 }
 0x369   : > { %984 = vst [vmem:[#allocation3 + $0x18] sm:$0xff] %v971_v4  ;;  %985 = vst [vmem:[#allocation3 + $0x20] sm:$0xff] %v972_v5  ;;  %v1045_v14 = vmul.f32 %v2414_v52, %v970_v3  ;;  %v1046_v31 = vmul.f32 %v2414_v52, %v971_v4  ;;  %v1047_v41 = vmul.f32 %v2414_v52, %v972_v5 }
 0x36a   : > { %986 = vst [vmem:[#allocation3 + $0x28] sm:$0xff] %v973_v6  ;;  %987 = vst [vmem:[#allocation3 + $0x30] sm:$0xff] %v974_v7  ;;  %v1048_v50 = vmul.f32 %v2414_v52, %v973_v6  ;;  %v1049_v58 = vmul.f32 %v2414_v52, %v974_v7  ;;  %v1050_v7 = vmul.f32 %v2414_v52, %v2402_v8 }
 0x36b   : > { %988 = vst [vmem:[#allocation3 + $0x38] sm:$0xff] %v2402_v8  ;;  %989 = vst [vmem:[#allocation3 + $0x40] sm:$0xff] %v2404_v9 }
 0x36c   : > { %990 = vst [vmem:[#allocation3 + $0x48] sm:$0xff] %v2406_v11  ;;  %991 = vst [vmem:[#allocation3 + $0x50] sm:$0x7f] %v978_v54  ;;  %v1051_v54 = vmul.f32 %v2414_v52, %v2404_v9 }
 0x373   : > { %v994_v13 = vld [vmem:[%s2416_s16] sm:$0xff]  ;;  %v995_v55 = vld [vmem:[%s2416_s16 + $0x8] sm:$0xff]  ;;  %v996_v15 = vld [vmem:[%s2416_s16 + $0x10] sm:$0xff] }
 0x374   : > { %v997_v17 = vld [vmem:[%s2416_s16 + $0x18] sm:$0xff]  ;;  %v1009_v1 = vmul.f32 %v1717_v12, %v994_v13  ;;  %v1010_v2 = vmul.f32 %v1717_v12, %v995_v55  ;;  %v1011_v18 = vmul.f32 %v1717_v12, %v996_v15  ;;  %v998_v10 = vld [vmem:[%s2416_s16 + $0x20] sm:$0xff]  ;;  %v999_v25 = vld [vmem:[%s2416_s16 + $0x28] sm:$0xff] }
 0x375   : > { %v1012_v28 = vmul.f32 %v1717_v12, %v997_v17  ;;  %v1719_v34 = vld [vmem:[%s2434_s24 + $0x8] sm:$0xff]  ;;  %v1720_v35 = vld [vmem:[%s2434_s24 + $0x10] sm:$0xff]  ;;  %v1721_v38 = vld [vmem:[%s2434_s24 + $0x18] sm:$0xff]  ;;  %v1013_v40 = vmul.f32 %v1717_v12, %v998_v10  ;;  %v1014_v44 = vmul.f32 %v1717_v12, %v999_v25 }
 0x376   : > { %v1054_v36 = vadd.f32 %v1044_v19, %v1009_v1  ;;  %v1055_v37 = vadd.f32 %v1045_v14, %v1010_v2  ;;  %v1056_v42 = vadd.f32 %v1046_v31, %v1011_v18  ;;  %v1000_v43 = vld [vmem:[%s2416_s16 + $0x30] sm:$0xff]  ;;  %v1722_v46 = vld [vmem:[%s2434_s24 + $0x20] sm:$0xff]  ;;  %v1081_v47 = vmul.f32 %v2429_v22, %v1719_v34  ;;  %v1001_v49 = vld [vmem:[%s2416_s16 + $0x38] sm:$0xff] }
 0x377   : > { %v1082_v48 = vmul.f32 %v2429_v22, %v1720_v35  ;;  %v1057_v51 = vadd.f32 %v1047_v41, %v1012_v28  ;;  %v1083_v53 = vmul.f32 %v2429_v22, %v1721_v38  ;;  %v1002_v39 = vld [vmem:[%s2416_s16 + $0x40] sm:$0xff]  ;;  %v1723_v59 = vld [vmem:[%s2434_s24 + $0x28] sm:$0xff]  ;;  %v1015_v62 = vmul.f32 %v1717_v12, %v1000_v43  ;;  %v1724_v3 = vld [vmem:[%s2434_s24 + $0x30] sm:$0xff] }
 0x378   : > { %v1091_v45 = vadd.f32 %v1081_v47, %v1054_v36  ;;  %v1003_v61 = vld [vmem:[%s2416_s16 + $0x48] sm:$0x7f]  ;;  %v1038_v63 = vld [vmem:[#allocation3 + $0x50] sm:$0x7f]  ;;  %v1058_v0 = vadd.f32 %v1048_v50, %v1013_v40  ;;  %v1084_v4 = vmul.f32 %v2429_v22, %v1722_v46  ;;  %v1016_v6 = vmul.f32 %v1717_v12, %v1001_v49  ;;  %v1725_v55 = vld [vmem:[%s2434_s24 + $0x38] sm:$0xff] }
 0x379   : > { %v1092_v56 = vadd.f32 %v1082_v48, %v1055_v37  ;;  %v1093_v5 = vadd.f32 %v1083_v53, %v1056_v42  ;;  %v1059_v13 = vadd.f32 %v1049_v58, %v1014_v44  ;;  %v1085_v15 = vmul.f32 %v2429_v22, %v1723_v59  ;;  %v1726_v34 = vld [vmem:[%s2434_s24 + $0x40] sm:$0xff]  ;;  %v1728_v37 = vld [vmem:[%s2434_s24 + $0x50] sm:$0x7f]  ;;  %v1727_v42 = vld [vmem:[%s2434_s24 + $0x48] sm:$0xff] }
 0x37a   : > { %v1094_v17 = vadd.f32 %v1084_v4, %v1057_v51  ;;  %v1108_v1 = vadd.f32 %v2455_v57, %v1091_v45  ;;  %v1017_v18 = vmul.f32 %v1717_v12, %v1002_v39  ;;  %v1018_v10 = vmul.f32 %v1717_v12, %v1003_v61 }
 0x37b   : > { %v1109_v2 = vadd.f32 %v2455_v57, %v1092_v56  ;;  %v1053_v19 = vmul.f32 %v2414_v52, %v1038_v63  ;;  %v1086_v8 = vmul.f32 %v2429_v22, %v1724_v3  ;;  %v1060_v14 = vadd.f32 %v1050_v7, %v1015_v62 }
 0x37c   : > { %v1095_v9 = vadd.f32 %v1085_v15, %v1058_v0  ;;  %v1110_v25 = vadd.f32 %v2455_v57, %v1093_v5  ;;  %v1052_v28 = vmul.f32 %v2414_v52, %v2406_v11  ;;  %v1061_v31 = vadd.f32 %v1051_v54, %v1016_v6 }
 0x37d   : > { %v1087_v35 = vmul.f32 %v2429_v22, %v1725_v55  ;;  %v1096_v36 = vadd.f32 %v1086_v8, %v1059_v13  ;;  %v1111_v12 = vadd.f32 %v2455_v57, %v1094_v17  ;;  %vm1119_vm15 = vcmp.ge.f32.partialorder %v1108_v1, 0.0 }
 0x37e   : > { %vm1120_vm0 = vcmp.ge.f32.partialorder %v1109_v2, 0.0  ;;  %v1130_v38 = vmul.f32 %v2458_v60, %v1108_v1  ;;  %v1062_v40 = vadd.f32 %v1052_v28, %v1017_v18  ;;  %v1063_v41 = vadd.f32 %v1053_v19, %v1018_v10 }
 0x37f   : > { %v1131_v43 = vmul.f32 %v2458_v60, %v1109_v2  ;;  %v1088_v44 = vmul.f32 %v2429_v22, %v1726_v34  ;;  %v1097_v11 = vadd.f32 %v1087_v35, %v1060_v14  ;;  %v1112_v52 = vadd.f32 %v2455_v57, %v1095_v9 }
 0x380   : > { %v1132_v46 = vmul.f32 %v2458_v60, %v1110_v25  ;;  %v1090_v47 = vmul.f32 %v2429_v22, %v1728_v37  ;;  %vm1121_vm1 = vcmp.ge.f32.partialorder %v1110_v25, 0.0  ;;  %v1140_v48 = vsel %vm1119_vm15, %v1108_v1, %v1130_v38 }
 0x381   : > { %v1141_v49 = vsel %vm1120_vm0, %v1109_v2, %v1131_v43  ;;  %v1089_v50 = vmul.f32 %v2429_v22, %v1727_v42  ;;  %v1098_v51 = vadd.f32 %v1088_v44, %v1061_v31  ;;  %v1113_v53 = vadd.f32 %v2455_v57, %v1096_v36 }
 0x382   : > { %v1133_v39 = vmul.f32 %v2458_v60, %v1111_v12  ;;  %v1100_v58 = vadd.f32 %v1090_v47, %v1063_v41  ;;  %vm1122_vm4 = vcmp.ge.f32.partialorder %v1111_v12, 0.0  ;;  %v1150_v59 = vadd.f32 %v1141_v49, %v1140_v48 }
 0x383   : > { %v1099_v45 = vadd.f32 %v1089_v50, %v1062_v40  ;;  %v1114_v56 = vadd.f32 %v2455_v57, %v1097_v11  ;;  %v1134_v61 = vmul.f32 %v2458_v60, %v1112_v52  ;;  %v1142_v62 = vsel %vm1121_vm1, %v1110_v25, %v1132_v46 }
 0x384   : > { %vm1123_vm5 = vcmp.ge.f32.partialorder %v1112_v52, 0.0  ;;  %v1151_v63 = vadd.f32 %v1150_v59, %v1142_v62  ;;  %v1115_v0 = vadd.f32 %v2455_v57, %v1098_v51  ;;  %v1135_v22 = vmul.f32 %v2458_v60, %v1113_v53 }
 0x385   : > { %v1143_v3 = vsel %vm1122_vm4, %v1111_v12, %v1133_v39  ;;  %v1117_v4 = vadd.f32 %v2455_v57, %v1100_v58  ;;  %vm1124_vm6 = vcmp.ge.f32.partialorder %v1113_v53, 0.0  ;;  %v1116_v6 = vadd.f32 %v2455_v57, %v1099_v45 }
 0x386   : > { %v1152_v5 = vadd.f32 %v1151_v63, %v1143_v3  ;;  %v1136_v7 = vmul.f32 %v2458_v60, %v1114_v56  ;;  %v1144_v54 = vsel %vm1123_vm5, %v1112_v52, %v1134_v61  ;;  %vm1125_vm7 = vcmp.ge.f32.partialorder %v1114_v56, 0.0 }
 0x387   : > { %v1137_v55 = vmul.f32 %v2458_v60, %v1115_v0  ;;  %v1145_v15 = vsel %vm1124_vm6, %v1113_v53, %v1135_v22  ;;  %vm1126_vm8 = vcmp.ge.f32.partialorder %v1115_v0, 0.0  ;;  %v1139_v17 = vmul.f32 %v2458_v60, %v1117_v4 }
 0x388   : > { %v1153_v13 = vadd.f32 %v1152_v5, %v1144_v54  ;;  %vm1128_vm9 = vcmp.ge.f32.partialorder %v1117_v4, 0.0  ;;  %v1138_v2 = vmul.f32 %v2458_v60, %v1116_v6  ;;  %v1146_v18 = vsel %vm1125_vm7, %v1114_v56, %v1136_v7 }
 0x389   : > { %vm1127_vm10 = vcmp.ge.f32.partialorder %v1116_v6, 0.0  ;;  %v1147_v19 = vsel %vm1126_vm8, %v1115_v0, %v1137_v55  ;;  %v1149_v57 = vsel %vm1128_vm9, %v1117_v4, %v1139_v17  ;;  %v1975_v55 = vld [vmem:[%s2286_s3 + $0x8] sm:$0xff]   ;;  %v1977_v17 = vld [vmem:[%s2286_s3 + $0x18] sm:$0xff]  }
 0x38a   : > { %v1154_v1 = vadd.f32 %v1153_v13, %v1145_v15  ;;  %v1148_v14 = vsel %vm1127_vm10, %v1116_v6, %v1138_v2  ;;  %v1158_v25 = vsel %vm876_vm14, %v1149_v57, 0.0  ;;  %v1974_v13 = vld [vmem:[%s2286_s3] sm:$0xff]   ;;  %v1979_v2 = vld [vmem:[%s2286_s3 + $0x28] sm:$0xff]  }
 0x38b   : > { %1842 = vmatpush3.bf16.msra.mxu0 %v1974_v13  ;;  %1885 = vmatpush3.bf16.msra.mxu1 %v1974_v13 }
 0x38c   : > { %v1155_v10 = vadd.f32 %v1154_v1, %v1146_v18  ;;  %1843 = vmatprep.subr.bf16.mxu0 %v2081_v16  ;;  %1878 = vmatprep.subr.bf16.mxu1 %v2081_v16  ;;  %v1978_v1 = vld [vmem:[%s2286_s3 + $0x20] sm:$0xff]  }
 0x38e   : > { %v1156_v8 = vadd.f32 %v1155_v10, %v1147_v19 }
 0x38f   : > { %1844 = vmatpush3.bf16.msra.mxu0 %v1975_v55  ;;  %1886 = vmatpush3.bf16.msra.mxu1 %v1975_v55 }
 0x390   : > { %v1157_v9 = vadd.f32 %v1156_v8, %v1148_v14  ;;  %1845 = vmatprep.subr.bf16.mxu0 %v2081_v16  ;;  %1879 = vmatprep.subr.bf16.mxu1 %v2081_v16  ;;  %v1981_v8 = vld [vmem:[%s2286_s3 + $0x38] sm:$0xff]  }
 0x392   : > { %v1159_v28 = vadd.f32 %v1158_v25, %v1157_v9 }
 0x394   : > { %1160 = vadd.xlane.f32.xlu1 %v1159_v28 }
 0x421   : > { %v1161_v31 = vpop.xlane.xlu1 %1160 }
 0x422   : > { %v1162_v34 = vrot.slane %v1161_v31, 4 }
 0x424   : > { %v1163_v35 = vadd.f32 %v1162_v34, %v1161_v31 }
 0x426   : > { %v1164_v36 = vrot.slane %v1163_v35, 2 }
 0x428   : > { %v1165_v37 = vadd.f32 %v1164_v36, %v1163_v35  ;;  %v1731_v36 = vld [vmem:[%s639_s30] ss:$0 sm:$0xff] }
 0x42a   : > { %v1166_v12 = vrot.slane %v1165_v37, 1 }
 0x42c   : > { %v1167_v38 = vadd.f32 %v1166_v12, %v1165_v37 }
 0x42e   : > { %1900 = vpush %v1167_v38 }
 0x45f   : > { %s1901_s14 = spop %1900 }
 0x460   : > { %s1169_s18 = smul.f32 9.889241e-05, %s1901_s14 }
 0x462   : > { %v1170_v60 = vstv %s1169_s18 }
 0x463   : > { %v2501_v40 = vsub.f32 %v1140_v48, %v1170_v60  ;;  %v2503_v41 = vsub.f32 %v1141_v49, %v1170_v60  ;;  %v2505_v42 = vsub.f32 %v1142_v62, %v1170_v60  ;;  %v2511_v11 = vsub.f32 %v1143_v3, %v1170_v60 }
 0x464   : > { %v2513_v52 = vsub.f32 %v1144_v54, %v1170_v60  ;;  %v2517_v48 = vsub.f32 %v1145_v15, %v1170_v60  ;;  %v2521_v51 = vsub.f32 %v1146_v18, %v1170_v60  ;;  %v2525_v58 = vsub.f32 %v1147_v19, %v1170_v60  ;;  %v1976_v15 = vld [vmem:[%s2286_s3 + $0x10] sm:$0xff]  }
 0x465   : > { %v1181_v43 = vmul.f32 %v2501_v40, %v2501_v40  ;;  %v1182_v44 = vmul.f32 %v2503_v41, %v2503_v41  ;;  %v1183_v46 = vmul.f32 %v2505_v42, %v2505_v42  ;;  %v1184_v49 = vmul.f32 %v2511_v11, %v2511_v11  ;;  %1846 = vmatpush3.bf16.msra.mxu0 %v1976_v15  ;;  %v1980_v19 = vld [vmem:[%s2286_s3 + $0x30] sm:$0xff]  }
 0x466   : > { %v1185_v53 = vmul.f32 %v2513_v52, %v2513_v52  ;;  %v1186_v59 = vmul.f32 %v2517_v48, %v2517_v48  ;;  %v2529_v56 = vsub.f32 %v1149_v57, %v1170_v60  ;;  %v2531_v61 = vsub.f32 %v1148_v14, %v1170_v60  ;;  %1887 = vmatpush3.bf16.msra.mxu1 %v1976_v15 }
 0x467   : > { %v1191_v47 = vadd.f32 %v1182_v44, %v1181_v43  ;;  %v1187_v62 = vmul.f32 %v2521_v51, %v2521_v51  ;;  %v1188_v0 = vmul.f32 %v2525_v58, %v2525_v58  ;;  %1847 = vmatprep.subr.bf16.mxu0 %v2081_v16  ;;  %1880 = vmatprep.subr.bf16.mxu1 %v2081_v16  ;;  %v1732_v43 = vld [vmem:[%s642_s21] ss:$0 sm:$0xff] }
 0x468   : > { %v1190_v3 = vmul.f32 %v2529_v56, %v2529_v56  ;;  %v1189_v4 = vmul.f32 %v2531_v61, %v2531_v61 }
 0x469   : > { %v1192_v50 = vadd.f32 %v1191_v47, %v1183_v46  ;;  %1848 = vmatpush3.bf16.msra.mxu0 %v1977_v17 }
 0x46a   : > { %v1199_v7 = vsel %vm876_vm14, %v1190_v3, 0.0  ;;  %1888 = vmatpush3.bf16.msra.mxu1 %v1977_v17  ;;  %1849 = vmatprep.subr.bf16.mxu0 %v2081_v16 }
 0x46b   : > { %v1193_v39 = vadd.f32 %v1192_v50, %v1184_v49  ;;  %1881 = vmatprep.subr.bf16.mxu1 %v2081_v16 }
 0x46d   : > { %v1194_v45 = vadd.f32 %v1193_v39, %v1185_v53  ;;  %1850 = vmatpush3.bf16.msra.mxu0 %v1978_v1 }
 0x46e   : > { %1889 = vmatpush3.bf16.msra.mxu1 %v1978_v1  ;;  %1851 = vmatprep.subr.bf16.mxu0 %v2081_v16  ;;  %v1733_v1 = vld [vmem:[%s650_s28] ss:$0 sm:$0xff] }
 0x46f   : > { %v1195_v63 = vadd.f32 %v1194_v45, %v1186_v59  ;;  %1882 = vmatprep.subr.bf16.mxu1 %v2081_v16 }
 0x471   : > { %v1196_v22 = vadd.f32 %v1195_v63, %v1187_v62  ;;  %1852 = vmatpush3.bf16.msra.mxu0 %v1979_v2 }
 0x472   : > { %1890 = vmatpush3.bf16.msra.mxu1 %v1979_v2  ;;  %1853 = vmatprep.subr.bf16.mxu0 %v2081_v16 }
 0x473   : > { %v1197_v5 = vadd.f32 %v1196_v22, %v1188_v0  ;;  %1883 = vmatprep.subr.bf16.mxu1 %v2081_v16 }
 0x475   : > { %v1198_v6 = vadd.f32 %v1197_v5, %v1189_v4  ;;  %1854 = vmatpush3.bf16.msra.mxu0 %v1980_v19 }
 0x476   : > { %1891 = vmatpush3.bf16.msra.mxu1 %v1980_v19  ;;  %1855 = vmatprep.subr.bf16.mxu0 %v2081_v16 }
 0x477   : > { %v1200_v54 = vadd.f32 %v1199_v7, %v1198_v6  ;;  %1884 = vmatprep.subr.bf16.mxu1 %v2081_v16 }
 0x479   : > { %1201 = vadd.xlane.f32.xlu1 %v1200_v54  ;;  %1856 = vmatpush3.bf16.msra.mxu0 %v1981_v8 }
 0x47a   : > { %1892 = vmatpush3.bf16.msra.mxu1 %v1981_v8 }
 0x506   : > { %v1202_v18 = vpop.xlane.xlu1 %1201 }
 0x507   : > { %v1203_v10 = vrot.slane %v1202_v18, 4 }
 0x509   : > { %v1204_v57 = vadd.f32 %v1203_v10, %v1202_v18 }
 0x50b   : > { %v1205_v14 = vrot.slane %v1204_v57, 2 }
 0x50d   : > { %v1206_v9 = vadd.f32 %v1205_v14, %v1204_v57 }
 0x50f   : > { %v1207_v25 = vrot.slane %v1206_v9, 1 }
 0x511   : > { %v1208_v28 = vadd.f32 %v1207_v25, %v1206_v9 }
 0x513   : > { %1902 = vpush %v1208_v28 }
 0x544   : > { %s1903_s29 = spop %1902 }
 0x545   : > { %s1210_s17 = smul.f32 9.889241e-05, %s1903_s29 }
 0x547   : > { %s1211_s19 = sadd.f32 1e-05, %s1210_s17 }
 0x549   : > { %v1212_v31 = vstv %s1211_s19 }
 0x54a   : > { %1984 = vrsqrt.f32 %v1212_v31 }
 0x554   : > { %v1985_v34 = vpop.eup %1984 }
 0x555   : > { %1904 = vpush %v1985_v34 }
 0x586   : > { %s1905_s3 = spop %1904 }
 0x587   : > { %v1215_v35 = vstv %s1905_s3 }
 0x588   : > { %v1216_v37 = vmul.f32 %v1215_v35, %v2501_v40  ;;  %v1217_v12 = vmul.f32 %v1215_v35, %v2503_v41  ;;  %v1218_v38 = vmul.f32 %v1215_v35, %v2505_v42  ;;  %v1219_v60 = vmul.f32 %v1215_v35, %v2511_v11 }
 0x589   : > { %v1220_v44 = vmul.f32 %v1215_v35, %v2513_v52  ;;  %v1221_v46 = vmul.f32 %v1215_v35, %v2517_v48  ;;  %v1222_v48 = vmul.f32 %v1215_v35, %v2521_v51  ;;  %v1223_v0 = vmul.f32 %v1215_v35, %v2525_v58 }
 0x58a   : > { %v1233_v47 = vmul.f32 %v1731_v36, %v1216_v37  ;;  %v1234_v49 = vmul.f32 %v1731_v36, %v1217_v12  ;;  %v1235_v50 = vmul.f32 %v1731_v36, %v1218_v38  ;;  %v1236_v53 = vmul.f32 %v1731_v36, %v1219_v60 }
 0x58b   : > { %v1237_v11 = vmul.f32 %v1731_v36, %v1220_v44  ;;  %v1238_v62 = vmul.f32 %v1731_v36, %v1221_v46  ;;  %v1239_v3 = vmul.f32 %v1731_v36, %v1222_v48  ;;  %v1240_v4 = vmul.f32 %v1731_v36, %v1223_v0 }
 0x58c   : > { %v1250_v40 = vadd.f32 %v1732_v43, %v1233_v47  ;;  %v1251_v39 = vadd.f32 %v1732_v43, %v1234_v49  ;;  %v1252_v41 = vadd.f32 %v1732_v43, %v1235_v50  ;;  %v1253_v59 = vadd.f32 %v1732_v43, %v1236_v53 }
 0x58d   : > { %v1254_v52 = vadd.f32 %v1732_v43, %v1237_v11  ;;  %v1255_v63 = vadd.f32 %v1732_v43, %v1238_v62  ;;  %v1256_v5 = vadd.f32 %v1732_v43, %v1239_v3  ;;  %v1257_v6 = vadd.f32 %v1732_v43, %v1240_v4 }
 0x58e   : > { %v1260_v42 = vpack.c.bf16 %v1251_v39, %v1250_v40  ;;  %v1261_v45 = vpack.c.bf16 %v1253_v59, %v1252_v41  ;;  %v1224_v7 = vmul.f32 %v1215_v35, %v2531_v61  ;;  %v1225_v54 = vmul.f32 %v1215_v35, %v2529_v56 }
 0x58f   : > { %v1262_v22 = vpack.c.bf16 %v1255_v63, %v1254_v52  ;;  %v1263_v13 = vpack.c.bf16 %v1257_v6, %v1256_v5  ;;  %v1487_v63 = vld [vmem:[%s2295_s6 + $0x24] sm:$0xf] (!%p1742_p0) }
 0x590   : > { %1858 = vmatmul.mubr.bf16.vlgmr.msra.gmra.mrb[20].mxu0 %v1260_v42  ;;  %1862 = vmatmul.mubr.bf16.vlgmr.msra.gmra.mrb[0].mxu1 %v1261_v45  ;;  %v1241_v55 = vmul.f32 %v1731_v36, %v1224_v7  ;;  %v1242_v15 = vmul.f32 %v1731_v36, %v1225_v54 }
 0x591   : > { %1865 = vmatprep.mubr.msk.bf16.mxu1 %vm2082_vm2, %v2081_v16 }
 0x592   : > { %v1258_v51 = vadd.f32 %v1732_v43, %v1241_v55  ;;  %v1259_v58 = vadd.f32 %v1732_v43, %v1242_v15 }
 0x594   : > { %v1264_v17 = vpack.c.bf16 %v1259_v58, %v1258_v51 }
 0x598   : > { %1866 = vmatmul.mubr.bf16.gmra.mrb[4].mxu1 %v1262_v22 }
 0x599   : > { %1869 = vmatprep.mubr.msk.bf16.mxu1 %vm2082_vm2, %v2081_v16 }
 0x5a0   : > { %1870 = vmatmul.mubr.bf16.gmra.mrb[8].mxu1 %v1263_v13 }
 0x5a1   : > { %1873 = vmatprep.mubr.msk.bf16.mxu1 %vm2082_vm2, %v2081_v16  ;;  %vm1428_vm2 = vcmask 522240  }
 0x5a8   : > { %1874 = vmatmul.mubr.bf16.gmra.mrb[12].mxu1 %v1264_v17 }
 0x663   : > { %v1370_v2 = vpop.f32.mrb[20].mxu0  ;;  %v1378_v61 = vpop.f32.mrb[0].mxu1 }
 0x664   : > { %v1371_v18 = vadd.f32 %v1733_v1, %v1370_v2  ;;  %v1379_v56 = vadd.f32 %v1733_v1, %v1378_v61  ;;  %v1859_v10 = vpop.f32.mrb[21].mxu0  ;;  %v1863_v19 = vpop.f32.mrb[1].mxu1 }
 0x665   : > { %v1373_v57 = vpop.f32.mrb[22].mxu0  ;;  %v1381_v8 = vpop.f32.mrb[2].mxu1 }
 0x666   : > { %v1409_v14 = vadd.f32 %v1371_v18, %v2322_v20  ;;  %v1411_v16 = vadd.f32 %v1379_v56, %v2333_v23  ;;  %v1374_v9 = vadd.f32 %v1733_v1, %v1373_v57  ;;  %v1382_v25 = vadd.f32 %v1733_v1, %v1381_v8  ;;  %v1860_v28 = vpop.f32.mrb[23].mxu0  ;;  %v1864_v31 = vpop.f32.mrb[3].mxu1 }
 0x668   : > { %1419 = vst.msk [vmem:[#allocation2] sm:$0xff] %vm747_vm3, %v1409_v14  ;;  %1421 = vst.msk [vmem:[#allocation2 + $0x10] sm:$0xff] %vm747_vm3, %v1411_v16  ;;  %v1410_v34 = vadd.f32 %v1374_v9, %v2324_v21  ;;  %v1412_v35 = vadd.f32 %v1382_v25, %v2335_v24  ;;  %v1759_v45 = vpack.c.bf16 (!%p1742_p0), %v1411_v16, %v1411_v16 }
 0x66a   : > { %1420 = vst.msk [vmem:[#allocation2 + $0x8] sm:$0xff] %vm747_vm3, %v1410_v34  ;;  %1422 = vst.msk [vmem:[#allocation2 + $0x18] sm:$0xff] %vm747_vm3, %v1412_v35  ;;  %v1760_v11 = vpack.c.bf16 (!%p1742_p0), %v1412_v35, %v1412_v35 }
 0x66b   : > { %v1386_v36 = vpop.f32.mrb[4].mxu1  ;;  %1477 = vst.msk [vmem:[%s2295_s6 + $0x8] sm:$0xf] (!%p1742_p0), %vm1474_vm11, %v1759_v45 }
 0x66c   : > { %v1387_v20 = vadd.f32 %v1733_v1, %v1386_v36  ;;  %v1867_v37 = vpop.f32.mrb[5].mxu1  ;;  %1478 = vst.msk [vmem:[%s2295_s6 + $0xc] sm:$0xf] (!%p1742_p0), %vm1474_vm11, %v1760_v11 }
 0x66d   : > { %v1389_v23 = vpop.f32.mrb[6].mxu1 }
 0x66e   : > { %v1413_v12 = vadd.f32 %v1387_v20, %v2342_v26  ;;  %v1390_v38 = vadd.f32 %v1733_v1, %v1389_v23  ;;  %v1868_v60 = vpop.f32.mrb[7].mxu1 }
 0x670   : > { %1423 = vst.msk [vmem:[#allocation2 + $0x20] sm:$0xff] %vm747_vm3, %v1413_v12  ;;  %v1414_v43 = vadd.f32 %v1390_v38, %v2344_v27  ;;  %v1761_v62 = vpack.c.bf16 (!%p1742_p0), %v1413_v12, %v1413_v12 }
 0x672   : > { %1424 = vst.msk [vmem:[#allocation2 + $0x28] sm:$0xff] %vm747_vm3, %v1414_v43 }
 0x673   : > { %v1394_v21 = vpop.f32.mrb[8].mxu1  ;;  %1479 = vst.msk [vmem:[%s2295_s6 + $0x10] sm:$0xf] (!%p1742_p0), %vm1474_vm11, %v1761_v62 }
 0x674   : > { %v1395_v24 = vadd.f32 %v1733_v1, %v1394_v21  ;;  %v1871_v44 = vpop.f32.mrb[9].mxu1 }
 0x675   : > { %v1397_v46 = vpop.f32.mrb[10].mxu1 }
 0x676   : > { %v1415_v47 = vadd.f32 %v1395_v24, %v2351_v29  ;;  %v1398_v49 = vadd.f32 %v1733_v1, %v1397_v46  ;;  %v1872_v50 = vpop.f32.mrb[11].mxu1 }
 0x678   : > { %1425 = vst.msk [vmem:[#allocation2 + $0x30] sm:$0xff] %vm747_vm3, %v1415_v47  ;;  %v1416_v26 = vadd.f32 %v1398_v49, %v2353_v30  ;;  %v1757_v30 = vpack.c.bf16 (!%p1742_p0), %v1409_v14, %v1409_v14  ;;  %v1763_v52 = vpack.c.bf16 (!%p1742_p0), %v1415_v47, %v1415_v47 }
 0x67a   : > { %1426 = vst.msk [vmem:[#allocation2 + $0x38] sm:$0xff] %vm747_vm3, %v1416_v26  ;;  %v1764_v48 = vpack.c.bf16 (!%p1742_p0), %v1416_v26, %v1416_v26 }
 0x67b   : > { %v1402_v53 = vpop.f32.mrb[12].mxu1  ;;  %1475 = vst.msk [vmem:[%s2295_s6] sm:$0xf] (!%p1742_p0), %vm1474_vm11, %v1757_v30  ;;  %1481 = vst.msk [vmem:[%s2295_s6 + $0x18] sm:$0xf] (!%p1742_p0), %vm1474_vm11, %v1763_v52 }
 0x67c   : > { %v1403_v40 = vadd.f32 %v1733_v1, %v1402_v53  ;;  %v1875_v39 = vpop.f32.mrb[13].mxu1  ;;  %1433 = sbr.rel (%p1742_p0) target bundleno = 1670 (0x686), region = 88  ;;  %1482 = vst.msk [vmem:[%s2295_s6 + $0x1c] sm:$0xf] (!%p1742_p0), %vm1474_vm11, %v1764_v48 }
 0x67d   : > { %v1405_v27 = vpop.f32.mrb[14].mxu1 }
 0x67e   : > { %v1417_v41 = vadd.f32 %v1403_v40, %v2360_v32  ;;  %v1406_v59 = vadd.f32 %v1733_v1, %v1405_v27  ;;  %v1876_v42 = vpop.f32.mrb[15].mxu1  ;;  %v1758_v32 = vpack.c.bf16 (!%p1742_p0), %v1410_v34, %v1410_v34 }
 0x680   : > { %1427 = vst.msk [vmem:[#allocation2 + $0x40] sm:$0xff] %vm747_vm3, %v1417_v41  ;;  %v1418_v29 = vadd.f32 %v1406_v59, %v2362_v33  ;;  %v1762_v33 = vpack.c.bf16 (!%p1742_p0), %v1414_v43, %v1414_v43  ;;  %v1765_v0 = vpack.c.bf16 (!%p1742_p0), %v1417_v41, %v1417_v41  ;;  %vm1485_vm3 = vsmask.f32 (!%p1742_p0), 3328 }
 0x681   : > { %1476 = vst.msk [vmem:[%s2295_s6 + $0x4] sm:$0xf] (!%p1742_p0), %vm1474_vm11, %v1758_v32  ;;  %vm1486_vm12 = vmand (!%p1742_p0), %vm1474_vm11, %vm1485_vm3 }
 0x682   : > { %1429 = vst.msk [vmem:[#allocation2 + $0x48] sm:$0x7f] %vm1428_vm2, %v1418_v29  ;;  %v1766_v22 = vpack.c.bf16 (!%p1742_p0), %v1418_v29, %v1418_v29 }
 0x683   : > { %1480 = vst.msk [vmem:[%s2295_s6 + $0x14] sm:$0xf] %vm1474_vm11, %v1762_v33  ;;  %1483 = vst.msk [vmem:[%s2295_s6 + $0x20] sm:$0xf] %vm1474_vm11, %v1765_v0 }
 0x684   : > { %v1488_v3 = vsel %vm1486_vm12, %v1766_v22, %v1487_v63 }
 0x685   : > { %1489 = vst [vmem:[%s2295_s6 + $0x24] sm:$0xf] %v1488_v3 }
 0x686 PF: > { %s2703_s25 = sld [smem:[#allocation16_spill]]  ;;  %s2704_s18 = sld [smem:[#allocation14_spill]] }
 0x687   : > { %s2705_s19 = sld [smem:[#allocation15_spill]]  ;;  %s2706_s0 = sld [smem:[#allocation17_spill]] }
 0x688   : > { %s2707_s20 = sld [smem:[#allocation18_spill]] }
 0x68c   : > { %s32_s21 = sadd.s32 1, %s2703_s25  }
 0x68d   : > { %p29_p4 = scmp.ge.s32.totalorder %s32_s21, 18  }
 0x68f   :  { %31 = sbr.rel (!%p29_p4) target bundleno = 21 (0x15), region = 151 }
 0x696   :  { %1511 = vsyncpa [#allocation7], 1 }
 0x697   :  { %1513 = vsyncpa [#allocation7 + $0x1], 1 }
 0x698   :  { %1514 = vsyncpa [#allocation9], 1 }

</bundles_post_ra>
